<compile_context>
chip_gen: v6e
topology: v6e:2x2x1
jax: 0.10.0
libtpu: 0.0.40
codegen_flags: <defaults>
</compile_context>

<pallas_src>
import numpy as np
import jax
import jax.numpy as jnp
from jax.experimental import pallas as pl
from jax.experimental.pallas import tpu as pltpu

F32 = jnp.float32
BF16 = jnp.bfloat16

_SOBEL_X = np.array([[1., 0., -1.], [2., 0., -2.], [1., 0., -1.]], np.float32)
_SOBEL_Y = np.array([[1., 2., 1.], [0., 0., 0.], [-1., -2., -1.]], np.float32)
_LAPLACIAN = np.array([[0., 1., 0.], [1., -4., 1.], [0., 1., 0.]], np.float32)

_BLOCK_KEYS = ("c1W", "c1b", "a1", "c2W", "c2b", "rteW", "rteb", "art",
               "rt2W", "rt2b", "erW", "erb", "saW", "fcw", "fcb", "fw", "fb")
_CONST_KEYS = ("Mstat", "Eg", "Rc", "Ec", "finW", "finb")


# ---------------------------------------------------------------------------
# Fused REG kernel (one grid step per EGRAB block; last step adds final conv)
# ---------------------------------------------------------------------------
def _make_reg_kernel(B, H, W, C):
    assert C & (C - 1) == 0, "C must be a power of two (group-max shift tree)"
    WC = W * C
    BH = B * H
    TW = 2 * W

    def conv3(pad_ref, x, w_ref, bias, alpha=None):
        """'same' 3x3 conv in the folded (rows, W*Cin) layout -> ONE matmul.

        x: (B*H, W*Cin) f32.  w_ref: stacked banded (3*W*Cin, W*Cout) weights.
        The persistent pad scratch keeps its top/bottom rows at zero.
        """
        wc_in = x.shape[-1]
        pad_ref[:, 1:H + 1, 0:wc_in] = x.reshape(B, H, wc_in)
        wmat = w_ref[...]
        op = jnp.concatenate(
            [pad_ref[:, dy:dy + H, 0:wc_in] for dy in range(3)], axis=-1)
        y = jnp.dot(op.reshape(BH, 3 * wc_in).astype(wmat.dtype), wmat,
                    preferred_element_type=F32) + bias
        if alpha is not None:                       # PReLU, per-lane alpha
            y = jnp.where(y >= 0.0, y, alpha * y)
        return y

    def group_max(x):
        """After the tree, lane w*C holds max over the C lanes of pixel w."""
        s = 1
        while s < C:
            x = jnp.maximum(x, jnp.concatenate([x[:, s:], x[:, :s]], axis=-1))
            s *= 2
        return x

    def kernel(x_ref,
               c1W, c1b, a1, c2W, c2b, rteW, rteb, art, rt2W, rt2b,
               erW, erb, saW, fcw, fcb, fw, fb,
               Mstat, Eg, Rc, Ec, finW, finb,
               o_ref, pad_ref, sap_ref):
        step = pl.program_id(0)
        nb = pl.num_programs(0)

        @pl.when(step == 0)
        def _init():
            o_ref[...] = x_ref[...]                  # activation carry
            pad_ref[...] = jnp.zeros_like(pad_ref)   # conv zero-pad rows
            sap_ref[...] = jnp.zeros_like(sap_ref)   # SA zero-pad rows

        act = o_ref[...].reshape(BH, WC)             # (B*H, W*C), f32

        # --- EGRAB body: conv3 -> PReLU -> conv3 ---------------------------
        t1 = conv3(pad_ref, act, c1W, c1b[...], a1[...])
        t = conv3(pad_ref, t1, c2W, c2b[...])

        # --- recon_trunk conv1 fused (along N) with the 3 EdgeConv 1x1s ----
        y = conv3(pad_ref, t, rteW, rteb[...])       # (BH, 4*WC)
        rt = y[:, :WC]
        e = y[:, WC:]                                # (BH, 3*WC)
        rt = jnp.where(rt >= 0.0, rt, art[...] * rt)
        out = conv3(pad_ref, rt, rt2W, rt2b[...]) + t

        # --- fixed edge filters + conv_reduce (folded 3x3, 3C -> C) --------
        feas = conv3(pad_ref, e, erW, erb[...])      # (BH, WC)

        # --- SpatialAttention ----------------------------------------------
        mtree = group_max(feas)
        stats = jnp.dot(jnp.concatenate([feas, mtree], axis=-1), Mstat[...],
                        preferred_element_type=F32)  # (BH, 2W) = [avg | max]
        sap_ref[:, 3:H + 3, :] = stats.reshape(B, H, TW)
        sa_op = jnp.concatenate(
            [sap_ref[:, dy:dy + H, :] for dy in range(7)], axis=-1)
        gate = jax.nn.sigmoid(
            jnp.dot(sa_op.reshape(BH, 7 * TW), saW[...],
                    preferred_element_type=F32))     # (BH, W)
        feas = feas * jnp.dot(gate, Eg[...], preferred_element_type=F32)

        # --- selective (SK) channel attention -------------------------------
        U = out + feas
        Usum = jnp.sum(U.reshape(B, H, WC), axis=1)  # per-batch spatial sum
        s = jnp.dot(Usum, Rc[...], preferred_element_type=F32)      # (B, C)
        z = jnp.dot(s, fcw[...], preferred_element_type=F32) + fcb[...]
        v = jnp.dot(z, fw[...], preferred_element_type=F32) + fb[...]
        a0 = jax.nn.sigmoid(v[:, :C] - v[:, C:])     # exact 2-way softmax
        a0w = jnp.dot(a0, Ec[...], preferred_element_type=F32)      # (B, WC)
        a0b = jnp.broadcast_to(a0w.reshape(B, 1, WC),
                               (B, H, WC)).reshape(BH, WC)
        res = feas + (out - feas) * a0b              # out*a0 + feas*(1-a0)

        new_act = res + act                          # EGRAB residual
        o_ref[...] = new_act.reshape(B, H, WC)

        @pl.when(step == nb - 1)
        def _final():                                # final conv + REG residual
            fin = conv3(pad_ref, new_act, finW, finb[...])
            o_ref[...] = fin.reshape(B, H, WC) + x_ref[...]

    return kernel


# ---------------------------------------------------------------------------
# pallas_call wrapper
# ---------------------------------------------------------------------------
def reg_forward(x_nchw, packed):
    """x_nchw: (B, C, H, W) float32 (PyTorch layout)."""
    B, C, H, W = x_nchw.shape
    WC = W * C
    # fold once to the lane-dense (B, H, W*C) layout at the boundary
    x = jnp.transpose(x_nchw, (0, 2, 3, 1)).reshape(B, H, WC)

    blk = packed["block"]
    cst = packed["const"]
    nb = blk["c1W"].shape[0]

    blk_specs = [pl.BlockSpec((None,) + tuple(blk[k].shape[1:]),
                              lambda s: (s, 0, 0)) for k in _BLOCK_KEYS]
    cst_specs = [pl.BlockSpec(tuple(cst[k].shape), lambda s: (0, 0))
                 for k in _CONST_KEYS]

    y = pl.pallas_call(
        _make_reg_kernel(B, H, W, C),
        out_shape=jax.ShapeDtypeStruct((B, H, WC), F32),
        grid=(nb,),
        in_specs=([pl.BlockSpec((B, H, WC), lambda s: (0, 0, 0))]
                  + blk_specs + cst_specs),
        out_specs=pl.BlockSpec((B, H, WC), lambda s: (0, 0, 0)),
        scratch_shapes=[
            pltpu.VMEM((B, H + 2, 3 * WC), F32),   # conv zero-pad scratch
            pltpu.VMEM((B, H + 6, 2 * W), F32),    # SA [avg|max] pad scratch
        ],
        compiler_params=pltpu.CompilerParams(
            dimension_semantics=("arbitrary",)),
    )(x, *[blk[k] for k in _BLOCK_KEYS], *[cst[k] for k in _CONST_KEYS])

    return jnp.transpose(y.reshape(B, H, W, C), (0, 3, 1, 2))


# ---------------------------------------------------------------------------
# Parameters: synthetic init + host-side packing into banded / folded form
# ---------------------------------------------------------------------------
def init_raw_params(key, C, d, K, n_resblocks):
    assert K == 3
    keys = iter(jax.random.split(key, 64 * (n_resblocks + 1)))
    nxt = lambda: next(keys)
    nrm = lambda shape, s=0.05: s * jax.random.normal(nxt(), shape, F32)
    blocks = []
    for _ in range(n_resblocks):
        blocks.append(dict(
            c1_w=nrm((K, K, C, C)), c1_b=nrm((C,)),
            prelu1=jnp.full((C,), 0.25, F32),        # nn.PReLU() default init
            c2_w=nrm((K, K, C, C)), c2_b=nrm((C,)),
            rt1_w=nrm((3, 3, C, C)), rt1_b=nrm((C,)),
            rt_prelu=jnp.full((C,), 0.25, F32),
            rt2_w=nrm((3, 3, C, C)), rt2_b=nrm((C,)),
            ec_w1=nrm((3, C, C)), ec_b1=nrm((3, C)),
            edge_scale=1.0 + nrm((3, C), 0.2), edge_bias=nrm((3, C)),
            red_w=nrm((3 * C, C)), red_b=nrm((C,)),
            sa_w=nrm((7, 7, 2), 0.1),
            fc_w=nrm((C, d)), fc_b=nrm((d,)),
            f0_w=nrm((d, C)), f0_b=nrm((C,)),
            f1_w=nrm((d, C)), f1_b=nrm((C,)),
        ))
    fin = dict(w=nrm((K, K, C, C)), b=nrm((C,)))
    return dict(blocks=blocks, fin=fin)


def _banded(wt, W):
    """(Kh, Kw, Cin, Cout) -> (Kh, W*Cin, W*Cout) banded row-tap matrices for
    the folded (w-major, c-minor) layout with 'same' zero padding."""
    wt = np.asarray(wt, np.float32)
    kh, kw, cin, cout = wt.shape
    p = kw // 2
    M = np.zeros((kh, W * cin, W * cout), np.float32)
    for dy in range(kh):
        for wo in range(W):
            for dx in range(kw):
                wi = wo + dx - p
                if 0 <= wi < W:
                    M[dy, wi * cin:(wi + 1) * cin,
                      wo * cout:(wo + 1) * cout] = wt[dy, dx]
    return M


def _banded_stacked(wt, W):
    M = _banded(wt, W)
    kh, rin, rout = M.shape
    return M.reshape(kh * rin, rout)          # tap-major rows, one matmul


def _fold_vec(v, W):
    return np.tile(np.asarray(v, np.float32).reshape(-1), W)[None, :]


def pack_params(raw, H, W, C):
    WC = W * C
    edge_k = np.stack([_SOBEL_X, _SOBEL_Y, _LAPLACIAN])     # (3, 3, 3)
    acc = {k: [] for k in _BLOCK_KEYS}

    for blk in raw["blocks"]:
        acc["c1W"].append(_banded_stacked(blk["c1_w"], W))
        acc["c1b"].append(_fold_vec(blk["c1_b"], W))
        acc["a1"].append(_fold_vec(blk["prelu1"], W))
        acc["c2W"].append(_banded_stacked(blk["c2_w"], W))
        acc["c2b"].append(_fold_vec(blk["c2_b"], W))

        # recon_trunk conv1 (3x3, C->C) fused along N with the three EdgeConv
        # 1x1s (C->3C, placed as the center tap of the banded 3x3).
        rt1_band = _banded(blk["rt1_w"], W)                  # (3, WC, WC)
        w1 = np.asarray(blk["ec_w1"], np.float32)            # (3, Cin, Cout)
        wcat = np.transpose(w1, (1, 0, 2)).reshape(C, 3 * C)
        ec_band = np.zeros((3, WC, 3 * WC), np.float32)
        ec_band[1] = _banded(wcat[None, None], W)[0]
        rte_band = np.concatenate([rt1_band, ec_band], axis=2)
        acc["rteW"].append(rte_band.reshape(3 * WC, 4 * WC))
        acc["rteb"].append(np.concatenate(
            [_fold_vec(blk["rt1_b"], W), _fold_vec(blk["ec_b1"], W)], axis=1))
        acc["art"].append(_fold_vec(blk["rt_prelu"], W))

        acc["rt2W"].append(_banded_stacked(blk["rt2_w"], W))
        acc["rt2b"].append(_fold_vec(blk["rt2_b"], W))

        # fixed depthwise edge filters (per-channel scale/bias) + conv_reduce
        # folded into a single 3x3 conv (3C -> C).
        scale = np.asarray(blk["edge_scale"], np.float32).reshape(3 * C)
        ebias = np.asarray(blk["edge_bias"], np.float32).reshape(3 * C)
        red_w = np.asarray(blk["red_w"], np.float32)         # (3C, C)
        red_b = np.asarray(blk["red_b"], np.float32)         # (C,)
        kmat = edge_k[np.repeat(np.arange(3), C)]            # (3C, 3, 3)
        wt_er = (np.transpose(kmat, (1, 2, 0))[:, :, :, None]
                 * scale[None, None, :, None]
                 * red_w[None, None, :, :])                  # (3, 3, 3C, C)
        acc["erW"].append(_banded_stacked(wt_er, W))
        acc["erb"].append(_fold_vec(red_b + ebias @ red_w, W))

        # SpatialAttention 7x7 conv over planar [avg | max] maps -> one matmul
        saw = np.asarray(blk["sa_w"], np.float32)            # (7, 7, 2)
        sa_M = np.zeros((7, 2 * W, W), np.float32)
        for dy in range(7):
            for wo in range(W):
                for dx in range(7):
                    wi = wo + dx - 3
                    if 0 <= wi < W:
                        sa_M[dy, wi, wo] = saw[dy, dx, 0]
                        sa_M[dy, W + wi, wo] = saw[dy, dx, 1]
        acc["saW"].append(sa_M.reshape(7 * 2 * W, W))

        acc["fcw"].append(np.asarray(blk["fc_w"], np.float32))
        acc["fcb"].append(np.asarray(blk["fc_b"], np.float32)[None, :])
        acc["fw"].append(np.concatenate(
            [np.asarray(blk["f0_w"], np.float32),
             np.asarray(blk["f1_w"], np.float32)], axis=1))   # (d, 2C)
        acc["fb"].append(np.concatenate(
            [np.asarray(blk["f0_b"], np.float32),
             np.asarray(blk["f1_b"], np.float32)])[None, :])  # (1, 2C)

    bf16_keys = ("c1W", "c2W", "rteW", "rt2W", "erW")         # big banded mats
    block = {k: jnp.asarray(np.stack(v), BF16 if k in bf16_keys else F32)
             for k, v in acc.items()}

    # shared constant fold/expand matrices for the (rows, W*C) layout
    Mstat = np.zeros((2 * WC, 2 * W), np.float32)  # [feas|group-max] -> [avg|max]
    Eg = np.zeros((W, WC), np.float32)             # per-pixel gate -> W*C lanes
    Rc = np.zeros((WC, C), np.float32)             # spatial mean per channel
    Ec = np.zeros((C, WC), np.float32)             # per-channel attn -> W*C lanes
    for w in range(W):
        for c in range(C):
            j = w * C + c
            Mstat[j, w] = 1.0 / C
            Eg[w, j] = 1.0
            Rc[j, c] = 1.0 / (H * W)
            Ec[c, j] = 1.0
        Mstat[WC + w * C, W + w] = 1.0

    const = dict(
        Mstat=jnp.asarray(Mstat), Eg=jnp.asarray(Eg),
        Rc=jnp.asarray(Rc), Ec=jnp.asarray(Ec),
        finW=jnp.asarray(_banded_stacked(raw["fin"]["w"], W), BF16),
        finb=jnp.asarray(_fold_vec(raw["fin"]["b"], W)),
    )
    return dict(block=block, const=const)


# ---------------------------------------------------------------------------
if __name__ == "__main__":
    key = jax.random.PRNGKey(0)
    kx, kp = jax.random.split(key)

    B, C, H, W = 2, 8, 16, 16      # NCHW input; W*C = 128 (lane-dense folded)
    K = 3                          # default_conv kernel size
    n_resblocks = 2
    d = max(C // 2, 32)            # CoreModule: d = max(features / r, L)

    x = jax.random.normal(kx, (B, C, H, W), F32)
    raw = init_raw_params(kp, C, d, K, n_resblocks)
    packed = pack_params(raw, H, W, C)

    fwd = jax.jit(reg_forward)
    y = fwd(x, packed)
    jax.block_until_ready(y)
    assert y.shape == (B, C, H, W) and y.dtype == F32
    print("KERNEL_OK")
</pallas_src>

<mosaic_0001>
module attributes {stable_mosaic.version = 11 : i64} {
  func.func @kernel(%arg0: i32, %arg1: memref<2x16x128xf32, #tpu.memory_space<vmem>>, %arg2: memref<1x384x128xbf16, #tpu.memory_space<vmem>>, %arg3: memref<1x1x128xf32, #tpu.memory_space<vmem>>, %arg4: memref<1x1x128xf32, #tpu.memory_space<vmem>>, %arg5: memref<1x384x128xbf16, #tpu.memory_space<vmem>>, %arg6: memref<1x1x128xf32, #tpu.memory_space<vmem>>, %arg7: memref<1x384x512xbf16, #tpu.memory_space<vmem>>, %arg8: memref<1x1x512xf32, #tpu.memory_space<vmem>>, %arg9: memref<1x1x128xf32, #tpu.memory_space<vmem>>, %arg10: memref<1x384x128xbf16, #tpu.memory_space<vmem>>, %arg11: memref<1x1x128xf32, #tpu.memory_space<vmem>>, %arg12: memref<1x1152x128xbf16, #tpu.memory_space<vmem>>, %arg13: memref<1x1x128xf32, #tpu.memory_space<vmem>>, %arg14: memref<1x224x16xf32, #tpu.memory_space<vmem>>, %arg15: memref<1x8x32xf32, #tpu.memory_space<vmem>>, %arg16: memref<1x1x32xf32, #tpu.memory_space<vmem>>, %arg17: memref<1x32x16xf32, #tpu.memory_space<vmem>>, %arg18: memref<1x1x16xf32, #tpu.memory_space<vmem>>, %arg19: memref<256x32xf32, #tpu.memory_space<vmem>>, %arg20: memref<16x128xf32, #tpu.memory_space<vmem>>, %arg21: memref<128x8xf32, #tpu.memory_space<vmem>>, %arg22: memref<8x128xf32, #tpu.memory_space<vmem>>, %arg23: memref<384x128xbf16, #tpu.memory_space<vmem>>, %arg24: memref<1x128xf32, #tpu.memory_space<vmem>>, %arg25: memref<2x16x128xf32, #tpu.memory_space<vmem>>, %arg26: memref<2x18x384xf32, #tpu.memory_space<vmem>>, %arg27: memref<2x22x32xf32, #tpu.memory_space<vmem>>) attributes {dimension_semantics = [#tpu.dimension_semantics<arbitrary>], iteration_bounds = array<i64: 2>, scalar_prefetch = 0 : i64, scratch_operands = 2 : i64, tpu.core_type = #tpu.core_type<tc>, window_params = [{pipeline_mode = #tpu.pipeline_mode<synchronous>, transform_indices = @transform_0, window_bounds = array<i64: 2, 16, 128>}, {transform_indices = @transform_1, window_bounds = array<i64: 1, 384, 128>}, {transform_indices = @transform_2, window_bounds = array<i64: 1, 1, 128>}, {transform_indices = @transform_3, window_bounds = array<i64: 1, 1, 128>}, {transform_indices = @transform_4, window_bounds = array<i64: 1, 384, 128>}, {transform_indices = @transform_5, window_bounds = array<i64: 1, 1, 128>}, {transform_indices = @transform_6, window_bounds = array<i64: 1, 384, 512>}, {transform_indices = @transform_7, window_bounds = array<i64: 1, 1, 512>}, {transform_indices = @transform_8, window_bounds = array<i64: 1, 1, 128>}, {transform_indices = @transform_9, window_bounds = array<i64: 1, 384, 128>}, {transform_indices = @transform_10, window_bounds = array<i64: 1, 1, 128>}, {transform_indices = @transform_11, window_bounds = array<i64: 1, 1152, 128>}, {transform_indices = @transform_12, window_bounds = array<i64: 1, 1, 128>}, {transform_indices = @transform_13, window_bounds = array<i64: 1, 224, 16>}, {transform_indices = @transform_14, window_bounds = array<i64: 1, 8, 32>}, {transform_indices = @transform_15, window_bounds = array<i64: 1, 1, 32>}, {transform_indices = @transform_16, window_bounds = array<i64: 1, 32, 16>}, {transform_indices = @transform_17, window_bounds = array<i64: 1, 1, 16>}, {pipeline_mode = #tpu.pipeline_mode<synchronous>, transform_indices = @transform_18, window_bounds = array<i64: 256, 32>}, {pipeline_mode = #tpu.pipeline_mode<synchronous>, transform_indices = @transform_19, window_bounds = array<i64: 16, 128>}, {pipeline_mode = #tpu.pipeline_mode<synchronous>, transform_indices = @transform_20, window_bounds = array<i64: 128, 8>}, {pipeline_mode = #tpu.pipeline_mode<synchronous>, transform_indices = @transform_21, window_bounds = array<i64: 8, 128>}, {pipeline_mode = #tpu.pipeline_mode<synchronous>, transform_indices = @transform_22, window_bounds = array<i64: 384, 128>}, {pipeline_mode = #tpu.pipeline_mode<synchronous>, transform_indices = @transform_23, window_bounds = array<i64: 1, 128>}, {pipeline_mode = #tpu.pipeline_mode<synchronous>, transform_indices = @transform_24, window_bounds = array<i64: 2, 16, 128>}]} {
    %c0_i32 = arith.constant 0 : i32
    %0 = arith.cmpi eq, %arg0, %c0_i32 : i32
    %1 = arith.extui %0 : i1 to i32
    %c0_i32_0 = arith.constant 0 : i32
    %2 = arith.cmpi ne, %1, %c0_i32_0 : i32
    scf.if %2 {
      %c0_160 = arith.constant 0 : index
      %c0_161 = arith.constant 0 : index
      %c0_162 = arith.constant 0 : index
      %176 = vector.load %arg1[%c0_160, %c0_161, %c0_162] : memref<2x16x128xf32, #tpu.memory_space<vmem>>, vector<2x16x128xf32>
      %c0_163 = arith.constant 0 : index
      %c0_164 = arith.constant 0 : index
      %c0_165 = arith.constant 0 : index
      %177 = vector.load %arg25[%c0_163, %c0_164, %c0_165] : memref<2x16x128xf32, #tpu.memory_space<vmem>>, vector<2x16x128xf32>
      tpu.vector_store %arg25[%c0_163, %c0_164, %c0_165], %176 {strides = array<i32>} : memref<2x16x128xf32, #tpu.memory_space<vmem>>, vector<2x16x128xf32>,
      %cst_166 = arith.constant 0.000000e+00 : f32
      %178 = vector.broadcast %cst_166 : f32 to vector<2x18x384xf32>
      %c0_167 = arith.constant 0 : index
      %c0_168 = arith.constant 0 : index
      %c0_169 = arith.constant 0 : index
      %179 = vector.load %arg26[%c0_167, %c0_168, %c0_169] : memref<2x18x384xf32, #tpu.memory_space<vmem>>, vector<2x18x384xf32>
      tpu.vector_store %arg26[%c0_167, %c0_168, %c0_169], %178 {strides = array<i32>} : memref<2x18x384xf32, #tpu.memory_space<vmem>>, vector<2x18x384xf32>,
      %cst_170 = arith.constant 0.000000e+00 : f32
      %180 = vector.broadcast %cst_170 : f32 to vector<2x22x32xf32>
      %c0_171 = arith.constant 0 : index
      %c0_172 = arith.constant 0 : index
      %c0_173 = arith.constant 0 : index
      %181 = vector.load %arg27[%c0_171, %c0_172, %c0_173] : memref<2x22x32xf32, #tpu.memory_space<vmem>>, vector<2x22x32xf32>
      tpu.vector_store %arg27[%c0_171, %c0_172, %c0_173], %180 {strides = array<i32>} : memref<2x22x32xf32, #tpu.memory_space<vmem>>, vector<2x22x32xf32>,
    } else {
    }
    %c0 = arith.constant 0 : index
    %c0_1 = arith.constant 0 : index
    %c0_2 = arith.constant 0 : index
    %3 = vector.load %arg25[%c0, %c0_1, %c0_2] : memref<2x16x128xf32, #tpu.memory_space<vmem>>, vector<2x16x128xf32>
    %4 = vector.shape_cast %3 : vector<2x16x128xf32> to vector<32x128xf32>
    %c0_3 = arith.constant 0 : index
    %c0_4 = arith.constant 0 : index
    %c0_5 = arith.constant 0 : index
    %5 = vector.load %arg3[%c0_3, %c0_4, %c0_5] : memref<1x1x128xf32, #tpu.memory_space<vmem>>, vector<1x1x128xf32>
    %6 = vector.shape_cast %5 : vector<1x1x128xf32> to vector<1x128xf32>
    %c0_6 = arith.constant 0 : index
    %c0_7 = arith.constant 0 : index
    %c0_8 = arith.constant 0 : index
    %7 = vector.load %arg4[%c0_6, %c0_7, %c0_8] : memref<1x1x128xf32, #tpu.memory_space<vmem>>, vector<1x1x128xf32>
    %8 = vector.shape_cast %7 : vector<1x1x128xf32> to vector<1x128xf32>
    %9 = vector.shape_cast %4 : vector<32x128xf32> to vector<2x16x128xf32>
    %c0_9 = arith.constant 0 : index
    %c1 = arith.constant 1 : index
    %c0_10 = arith.constant 0 : index
    %10 = vector.load %arg26[%c0_9, %c1, %c0_10] : memref<2x18x384xf32, #tpu.memory_space<vmem>>, vector<2x16x128xf32>
    tpu.vector_store %arg26[%c0_9, %c1, %c0_10], %9 {strides = array<i32>} : memref<2x18x384xf32, #tpu.memory_space<vmem>>, vector<2x16x128xf32>,
    %c0_11 = arith.constant 0 : index
    %c0_12 = arith.constant 0 : index
    %c0_13 = arith.constant 0 : index
    %11 = vector.load %arg2[%c0_11, %c0_12, %c0_13] : memref<1x384x128xbf16, #tpu.memory_space<vmem>>, vector<1x384x128xbf16>
    %12 = vector.shape_cast %11 : vector<1x384x128xbf16> to vector<384x128xbf16>
    %c0_14 = arith.constant 0 : index
    %c0_15 = arith.constant 0 : index
    %c0_16 = arith.constant 0 : index
    %13 = vector.load %arg26[%c0_14, %c0_15, %c0_16] : memref<2x18x384xf32, #tpu.memory_space<vmem>>, vector<2x16x128xf32>
    %c0_17 = arith.constant 0 : index
    %c1_18 = arith.constant 1 : index
    %c0_19 = arith.constant 0 : index
    %14 = vector.load %arg26[%c0_17, %c1_18, %c0_19] : memref<2x18x384xf32, #tpu.memory_space<vmem>>, vector<2x16x128xf32>
    %c0_20 = arith.constant 0 : index
    %c2 = arith.constant 2 : index
    %c0_21 = arith.constant 0 : index
    %15 = vector.load %arg26[%c0_20, %c2, %c0_21] : memref<2x18x384xf32, #tpu.memory_space<vmem>>, vector<2x16x128xf32>
    %16 = tpu.concatenate %13, %14, %15 in 2 : vector<2x16x128xf32>, vector<2x16x128xf32>, vector<2x16x128xf32> -> vector<2x16x384xf32>
    %17 = vector.shape_cast %16 : vector<2x16x384xf32> to vector<32x384xf32>
    %18 = arith.truncf %17 : vector<32x384xf32> to vector<32x384xbf16>
    %cst = arith.constant dense<0.000000e+00> : vector<32x128xf32>
    %19 = tpu.matmul %18, %12, %cst {dimension_numbers = #tpu.dot_dimension_numbers<[1], [0], [0], [1], [0, 0, 1, 1], [], []>} : vector<32x384xbf16>, vector<384x128xbf16>, vector<32x128xf32> -> vector<32x128xf32>
    %20 = vector.broadcast %6 : vector<1x128xf32> to vector<32x128xf32>
    %21 = arith.addf %19, %20 : vector<32x128xf32>
    %cst_22 = arith.constant 0.000000e+00 : f32
    %22 = vector.broadcast %cst_22 : f32 to vector<32x128xf32>
    %23 = arith.cmpf oge, %21, %22 : vector<32x128xf32>
    %24 = vector.broadcast %8 : vector<1x128xf32> to vector<32x128xf32>
    %25 = arith.mulf %24, %21 : vector<32x128xf32>
    %26 = arith.select %23, %21, %25 : vector<32x128xi1>, vector<32x128xf32>
    %c0_23 = arith.constant 0 : index
    %c0_24 = arith.constant 0 : index
    %c0_25 = arith.constant 0 : index
    %27 = vector.load %arg6[%c0_23, %c0_24, %c0_25] : memref<1x1x128xf32, #tpu.memory_space<vmem>>, vector<1x1x128xf32>
    %28 = vector.shape_cast %27 : vector<1x1x128xf32> to vector<1x128xf32>
    %29 = vector.shape_cast %26 : vector<32x128xf32> to vector<2x16x128xf32>
    %c0_26 = arith.constant 0 : index
    %c1_27 = arith.constant 1 : index
    %c0_28 = arith.constant 0 : index
    %30 = vector.load %arg26[%c0_26, %c1_27, %c0_28] : memref<2x18x384xf32, #tpu.memory_space<vmem>>, vector<2x16x128xf32>
    tpu.vector_store %arg26[%c0_26, %c1_27, %c0_28], %29 {strides = array<i32>} : memref<2x18x384xf32, #tpu.memory_space<vmem>>, vector<2x16x128xf32>,
    %c0_29 = arith.constant 0 : index
    %c0_30 = arith.constant 0 : index
    %c0_31 = arith.constant 0 : index
    %31 = vector.load %arg5[%c0_29, %c0_30, %c0_31] : memref<1x384x128xbf16, #tpu.memory_space<vmem>>, vector<1x384x128xbf16>
    %32 = vector.shape_cast %31 : vector<1x384x128xbf16> to vector<384x128xbf16>
    %c0_32 = arith.constant 0 : index
    %c0_33 = arith.constant 0 : index
    %c0_34 = arith.constant 0 : index
    %33 = vector.load %arg26[%c0_32, %c0_33, %c0_34] : memref<2x18x384xf32, #tpu.memory_space<vmem>>, vector<2x16x128xf32>
    %c0_35 = arith.constant 0 : index
    %c1_36 = arith.constant 1 : index
    %c0_37 = arith.constant 0 : index
    %34 = vector.load %arg26[%c0_35, %c1_36, %c0_37] : memref<2x18x384xf32, #tpu.memory_space<vmem>>, vector<2x16x128xf32>
    %c0_38 = arith.constant 0 : index
    %c2_39 = arith.constant 2 : index
    %c0_40 = arith.constant 0 : index
    %35 = vector.load %arg26[%c0_38, %c2_39, %c0_40] : memref<2x18x384xf32, #tpu.memory_space<vmem>>, vector<2x16x128xf32>
    %36 = tpu.concatenate %33, %34, %35 in 2 : vector<2x16x128xf32>, vector<2x16x128xf32>, vector<2x16x128xf32> -> vector<2x16x384xf32>
    %37 = vector.shape_cast %36 : vector<2x16x384xf32> to vector<32x384xf32>
    %38 = arith.truncf %37 : vector<32x384xf32> to vector<32x384xbf16>
    %cst_41 = arith.constant dense<0.000000e+00> : vector<32x128xf32>
    %39 = tpu.matmul %38, %32, %cst_41 {dimension_numbers = #tpu.dot_dimension_numbers<[1], [0], [0], [1], [0, 0, 1, 1], [], []>} : vector<32x384xbf16>, vector<384x128xbf16>, vector<32x128xf32> -> vector<32x128xf32>
    %40 = vector.broadcast %28 : vector<1x128xf32> to vector<32x128xf32>
    %41 = arith.addf %39, %40 : vector<32x128xf32>
    %c0_42 = arith.constant 0 : index
    %c0_43 = arith.constant 0 : index
    %c0_44 = arith.constant 0 : index
    %42 = vector.load %arg8[%c0_42, %c0_43, %c0_44] : memref<1x1x512xf32, #tpu.memory_space<vmem>>, vector<1x1x512xf32>
    %43 = vector.shape_cast %42 : vector<1x1x512xf32> to vector<1x512xf32>
    %44 = vector.shape_cast %41 : vector<32x128xf32> to vector<2x16x128xf32>
    %c0_45 = arith.constant 0 : index
    %c1_46 = arith.constant 1 : index
    %c0_47 = arith.constant 0 : index
    %45 = vector.load %arg26[%c0_45, %c1_46, %c0_47] : memref<2x18x384xf32, #tpu.memory_space<vmem>>, vector<2x16x128xf32>
    tpu.vector_store %arg26[%c0_45, %c1_46, %c0_47], %44 {strides = array<i32>} : memref<2x18x384xf32, #tpu.memory_space<vmem>>, vector<2x16x128xf32>,
    %c0_48 = arith.constant 0 : index
    %c0_49 = arith.constant 0 : index
    %c0_50 = arith.constant 0 : index
    %46 = vector.load %arg7[%c0_48, %c0_49, %c0_50] : memref<1x384x512xbf16, #tpu.memory_space<vmem>>, vector<1x384x512xbf16>
    %47 = vector.shape_cast %46 : vector<1x384x512xbf16> to vector<384x512xbf16>
    %c0_51 = arith.constant 0 : index
    %c0_52 = arith.constant 0 : index
    %c0_53 = arith.constant 0 : index
    %48 = vector.load %arg26[%c0_51, %c0_52, %c0_53] : memref<2x18x384xf32, #tpu.memory_space<vmem>>, vector<2x16x128xf32>
    %c0_54 = arith.constant 0 : index
    %c1_55 = arith.constant 1 : index
    %c0_56 = arith.constant 0 : index
    %49 = vector.load %arg26[%c0_54, %c1_55, %c0_56] : memref<2x18x384xf32, #tpu.memory_space<vmem>>, vector<2x16x128xf32>
    %c0_57 = arith.constant 0 : index
    %c2_58 = arith.constant 2 : index
    %c0_59 = arith.constant 0 : index
    %50 = vector.load %arg26[%c0_57, %c2_58, %c0_59] : memref<2x18x384xf32, #tpu.memory_space<vmem>>, vector<2x16x128xf32>
    %51 = tpu.concatenate %48, %49, %50 in 2 : vector<2x16x128xf32>, vector<2x16x128xf32>, vector<2x16x128xf32> -> vector<2x16x384xf32>
    %52 = vector.shape_cast %51 : vector<2x16x384xf32> to vector<32x384xf32>
    %53 = arith.truncf %52 : vector<32x384xf32> to vector<32x384xbf16>
    %cst_60 = arith.constant dense<0.000000e+00> : vector<32x512xf32>
    %54 = tpu.matmul %53, %47, %cst_60 {dimension_numbers = #tpu.dot_dimension_numbers<[1], [0], [0], [1], [0, 0, 1, 1], [], []>} : vector<32x384xbf16>, vector<384x512xbf16>, vector<32x512xf32> -> vector<32x512xf32>
    %55 = vector.broadcast %43 : vector<1x512xf32> to vector<32x512xf32>
    %56 = arith.addf %54, %55 : vector<32x512xf32>
    %57 = vector.extract_strided_slice %56 {offsets = [0, 0], sizes = [32, 128], strides = [1, 1]} : vector<32x512xf32> to vector<32x128xf32>
    %58 = vector.extract_strided_slice %56 {offsets = [0, 128], sizes = [32, 384], strides = [1, 1]} : vector<32x512xf32> to vector<32x384xf32>
    %cst_61 = arith.constant 0.000000e+00 : f32
    %59 = vector.broadcast %cst_61 : f32 to vector<32x128xf32>
    %60 = arith.cmpf oge, %57, %59 : vector<32x128xf32>
    %c0_62 = arith.constant 0 : index
    %c0_63 = arith.constant 0 : index
    %c0_64 = arith.constant 0 : index
    %61 = vector.load %arg9[%c0_62, %c0_63, %c0_64] : memref<1x1x128xf32, #tpu.memory_space<vmem>>, vector<1x1x128xf32>
    %62 = vector.shape_cast %61 : vector<1x1x128xf32> to vector<1x128xf32>
    %63 = vector.broadcast %62 : vector<1x128xf32> to vector<32x128xf32>
    %64 = arith.mulf %63, %57 : vector<32x128xf32>
    %65 = arith.select %60, %57, %64 : vector<32x128xi1>, vector<32x128xf32>
    %c0_65 = arith.constant 0 : index
    %c0_66 = arith.constant 0 : index
    %c0_67 = arith.constant 0 : index
    %66 = vector.load %arg11[%c0_65, %c0_66, %c0_67] : memref<1x1x128xf32, #tpu.memory_space<vmem>>, vector<1x1x128xf32>
    %67 = vector.shape_cast %66 : vector<1x1x128xf32> to vector<1x128xf32>
    %68 = vector.shape_cast %65 : vector<32x128xf32> to vector<2x16x128xf32>
    %c0_68 = arith.constant 0 : index
    %c1_69 = arith.constant 1 : index
    %c0_70 = arith.constant 0 : index
    %69 = vector.load %arg26[%c0_68, %c1_69, %c0_70] : memref<2x18x384xf32, #tpu.memory_space<vmem>>, vector<2x16x128xf32>
    tpu.vector_store %arg26[%c0_68, %c1_69, %c0_70], %68 {strides = array<i32>} : memref<2x18x384xf32, #tpu.memory_space<vmem>>, vector<2x16x128xf32>,
    %c0_71 = arith.constant 0 : index
    %c0_72 = arith.constant 0 : index
    %c0_73 = arith.constant 0 : index
    %70 = vector.load %arg10[%c0_71, %c0_72, %c0_73] : memref<1x384x128xbf16, #tpu.memory_space<vmem>>, vector<1x384x128xbf16>
    %71 = vector.shape_cast %70 : vector<1x384x128xbf16> to vector<384x128xbf16>
    %c0_74 = arith.constant 0 : index
    %c0_75 = arith.constant 0 : index
    %c0_76 = arith.constant 0 : index
    %72 = vector.load %arg26[%c0_74, %c0_75, %c0_76] : memref<2x18x384xf32, #tpu.memory_space<vmem>>, vector<2x16x128xf32>
    %c0_77 = arith.constant 0 : index
    %c1_78 = arith.constant 1 : index
    %c0_79 = arith.constant 0 : index
    %73 = vector.load %arg26[%c0_77, %c1_78, %c0_79] : memref<2x18x384xf32, #tpu.memory_space<vmem>>, vector<2x16x128xf32>
    %c0_80 = arith.constant 0 : index
    %c2_81 = arith.constant 2 : index
    %c0_82 = arith.constant 0 : index
    %74 = vector.load %arg26[%c0_80, %c2_81, %c0_82] : memref<2x18x384xf32, #tpu.memory_space<vmem>>, vector<2x16x128xf32>
    %75 = tpu.concatenate %72, %73, %74 in 2 : vector<2x16x128xf32>, vector<2x16x128xf32>, vector<2x16x128xf32> -> vector<2x16x384xf32>
    %76 = vector.shape_cast %75 : vector<2x16x384xf32> to vector<32x384xf32>
    %77 = arith.truncf %76 : vector<32x384xf32> to vector<32x384xbf16>
    %cst_83 = arith.constant dense<0.000000e+00> : vector<32x128xf32>
    %78 = tpu.matmul %77, %71, %cst_83 {dimension_numbers = #tpu.dot_dimension_numbers<[1], [0], [0], [1], [0, 0, 1, 1], [], []>} : vector<32x384xbf16>, vector<384x128xbf16>, vector<32x128xf32> -> vector<32x128xf32>
    %79 = vector.broadcast %67 : vector<1x128xf32> to vector<32x128xf32>
    %80 = arith.addf %78, %79 : vector<32x128xf32>
    %81 = arith.addf %80, %41 : vector<32x128xf32>
    %c0_84 = arith.constant 0 : index
    %c0_85 = arith.constant 0 : index
    %c0_86 = arith.constant 0 : index
    %82 = vector.load %arg13[%c0_84, %c0_85, %c0_86] : memref<1x1x128xf32, #tpu.memory_space<vmem>>, vector<1x1x128xf32>
    %83 = vector.shape_cast %82 : vector<1x1x128xf32> to vector<1x128xf32>
    %84 = vector.shape_cast %58 : vector<32x384xf32> to vector<2x16x384xf32>
    %c0_87 = arith.constant 0 : index
    %c1_88 = arith.constant 1 : index
    %c0_89 = arith.constant 0 : index
    %85 = vector.load %arg26[%c0_87, %c1_88, %c0_89] : memref<2x18x384xf32, #tpu.memory_space<vmem>>, vector<2x16x384xf32>
    tpu.vector_store %arg26[%c0_87, %c1_88, %c0_89], %84 {strides = array<i32>} : memref<2x18x384xf32, #tpu.memory_space<vmem>>, vector<2x16x384xf32>,
    %c0_90 = arith.constant 0 : index
    %c0_91 = arith.constant 0 : index
    %c0_92 = arith.constant 0 : index
    %86 = vector.load %arg12[%c0_90, %c0_91, %c0_92] : memref<1x1152x128xbf16, #tpu.memory_space<vmem>>, vector<1x1152x128xbf16>
    %87 = vector.shape_cast %86 : vector<1x1152x128xbf16> to vector<1152x128xbf16>
    %c0_93 = arith.constant 0 : index
    %c0_94 = arith.constant 0 : index
    %c0_95 = arith.constant 0 : index
    %88 = vector.load %arg26[%c0_93, %c0_94, %c0_95] : memref<2x18x384xf32, #tpu.memory_space<vmem>>, vector<2x16x384xf32>
    %c0_96 = arith.constant 0 : index
    %c1_97 = arith.constant 1 : index
    %c0_98 = arith.constant 0 : index
    %89 = vector.load %arg26[%c0_96, %c1_97, %c0_98] : memref<2x18x384xf32, #tpu.memory_space<vmem>>, vector<2x16x384xf32>
    %c0_99 = arith.constant 0 : index
    %c2_100 = arith.constant 2 : index
    %c0_101 = arith.constant 0 : index
    %90 = vector.load %arg26[%c0_99, %c2_100, %c0_101] : memref<2x18x384xf32, #tpu.memory_space<vmem>>, vector<2x16x384xf32>
    %91 = tpu.concatenate %88, %89, %90 in 2 : vector<2x16x384xf32>, vector<2x16x384xf32>, vector<2x16x384xf32> -> vector<2x16x1152xf32>
    %92 = vector.shape_cast %91 : vector<2x16x1152xf32> to vector<32x1152xf32>
    %93 = arith.truncf %92 : vector<32x1152xf32> to vector<32x1152xbf16>
    %cst_102 = arith.constant dense<0.000000e+00> : vector<32x128xf32>
    %94 = tpu.matmul %93, %87, %cst_102 {dimension_numbers = #tpu.dot_dimension_numbers<[1], [0], [0], [1], [0, 0, 1, 1], [], []>} : vector<32x1152xbf16>, vector<1152x128xbf16>, vector<32x128xf32> -> vector<32x128xf32>
    %95 = vector.broadcast %83 : vector<1x128xf32> to vector<32x128xf32>
    %96 = arith.addf %94, %95 : vector<32x128xf32>
    %97 = vector.extract_strided_slice %96 {offsets = [0, 1], sizes = [32, 127], strides = [1, 1]} : vector<32x128xf32> to vector<32x127xf32>
    %98 = vector.extract_strided_slice %96 {offsets = [0, 0], sizes = [32, 1], strides = [1, 1]} : vector<32x128xf32> to vector<32x1xf32>
    %99 = tpu.concatenate %97, %98 in 1 : vector<32x127xf32>, vector<32x1xf32> -> vector<32x128xf32>
    %100 = arith.maximumf %96, %99 : vector<32x128xf32>
    %101 = vector.extract_strided_slice %100 {offsets = [0, 2], sizes = [32, 126], strides = [1, 1]} : vector<32x128xf32> to vector<32x126xf32>
    %102 = vector.extract_strided_slice %100 {offsets = [0, 0], sizes = [32, 2], strides = [1, 1]} : vector<32x128xf32> to vector<32x2xf32>
    %103 = tpu.concatenate %101, %102 in 1 : vector<32x126xf32>, vector<32x2xf32> -> vector<32x128xf32>
    %104 = arith.maximumf %100, %103 : vector<32x128xf32>
    %105 = vector.extract_strided_slice %104 {offsets = [0, 4], sizes = [32, 124], strides = [1, 1]} : vector<32x128xf32> to vector<32x124xf32>
    %106 = vector.extract_strided_slice %104 {offsets = [0, 0], sizes = [32, 4], strides = [1, 1]} : vector<32x128xf32> to vector<32x4xf32>
    %107 = tpu.concatenate %105, %106 in 1 : vector<32x124xf32>, vector<32x4xf32> -> vector<32x128xf32>
    %108 = arith.maximumf %104, %107 : vector<32x128xf32>
    %109 = tpu.concatenate %96, %108 in 1 : vector<32x128xf32>, vector<32x128xf32> -> vector<32x256xf32>
    %c0_103 = arith.constant 0 : index
    %c0_104 = arith.constant 0 : index
    %110 = vector.load %arg19[%c0_103, %c0_104] : memref<256x32xf32, #tpu.memory_space<vmem>>, vector<256x32xf32>
    %cst_105 = arith.constant dense<0.000000e+00> : vector<32x32xf32>
    %111 = tpu.matmul %109, %110, %cst_105 {dimension_numbers = #tpu.dot_dimension_numbers<[1], [0], [0], [1], [0, 0, 1, 1], [], []>} : vector<32x256xf32>, vector<256x32xf32>, vector<32x32xf32> -> vector<32x32xf32>
    %112 = vector.shape_cast %111 : vector<32x32xf32> to vector<2x16x32xf32>
    %c0_106 = arith.constant 0 : index
    %c3 = arith.constant 3 : index
    %c0_107 = arith.constant 0 : index
    %113 = vector.load %arg27[%c0_106, %c3, %c0_107] : memref<2x22x32xf32, #tpu.memory_space<vmem>>, vector<2x16x32xf32>
    tpu.vector_store %arg27[%c0_106, %c3, %c0_107], %112 {strides = array<i32>} : memref<2x22x32xf32, #tpu.memory_space<vmem>>, vector<2x16x32xf32>,
    %c0_108 = arith.constant 0 : index
    %c0_109 = arith.constant 0 : index
    %c0_110 = arith.constant 0 : index
    %114 = vector.load %arg27[%c0_108, %c0_109, %c0_110] : memref<2x22x32xf32, #tpu.memory_space<vmem>>, vector<2x16x32xf32>
    %c0_111 = arith.constant 0 : index
    %c1_112 = arith.constant 1 : index
    %c0_113 = arith.constant 0 : index
    %115 = vector.load %arg27[%c0_111, %c1_112, %c0_113] : memref<2x22x32xf32, #tpu.memory_space<vmem>>, vector<2x16x32xf32>
    %c0_114 = arith.constant 0 : index
    %c2_115 = arith.constant 2 : index
    %c0_116 = arith.constant 0 : index
    %116 = vector.load %arg27[%c0_114, %c2_115, %c0_116] : memref<2x22x32xf32, #tpu.memory_space<vmem>>, vector<2x16x32xf32>
    %c0_117 = arith.constant 0 : index
    %c3_118 = arith.constant 3 : index
    %c0_119 = arith.constant 0 : index
    %117 = vector.load %arg27[%c0_117, %c3_118, %c0_119] : memref<2x22x32xf32, #tpu.memory_space<vmem>>, vector<2x16x32xf32>
    %c0_120 = arith.constant 0 : index
    %c4 = arith.constant 4 : index
    %c0_121 = arith.constant 0 : index
    %118 = vector.load %arg27[%c0_120, %c4, %c0_121] : memref<2x22x32xf32, #tpu.memory_space<vmem>>, vector<2x16x32xf32>
    %c0_122 = arith.constant 0 : index
    %c5 = arith.constant 5 : index
    %c0_123 = arith.constant 0 : index
    %119 = vector.load %arg27[%c0_122, %c5, %c0_123] : memref<2x22x32xf32, #tpu.memory_space<vmem>>, vector<2x16x32xf32>
    %c0_124 = arith.constant 0 : index
    %c6 = arith.constant 6 : index
    %c0_125 = arith.constant 0 : index
    %120 = vector.load %arg27[%c0_124, %c6, %c0_125] : memref<2x22x32xf32, #tpu.memory_space<vmem>>, vector<2x16x32xf32>
    %121 = tpu.concatenate %114, %115, %116, %117, %118, %119, %120 in 2 : vector<2x16x32xf32>, vector<2x16x32xf32>, vector<2x16x32xf32>, vector<2x16x32xf32>, vector<2x16x32xf32>, vector<2x16x32xf32>, vector<2x16x32xf32> -> vector<2x16x224xf32>
    %122 = vector.shape_cast %121 : vector<2x16x224xf32> to vector<32x224xf32>
    %c0_126 = arith.constant 0 : index
    %c0_127 = arith.constant 0 : index
    %c0_128 = arith.constant 0 : index
    %123 = vector.load %arg14[%c0_126, %c0_127, %c0_128] : memref<1x224x16xf32, #tpu.memory_space<vmem>>, vector<1x224x16xf32>
    %124 = vector.shape_cast %123 : vector<1x224x16xf32> to vector<224x16xf32>
    %cst_129 = arith.constant dense<0.000000e+00> : vector<32x16xf32>
    %125 = tpu.matmul %122, %124, %cst_129 {dimension_numbers = #tpu.dot_dimension_numbers<[1], [0], [0], [1], [0, 0, 1, 1], [], []>} : vector<32x224xf32>, vector<224x16xf32>, vector<32x16xf32> -> vector<32x16xf32>
    %126 = arith.negf %125 : vector<32x16xf32>
    %127 = math.exp %126 : vector<32x16xf32>
    %cst_130 = arith.constant 1.000000e+00 : f32
    %128 = vector.broadcast %cst_130 : f32 to vector<32x16xf32>
    %129 = arith.addf %128, %127 : vector<32x16xf32>
    %130 = arith.divf %128, %129 : vector<32x16xf32>
    %c0_131 = arith.constant 0 : index
    %c0_132 = arith.constant 0 : index
    %131 = vector.load %arg20[%c0_131, %c0_132] : memref<16x128xf32, #tpu.memory_space<vmem>>, vector<16x128xf32>
    %cst_133 = arith.constant dense<0.000000e+00> : vector<32x128xf32>
    %132 = tpu.matmul %130, %131, %cst_133 {dimension_numbers = #tpu.dot_dimension_numbers<[1], [0], [0], [1], [0, 0, 1, 1], [], []>} : vector<32x16xf32>, vector<16x128xf32>, vector<32x128xf32> -> vector<32x128xf32>
    %133 = arith.mulf %96, %132 : vector<32x128xf32>
    %134 = arith.addf %81, %133 : vector<32x128xf32>
    %135 = vector.shape_cast %134 : vector<32x128xf32> to vector<2x16x128xf32>
    %cst_134 = arith.constant dense<0.000000e+00> : vector<2x128xf32>
    %136 = vector.multi_reduction <add>, %135, %cst_134 [1] : vector<2x16x128xf32> to vector<2x128xf32>
    %c0_135 = arith.constant 0 : index
    %c0_136 = arith.constant 0 : index
    %137 = vector.load %arg21[%c0_135, %c0_136] : memref<128x8xf32, #tpu.memory_space<vmem>>, vector<128x8xf32>
    %cst_137 = arith.constant dense<0.000000e+00> : vector<2x8xf32>
    %138 = tpu.matmul %136, %137, %cst_137 {dimension_numbers = #tpu.dot_dimension_numbers<[1], [0], [0], [1], [0, 0, 1, 1], [], []>} : vector<2x128xf32>, vector<128x8xf32>, vector<2x8xf32> -> vector<2x8xf32>
    %c0_138 = arith.constant 0 : index
    %c0_139 = arith.constant 0 : index
    %c0_140 = arith.constant 0 : index
    %139 = vector.load %arg15[%c0_138, %c0_139, %c0_140] : memref<1x8x32xf32, #tpu.memory_space<vmem>>, vector<1x8x32xf32>
    %140 = vector.shape_cast %139 : vector<1x8x32xf32> to vector<8x32xf32>
    %cst_141 = arith.constant dense<0.000000e+00> : vector<2x32xf32>
    %141 = tpu.matmul %138, %140, %cst_141 {dimension_numbers = #tpu.dot_dimension_numbers<[1], [0], [0], [1], [0, 0, 1, 1], [], []>} : vector<2x8xf32>, vector<8x32xf32>, vector<2x32xf32> -> vector<2x32xf32>
    %c0_142 = arith.constant 0 : index
    %c0_143 = arith.constant 0 : index
    %c0_144 = arith.constant 0 : index
    %142 = vector.load %arg16[%c0_142, %c0_143, %c0_144] : memref<1x1x32xf32, #tpu.memory_space<vmem>>, vector<1x1x32xf32>
    %143 = vector.shape_cast %142 : vector<1x1x32xf32> to vector<1x32xf32>
    %144 = vector.broadcast %143 : vector<1x32xf32> to vector<2x32xf32>
    %145 = arith.addf %141, %144 : vector<2x32xf32>
    %c0_145 = arith.constant 0 : index
    %c0_146 = arith.constant 0 : index
    %c0_147 = arith.constant 0 : index
    %146 = vector.load %arg17[%c0_145, %c0_146, %c0_147] : memref<1x32x16xf32, #tpu.memory_space<vmem>>, vector<1x32x16xf32>
    %147 = vector.shape_cast %146 : vector<1x32x16xf32> to vector<32x16xf32>
    %cst_148 = arith.constant dense<0.000000e+00> : vector<2x16xf32>
    %148 = tpu.matmul %145, %147, %cst_148 {dimension_numbers = #tpu.dot_dimension_numbers<[1], [0], [0], [1], [0, 0, 1, 1], [], []>} : vector<2x32xf32>, vector<32x16xf32>, vector<2x16xf32> -> vector<2x16xf32>
    %c0_149 = arith.constant 0 : index
    %c0_150 = arith.constant 0 : index
    %c0_151 = arith.constant 0 : index
    %149 = vector.load %arg18[%c0_149, %c0_150, %c0_151] : memref<1x1x16xf32, #tpu.memory_space<vmem>>, vector<1x1x16xf32>
    %150 = vector.shape_cast %149 : vector<1x1x16xf32> to vector<1x16xf32>
    %151 = vector.broadcast %150 : vector<1x16xf32> to vector<2x16xf32>
    %152 = arith.addf %148, %151 : vector<2x16xf32>
    %153 = vector.extract_strided_slice %152 {offsets = [0, 0], sizes = [2, 8], strides = [1, 1]} : vector<2x16xf32> to vector<2x8xf32>
    %154 = vector.extract_strided_slice %152 {offsets = [0, 8], sizes = [2, 8], strides = [1, 1]} : vector<2x16xf32> to vector<2x8xf32>
    %155 = arith.subf %153, %154 : vector<2x8xf32>
    %156 = arith.negf %155 : vector<2x8xf32>
    %157 = math.exp %156 : vector<2x8xf32>
    %cst_152 = arith.constant 1.000000e+00 : f32
    %158 = vector.broadcast %cst_152 : f32 to vector<2x8xf32>
    %159 = arith.addf %158, %157 : vector<2x8xf32>
    %160 = arith.divf %158, %159 : vector<2x8xf32>
    %c0_153 = arith.constant 0 : index
    %c0_154 = arith.constant 0 : index
    %161 = vector.load %arg22[%c0_153, %c0_154] : memref<8x128xf32, #tpu.memory_space<vmem>>, vector<8x128xf32>
    %cst_155 = arith.constant dense<0.000000e+00> : vector<2x128xf32>
    %162 = tpu.matmul %160, %161, %cst_155 {dimension_numbers = #tpu.dot_dimension_numbers<[1], [0], [0], [1], [0, 0, 1, 1], [], []>} : vector<2x8xf32>, vector<8x128xf32>, vector<2x128xf32> -> vector<2x128xf32>
    %163 = vector.shape_cast %162 : vector<2x128xf32> to vector<2x1x128xf32>
    %164 = vector.shape_cast %163 : vector<2x1x128xf32> to vector<2x1x128xf32>
    %165 = vector.broadcast %164 : vector<2x1x128xf32> to vector<2x16x128xf32>
    %166 = vector.shape_cast %165 : vector<2x16x128xf32> to vector<32x128xf32>
    %167 = arith.subf %81, %133 : vector<32x128xf32>
    %168 = arith.mulf %167, %166 : vector<32x128xf32>
    %169 = arith.addf %133, %168 : vector<32x128xf32>
    %170 = arith.addf %169, %4 : vector<32x128xf32>
    %171 = vector.shape_cast %170 : vector<32x128xf32> to vector<2x16x128xf32>
    %c0_156 = arith.constant 0 : index
    %c0_157 = arith.constant 0 : index
    %c0_158 = arith.constant 0 : index
    %172 = vector.load %arg25[%c0_156, %c0_157, %c0_158] : memref<2x16x128xf32, #tpu.memory_space<vmem>>, vector<2x16x128xf32>
    tpu.vector_store %arg25[%c0_156, %c0_157, %c0_158], %171 {strides = array<i32>} : memref<2x16x128xf32, #tpu.memory_space<vmem>>, vector<2x16x128xf32>,
    %c1_i32 = arith.constant 1 : i32
    %173 = arith.cmpi eq, %arg0, %c1_i32 : i32
    %174 = arith.extui %173 : i1 to i32
    %c0_i32_159 = arith.constant 0 : i32
    %175 = arith.cmpi ne, %174, %c0_i32_159 : i32
    scf.if %175 {
      %c0_160 = arith.constant 0 : index
      %c0_161 = arith.constant 0 : index
      %176 = vector.load %arg24[%c0_160, %c0_161] : memref<1x128xf32, #tpu.memory_space<vmem>>, vector<1x128xf32>
      %177 = vector.shape_cast %170 : vector<32x128xf32> to vector<2x16x128xf32>
      %c0_162 = arith.constant 0 : index
      %c1_163 = arith.constant 1 : index
      %c0_164 = arith.constant 0 : index
      %178 = vector.load %arg26[%c0_162, %c1_163, %c0_164] : memref<2x18x384xf32, #tpu.memory_space<vmem>>, vector<2x16x128xf32>
      tpu.vector_store %arg26[%c0_162, %c1_163, %c0_164], %177 {strides = array<i32>} : memref<2x18x384xf32, #tpu.memory_space<vmem>>, vector<2x16x128xf32>,
      %c0_165 = arith.constant 0 : index
      %c0_166 = arith.constant 0 : index
      %179 = vector.load %arg23[%c0_165, %c0_166] : memref<384x128xbf16, #tpu.memory_space<vmem>>, vector<384x128xbf16>
      %c0_167 = arith.constant 0 : index
      %c0_168 = arith.constant 0 : index
      %c0_169 = arith.constant 0 : index
      %180 = vector.load %arg26[%c0_167, %c0_168, %c0_169] : memref<2x18x384xf32, #tpu.memory_space<vmem>>, vector<2x16x128xf32>
      %c0_170 = arith.constant 0 : index
      %c1_171 = arith.constant 1 : index
      %c0_172 = arith.constant 0 : index
      %181 = vector.load %arg26[%c0_170, %c1_171, %c0_172] : memref<2x18x384xf32, #tpu.memory_space<vmem>>, vector<2x16x128xf32>
      %c0_173 = arith.constant 0 : index
      %c2_174 = arith.constant 2 : index
      %c0_175 = arith.constant 0 : index
      %182 = vector.load %arg26[%c0_173, %c2_174, %c0_175] : memref<2x18x384xf32, #tpu.memory_space<vmem>>, vector<2x16x128xf32>
      %183 = tpu.concatenate %180, %181, %182 in 2 : vector<2x16x128xf32>, vector<2x16x128xf32>, vector<2x16x128xf32> -> vector<2x16x384xf32>
      %184 = vector.shape_cast %183 : vector<2x16x384xf32> to vector<32x384xf32>
      %185 = arith.truncf %184 : vector<32x384xf32> to vector<32x384xbf16>
      %cst_176 = arith.constant dense<0.000000e+00> : vector<32x128xf32>
      %186 = tpu.matmul %185, %179, %cst_176 {dimension_numbers = #tpu.dot_dimension_numbers<[1], [0], [0], [1], [0, 0, 1, 1], [], []>} : vector<32x384xbf16>, vector<384x128xbf16>, vector<32x128xf32> -> vector<32x128xf32>
      %187 = vector.broadcast %176 : vector<1x128xf32> to vector<32x128xf32>
      %188 = arith.addf %186, %187 : vector<32x128xf32>
      %189 = vector.shape_cast %188 : vector<32x128xf32> to vector<2x16x128xf32>
      %c0_177 = arith.constant 0 : index
      %c0_178 = arith.constant 0 : index
      %c0_179 = arith.constant 0 : index
      %190 = vector.load %arg1[%c0_177, %c0_178, %c0_179] : memref<2x16x128xf32, #tpu.memory_space<vmem>>, vector<2x16x128xf32>
      %191 = arith.addf %189, %190 : vector<2x16x128xf32>
      %c0_180 = arith.constant 0 : index
      %c0_181 = arith.constant 0 : index
      %c0_182 = arith.constant 0 : index
      %192 = vector.load %arg25[%c0_180, %c0_181, %c0_182] : memref<2x16x128xf32, #tpu.memory_space<vmem>>, vector<2x16x128xf32>
      tpu.vector_store %arg25[%c0_180, %c0_181, %c0_182], %191 {strides = array<i32>} : memref<2x16x128xf32, #tpu.memory_space<vmem>>, vector<2x16x128xf32>,
    } else {
    }
    return
  }
  func.func @transform_0(%arg0: i32) -> (i32, i32, i32) {
    %c0_i32 = arith.constant 0 : i32
    %c0_i32_0 = arith.constant 0 : i32
    %c0_i32_1 = arith.constant 0 : i32
    %c0_i32_2 = arith.constant 0 : i32
    return %c0_i32, %c0_i32_0, %c0_i32_1 : i32, i32, i32
  }
  func.func @transform_1(%arg0: i32) -> (i32, i32, i32) {
    %c0_i32 = arith.constant 0 : i32
    %c0_i32_0 = arith.constant 0 : i32
    %c0_i32_1 = arith.constant 0 : i32
    return %arg0, %c0_i32, %c0_i32_0 : i32, i32, i32
  }
  func.func @transform_2(%arg0: i32) -> (i32, i32, i32) {
    %c0_i32 = arith.constant 0 : i32
    %c0_i32_0 = arith.constant 0 : i32
    %c0_i32_1 = arith.constant 0 : i32
    return %arg0, %c0_i32, %c0_i32_0 : i32, i32, i32
  }
  func.func @transform_3(%arg0: i32) -> (i32, i32, i32) {
    %c0_i32 = arith.constant 0 : i32
    %c0_i32_0 = arith.constant 0 : i32
    %c0_i32_1 = arith.constant 0 : i32
    return %arg0, %c0_i32, %c0_i32_0 : i32, i32, i32
  }
  func.func @transform_4(%arg0: i32) -> (i32, i32, i32) {
    %c0_i32 = arith.constant 0 : i32
    %c0_i32_0 = arith.constant 0 : i32
    %c0_i32_1 = arith.constant 0 : i32
    return %arg0, %c0_i32, %c0_i32_0 : i32, i32, i32
  }
  func.func @transform_5(%arg0: i32) -> (i32, i32, i32) {
    %c0_i32 = arith.constant 0 : i32
    %c0_i32_0 = arith.constant 0 : i32
    %c0_i32_1 = arith.constant 0 : i32
    return %arg0, %c0_i32, %c0_i32_0 : i32, i32, i32
  }
  func.func @transform_6(%arg0: i32) -> (i32, i32, i32) {
    %c0_i32 = arith.constant 0 : i32
    %c0_i32_0 = arith.constant 0 : i32
    %c0_i32_1 = arith.constant 0 : i32
    return %arg0, %c0_i32, %c0_i32_0 : i32, i32, i32
  }
  func.func @transform_7(%arg0: i32) -> (i32, i32, i32) {
    %c0_i32 = arith.constant 0 : i32
    %c0_i32_0 = arith.constant 0 : i32
    %c0_i32_1 = arith.constant 0 : i32
    return %arg0, %c0_i32, %c0_i32_0 : i32, i32, i32
  }
  func.func @transform_8(%arg0: i32) -> (i32, i32, i32) {
    %c0_i32 = arith.constant 0 : i32
    %c0_i32_0 = arith.constant 0 : i32
    %c0_i32_1 = arith.constant 0 : i32
    return %arg0, %c0_i32, %c0_i32_0 : i32, i32, i32
  }
  func.func @transform_9(%arg0: i32) -> (i32, i32, i32) {
    %c0_i32 = arith.constant 0 : i32
    %c0_i32_0 = arith.constant 0 : i32
    %c0_i32_1 = arith.constant 0 : i32
    return %arg0, %c0_i32, %c0_i32_0 : i32, i32, i32
  }
  func.func @transform_10(%arg0: i32) -> (i32, i32, i32) {
    %c0_i32 = arith.constant 0 : i32
    %c0_i32_0 = arith.constant 0 : i32
    %c0_i32_1 = arith.constant 0 : i32
    return %arg0, %c0_i32, %c0_i32_0 : i32, i32, i32
  }
  func.func @transform_11(%arg0: i32) -> (i32, i32, i32) {
    %c0_i32 = arith.constant 0 : i32
    %c0_i32_0 = arith.constant 0 : i32
    %c0_i32_1 = arith.constant 0 : i32
    return %arg0, %c0_i32, %c0_i32_0 : i32, i32, i32
  }
  func.func @transform_12(%arg0: i32) -> (i32, i32, i32) {
    %c0_i32 = arith.constant 0 : i32
    %c0_i32_0 = arith.constant 0 : i32
    %c0_i32_1 = arith.constant 0 : i32
    return %arg0, %c0_i32, %c0_i32_0 : i32, i32, i32
  }
  func.func @transform_13(%arg0: i32) -> (i32, i32, i32) {
    %c0_i32 = arith.constant 0 : i32
    %c0_i32_0 = arith.constant 0 : i32
    %c0_i32_1 = arith.constant 0 : i32
    return %arg0, %c0_i32, %c0_i32_0 : i32, i32, i32
  }
  func.func @transform_14(%arg0: i32) -> (i32, i32, i32) {
    %c0_i32 = arith.constant 0 : i32
    %c0_i32_0 = arith.constant 0 : i32
    %c0_i32_1 = arith.constant 0 : i32
    return %arg0, %c0_i32, %c0_i32_0 : i32, i32, i32
  }
  func.func @transform_15(%arg0: i32) -> (i32, i32, i32) {
    %c0_i32 = arith.constant 0 : i32
    %c0_i32_0 = arith.constant 0 : i32
    %c0_i32_1 = arith.constant 0 : i32
    return %arg0, %c0_i32, %c0_i32_0 : i32, i32, i32
  }
  func.func @transform_16(%arg0: i32) -> (i32, i32, i32) {
    %c0_i32 = arith.constant 0 : i32
    %c0_i32_0 = arith.constant 0 : i32
    %c0_i32_1 = arith.constant 0 : i32
    return %arg0, %c0_i32, %c0_i32_0 : i32, i32, i32
  }
  func.func @transform_17(%arg0: i32) -> (i32, i32, i32) {
    %c0_i32 = arith.constant 0 : i32
    %c0_i32_0 = arith.constant 0 : i32
    %c0_i32_1 = arith.constant 0 : i32
    return %arg0, %c0_i32, %c0_i32_0 : i32, i32, i32
  }
  func.func @transform_18(%arg0: i32) -> (i32, i32) {
    %c0_i32 = arith.constant 0 : i32
    %c0_i32_0 = arith.constant 0 : i32
    %c0_i32_1 = arith.constant 0 : i32
    return %c0_i32, %c0_i32_0 : i32, i32
  }
  func.func @transform_19(%arg0: i32) -> (i32, i32) {
    %c0_i32 = arith.constant 0 : i32
    %c0_i32_0 = arith.constant 0 : i32
    %c0_i32_1 = arith.constant 0 : i32
    return %c0_i32, %c0_i32_0 : i32, i32
  }
  func.func @transform_20(%arg0: i32) -> (i32, i32) {
    %c0_i32 = arith.constant 0 : i32
    %c0_i32_0 = arith.constant 0 : i32
    %c0_i32_1 = arith.constant 0 : i32
    return %c0_i32, %c0_i32_0 : i32, i32
  }
  func.func @transform_21(%arg0: i32) -> (i32, i32) {
    %c0_i32 = arith.constant 0 : i32
    %c0_i32_0 = arith.constant 0 : i32
    %c0_i32_1 = arith.constant 0 : i32
    return %c0_i32, %c0_i32_0 : i32, i32
  }
  func.func @transform_22(%arg0: i32) -> (i32, i32) {
    %c0_i32 = arith.constant 0 : i32
    %c0_i32_0 = arith.constant 0 : i32
    %c0_i32_1 = arith.constant 0 : i32
    return %c0_i32, %c0_i32_0 : i32, i32
  }
  func.func @transform_23(%arg0: i32) -> (i32, i32) {
    %c0_i32 = arith.constant 0 : i32
    %c0_i32_0 = arith.constant 0 : i32
    %c0_i32_1 = arith.constant 0 : i32
    return %c0_i32, %c0_i32_0 : i32, i32
  }
  func.func @transform_24(%arg0: i32) -> (i32, i32, i32) {
    %c0_i32 = arith.constant 0 : i32
    %c0_i32_0 = arith.constant 0 : i32
    %c0_i32_1 = arith.constant 0 : i32
    %c0_i32_2 = arith.constant 0 : i32
    return %c0_i32, %c0_i32_0, %c0_i32_1 : i32, i32, i32
  }
}

</mosaic_0001>

<bundles_post_ra>
// kernel: reg_forward.1
= control target key start
LH: loop header
LB: loop body
LE: loop exit
PB: predicated region body
PF: predicated region fallthrough
CT: control target
= control target key end

     0   :  { %s8699_s0 = inlined_call_operand.vmem [shape: f32[2,16,128], index: 0, kind: input, shape index: {}]   ;;  %s8700_s1 = inlined_call_operand.hbm [shape: bf16[2,384,128], index: 1, kind: input, shape index: {}]   ;;  %s8701_s2 = inlined_call_operand.vmem [shape: f32[2,1,128], index: 2, kind: input, shape index: {}]   ;;  %s8702_s3 = inlined_call_operand.vmem [shape: f32[2,1,128], index: 3, kind: input, shape index: {}]   ;;  %s8703_s4 = inlined_call_operand.hbm [shape: bf16[2,384,128], index: 4, kind: input, shape index: {}]   ;;  %s8704_s5 = inlined_call_operand.vmem [shape: f32[2,1,128], index: 5, kind: input, shape index: {}]   ;;  %s8705_s6 = inlined_call_operand.vmem [shape: bf16[2,384,512], index: 6, kind: input, shape index: {}]   ;;  %s8706_s7 = inlined_call_operand.vmem [shape: f32[2,1,512], index: 7, kind: input, shape index: {}]   ;;  %s8707_s8 = inlined_call_operand.vmem [shape: f32[2,1,128], index: 8, kind: input, shape index: {}]   ;;  %s8708_s9 = inlined_call_operand.hbm [shape: bf16[2,384,128], index: 9, kind: input, shape index: {}]   ;;  %s8709_s10 = inlined_call_operand.vmem [shape: f32[2,1,128], index: 10, kind: input, shape index: {}]   ;;  %s8710_s11 = inlined_call_operand.hbm [shape: bf16[2,1152,128], index: 11, kind: input, shape index: {}]   ;;  %s8711_s12 = inlined_call_operand.vmem [shape: f32[2,1,128], index: 12, kind: input, shape index: {}]   ;;  %s8712_s13 = inlined_call_operand.vmem [shape: f32[2,224,16], index: 13, kind: input, shape index: {}]   ;;  %s8713_s14 = inlined_call_operand.vmem [shape: f32[2,8,32], index: 14, kind: input, shape index: {}]   ;;  %s8714_s15 = inlined_call_operand.vmem [shape: f32[2,1,32], index: 15, kind: input, shape index: {}]   ;;  %s8715_s16 = inlined_call_operand.vmem [shape: f32[2,32,16], index: 16, kind: input, shape index: {}]   ;;  %s8716_s17 = inlined_call_operand.vmem [shape: f32[2,1,16], index: 17, kind: input, shape index: {}]   ;;  %s8717_s18 = inlined_call_operand.vmem [shape: f32[256,32], index: 18, kind: input, shape index: {}]   ;;  %s8718_s19 = inlined_call_operand.vmem [shape: f32[16,128], index: 19, kind: input, shape index: {}]   ;;  %s8719_s20 = inlined_call_operand.vmem [shape: f32[128,8], index: 20, kind: input, shape index: {}]   ;;  %s8720_s21 = inlined_call_operand.vmem [shape: f32[8,128], index: 21, kind: input, shape index: {}]   ;;  %s8721_s22 = inlined_call_operand.vmem [shape: bf16[384,128], index: 22, kind: input, shape index: {}]   ;;  %s8722_s23 = inlined_call_operand.vmem [shape: f32[1,128], index: 23, kind: input, shape index: {}]   ;;  %s8723_s24 = inlined_call_operand.vmem [shape: f32[2,16,128], index: 24, kind: output, shape index: {}]  }
   0x1   :  { %8746 = sst [smem:[#allocation18_spill]] %s8699_s0 }
   0x2   :  { %8747 = sst [smem:[#allocation19_spill]] %s8700_s1 }
   0x3   :  { %8748 = sst [smem:[#allocation20_spill]] %s8701_s2 }
   0x4   :  { %8749 = sst [smem:[#allocation21_spill]] %s8702_s3 }
   0x5   :  { %8750 = sst [smem:[#allocation22_spill]] %s8703_s4 }
   0x6   :  { %8751 = sst [smem:[#allocation23_spill]] %s8704_s5 }
   0x7   :  { %8752 = sst [smem:[#allocation24_spill]] %s8705_s6 }
   0x8   :  { %8753 = sst [smem:[#allocation25_spill]] %s8706_s7 }
   0x9   :  { %8754 = sst [smem:[#allocation26_spill]] %s8707_s8 }
   0xa   :  { %8755 = sst [smem:[#allocation27_spill]] %s8708_s9 }
   0xb   :  { %8756 = sst [smem:[#allocation28_spill]] %s8710_s11 }
   0xc   :  { %8757 = sst [smem:[#allocation29_spill]] %s8712_s13 }
   0xd   :  { %8758 = sst [smem:[#allocation30_spill]] %s8715_s16 }
   0xe   :  { %8759 = sst [smem:[#allocation31_spill]] %s8716_s17 }
   0xf   :  { %8760 = sst [smem:[#allocation32_spill]] %s8717_s18 }
  0x10   :  { %8761 = sst [smem:[#allocation33_spill]] %s8718_s19 }
  0x11   :  { %8762 = sst [smem:[#allocation34_spill]] %s8719_s20 }
  0x12   :  { %8763 = sst [smem:[#allocation35_spill]] %s8720_s21 }
  0x13   :  { %8764 = sst [smem:[#allocation36_spill]] %s8721_s22 }
  0x14   :  { %8765 = sst [smem:[#allocation37_spill]] %s8722_s23 }
  0x15   :  { %8766 = sst [smem:[#allocation38_spill]] %s8723_s24 }
  0x16   :  { %29 = vsyncpa [#allocation5], 0 }
  0x17   :  { %31 = vsyncpa [#allocation5 + $0x1], 0 }
  0x18   :  { %32 = vsyncpa [#allocation7], 0 }
  0x19   :  { %34 = vsyncpa [#allocation7 + $0x1], 0 }
  0x1a   :  { %35 = vsyncpa [#allocation10], 0 }
  0x1b   :  { %37 = vsyncpa [#allocation10 + $0x1], 0  ;;  %s7399_s5 = smov 0   ;;  %s7401_s26 = smov 0  }
  0x1c   :  { %s7403_s27 = smov 0   ;;  %s7405_s28 = smov 0  }
  0x1d LB: > { %8767 = sst [smem:[#allocation14_spill]] %s7246_s26  ;;  %s7418_s6 = sadd.s32 4294967295, %s7254_s28   ;;  %s7254_s28 = sphi %s7405_s28, %s8816_s28   ;;  %s7250_s27 = sphi %s7403_s27, %s8819_s27   ;;  %s7246_s26 = sphi %s7401_s26, %s8818_s26   ;;  %s7242_s5 = sphi %s7399_s5, %s8817_s5  }
  0x1e   : > { %8768 = sst [smem:[#allocation15_spill]] %s7250_s27  ;;  %s7421_s2 = sadd.s32 1, %s7254_s28  }
  0x1f   : > { %8769 = sst [smem:[#allocation16_spill]] %s7421_s2  ;;  %s68_s29 = ssub.s32 %s7254_s28, %s7421_s2 }
  0x20   : > { %s71_s0 = sadd.s32 1, %s7250_s27  ;;  %p69_p0 = scmp.eq.s32.totalorder %s68_s29, 0 }
  0x21   : > { %p78_p1 = scmp.ne.s32.totalorder %s7250_s27, %s7246_s26  ;;  %p79_p2 = scmp.eq.s32.totalorder %s7254_s28, 0 }
  0x22   : > { %p84_p3 = scmp.ne.s32.totalorder %s7246_s26, %s7242_s5  ;;  %p85_p5 = scmp.eq.s32.totalorder %s7418_s6, 0 }
  0x23   : > { %s7431_s7 = scalar_select %p69_p0, %s7250_s27, %s71_s0  }
  0x24   : > { %p80_p4 = por %p79_p2, %p78_p1  ;;  %p6692_p6 = scmp.lt.s32.totalorder %s7254_s28, 2 }
  0x25   : > { %8770 = sst [smem:[#allocation17_spill]] %s7431_s7  ;;  %p7435_p7 = por %p85_p5, %p84_p3 }
  0x26   : > { %s7440_s3 = sand.u32 1, %s7250_s27   ;;  %p7445_p8 = pnand %p6692_p6, %p80_p4 }
  0x27   : > { %s8771_s30 = scalar_select %p7435_p7, 1, 0 }
  0x28   : > { %s7443_s25 = smul.u32 192, %s7440_s3  ;;  %s725_s1 = sand.u32 1, %s7254_s28  }
  0x29   : > { %s7450_s4 = smul.u32 3072, %s7254_s28  ;;  %s8773_s0 = sld [smem:[#allocation22_spill]] }
  0x2a   : > { %s729_s27 = scalar_lea.vmem [#allocation6], %s7443_s25  ;;  %s7464_s23 = scalar_lea.sflag [#allocation7], %s725_s1 }
  0x2b   : > { %s736_s2 = sshll.u32 %s729_s27, 4  ;;  %p7470_p12 = pneg %p7445_p8  ;;  %s7461_s2 = int_to_ptr.vmem [resolvable:$true] %s736_s2 }
  0x2f   : > { %s7457_s7 = scalar_lea.hbm %s8773_s0, %s7450_s4  ;;  %s7105_s27 = scalar_lea.hbm %s8773_s0, 6144 }
  0x30   : > { %s7100_s22 = scalar_lea.hbm %s7457_s7, 3072  ;;  %p7106_p1 = scmp.lt.s32.totalorder %s7457_s7, %s8773_s0 }
  0x31   : > { %p7101_p11 = scmp.ne.s32.totalorder %s7457_s7, %s7100_s22  ;;  %p7107_p2 = scmp.lt.s32.totalorder %s7105_s27, %s7100_s22 }
  0x33   : > { %p7103_p13 = pnand %p7470_p12, %p7101_p11  ;;  %p7108_p3 = por %p7107_p2, %p7106_p1 }
  0x35   : > { %p7104_p0 = pneg %p7103_p13 }
  0x37   : > { %p7109_p4 = pnand %p7108_p3, %p7104_p0 }
  0x39   : > { %7112 = shalt.err (!%p7109_p4)
}
  0x3a   : > { %s7113_s1 = scalar_lea.vmem %s7461_s2, 3072  ;;  %s7256_s18 = smov [#allocation6]  }
  0x3b   : > { %p7114_p5 = scmp.ne.s32.totalorder %s7461_s2, %s7113_s1  ;;  %s7118_s5 = sshll.u32 %s7256_s18, 4  ;;  %s7119_s5 = int_to_ptr.vmem [resolvable:$false] %s7118_s5 }
  0x3c   : > { %s7120_s29 = scalar_lea.vmem %s7119_s5, 6144  ;;  %p7121_p13 = scmp.lt.s32.totalorder %s7461_s2, %s7119_s5 }
  0x3d   : > { %p7116_p6 = pnand %p7114_p5, %p7470_p12  ;;  %p7122_p9 = scmp.lt.s32.totalorder %s7120_s29, %s7113_s1 }
  0x3f   : > { %p7117_p11 = pneg %p7116_p6  ;;  %p7123_p10 = por %p7122_p9, %p7121_p13 }
  0x41   : > { %p7124_p7 = pnand %p7123_p10, %p7117_p11 }
  0x43   : > { %7127 = shalt.err (!%p7124_p7)
}
  0x44   : > { %s8740_s19 = smov 64   ;;  %s8742_s18 = smov 4  }
  0x45   : > { %6685 = dma.hbm_to_vmem [thread:$0]  (!%p7445_p8), %s7457_s7, 3072, %s7461_s2, %s7464_s23, %s8740_s19, %s8740_s19, %s8742_s18  }
  0x46   : > { %p8775_p9 = scmp.lt.s32.totalorder %s7254_s28, 3  ;;  %p8776_p7 = scmp.ge.s32.totalorder %s7254_s28, 1 }
  0x47   : > { %s8778_s1 = sld [smem:[#allocation19_spill]]  ;;  %s696_s29 = scalar_lea.vmem [#allocation4], %s7443_s25 }
  0x48   : > { %p7500_p10 = pnand %p8776_p7, %p8775_p9  ;;  %s703_s0 = sshll.u32 %s696_s29, 4  ;;  %s7511_s0 = int_to_ptr.vmem [resolvable:$true] %s703_s0 }
  0x49   : > { %s8779_s9 = sld [smem:[#allocation27_spill]]  ;;  %s693_s19 = scalar_lea.sflag [#allocation5], %s7440_s3 }
  0x4a   : > { %s8777_s20 = scalar_select %p7500_p10, 1, 0 }
  0x4d   : > { %s7508_s5 = scalar_lea.hbm %s8778_s1, %s7450_s4  ;;  %s7133_s17 = scalar_lea.hbm %s8778_s1, 6144 }
  0x4e   : > { %s7128_s18 = scalar_lea.hbm %s7508_s5, 3072  ;;  %p7134_p3 = scmp.lt.s32.totalorder %s7508_s5, %s8778_s1 }
  0x4f   : > { %s7517_s7 = scalar_lea.hbm %s8779_s9, %s7450_s4  ;;  %p7129_p0 = scmp.ne.s32.totalorder %s7508_s5, %s7128_s18 }
  0x50   : > { %p7135_p4 = scmp.lt.s32.totalorder %s7133_s17, %s7128_s18 }
  0x51   : > { %p7131_p1 = pnand %p7129_p0, %p7470_p12 }
  0x52   : > { %p7136_p5 = por %p7135_p4, %p7134_p3 }
  0x53   : > { %p7132_p2 = pneg %p7131_p1 }
  0x55   : > { %p7137_p6 = pnand %p7136_p5, %p7132_p2 }
  0x57   : > { %7140 = shalt.err (!%p7137_p6)
}
  0x58   : > { %s7141_s24 = scalar_lea.vmem %s7511_s0, 3072  ;;  %s7259_s4 = smov [#allocation4]  }
  0x59   : > { %p7142_p11 = scmp.ne.s32.totalorder %s7511_s0, %s7141_s24  ;;  %s7146_s29 = sshll.u32 %s7259_s4, 4  ;;  %s7147_s29 = int_to_ptr.vmem [resolvable:$false] %s7146_s29 }
  0x5a   : > { %s7148_s2 = scalar_lea.vmem %s7147_s29, 6144  ;;  %p7149_p7 = scmp.lt.s32.totalorder %s7511_s0, %s7147_s29 }
  0x5b   : > { %p7144_p13 = pnand %p7142_p11, %p7470_p12  ;;  %p7150_p0 = scmp.lt.s32.totalorder %s7148_s2, %s7141_s24 }
  0x5d   : > { %p7145_p9 = pneg %p7144_p13  ;;  %p7151_p1 = por %p7150_p0, %p7149_p7 }
  0x5f   : > { %p7152_p10 = pnand %p7151_p1, %p7145_p9 }
  0x61   : > { %7155 = shalt.err (!%p7152_p10)
}
  0x62   : > { %s8780_s13 = smov 4   ;;  %s8781_s16 = smov 64  }
  0x63   : > { %6682 = dma.hbm_to_vmem [thread:$0]  (!%p7445_p8), %s7508_s5, 3072, %s7511_s0, %s693_s19, %s8781_s16, %s8781_s16, %s8780_s13  }
  0x64   : > { %s777_s17 = scalar_lea.vmem [#allocation8], %s7443_s25  ;;  %s6665_s22 = smul.u32 576, %s7440_s3 }
  0x65   : > { %s784_s18 = sshll.u32 %s777_s17, 4  ;;  %s7156_s27 = scalar_lea.hbm %s7517_s7, 3072  ;;  %s7544_s18 = int_to_ptr.vmem [resolvable:$true] %s784_s18 }
  0x66   : > { %p7157_p10 = scmp.ne.s32.totalorder %s7517_s7, %s7156_s27  ;;  %s7161_s29 = scalar_lea.hbm %s8779_s9, 6144 }
  0x67   : > { %p7162_p4 = scmp.lt.s32.totalorder %s7517_s7, %s8779_s9  ;;  %p7163_p5 = scmp.lt.s32.totalorder %s7161_s29, %s7156_s27 }
  0x68   : > { %p7159_p2 = pnand %p7157_p10, %p7470_p12 }
  0x69   : > { %p7164_p6 = por %p7163_p5, %p7162_p4 }
  0x6a   : > { %p7160_p3 = pneg %p7159_p2 }
  0x6c   : > { %p7165_p11 = pnand %p7164_p6, %p7160_p3 }
  0x6e   : > { %7168 = shalt.err (!%p7165_p11)
}
  0x6f   : > { %s7169_s25 = scalar_lea.vmem %s7544_s18, 3072  ;;  %s7260_s0 = smov [#allocation8]  }
  0x70   : > { %p7170_p13 = scmp.ne.s32.totalorder %s7544_s18, %s7169_s25  ;;  %s7174_s19 = sshll.u32 %s7260_s0, 4  ;;  %s7175_s19 = int_to_ptr.vmem [resolvable:$false] %s7174_s19 }
  0x71   : > { %s7176_s5 = scalar_lea.vmem %s7175_s19, 6144  ;;  %p7177_p0 = scmp.lt.s32.totalorder %s7544_s18, %s7175_s19 }
  0x72   : > { %p7172_p9 = pnand %p7170_p13, %p7470_p12  ;;  %p7178_p1 = scmp.lt.s32.totalorder %s7176_s5, %s7169_s25 }
  0x74   : > { %p7173_p7 = pneg %p7172_p9  ;;  %p7179_p10 = por %p7178_p1, %p7177_p0 }
  0x76   : > { %p7180_p2 = pnand %p7179_p10, %p7173_p7 }
  0x78   : > { %7183 = shalt.err (!%p7180_p2)
}
  0x79   : > { %6688 = dma.hbm_to_vmem [thread:$0]  (!%p7445_p8), %s7517_s7, 3072, %s7544_s18, %s7464_s23, %s8781_s16, %s8781_s16, %s8780_s13  }
  0x7a   : > { %s6666_s1 = smul.u32 9216, %s7254_s28  ;;  %s804_s17 = scalar_lea.vmem [#allocation9], %s6665_s22 }
  0x7b   : > { %s811_s27 = sshll.u32 %s804_s17, 4  ;;  %s8782_s11 = sld [smem:[#allocation28_spill]]  ;;  %s7579_s27 = int_to_ptr.vmem [resolvable:$true] %s811_s27 }
  0x7c   : > { %s801_s2 = scalar_lea.sflag [#allocation10], %s7440_s3 }
  0x81   : > { %s7577_s29 = scalar_lea.hbm %s8782_s11, %s6666_s1  ;;  %s7189_s7 = scalar_lea.hbm %s8782_s11, 18432 }
  0x82   : > { %s7184_s25 = scalar_lea.hbm %s7577_s29, 9216  ;;  %p7190_p6 = scmp.lt.s32.totalorder %s7577_s29, %s8782_s11 }
  0x83   : > { %p7185_p3 = scmp.ne.s32.totalorder %s7577_s29, %s7184_s25  ;;  %p7191_p11 = scmp.lt.s32.totalorder %s7189_s7, %s7184_s25 }
  0x85   : > { %p7187_p4 = pnand %p7185_p3, %p7470_p12  ;;  %p7192_p13 = por %p7191_p11, %p7190_p6 }
  0x87   : > { %p7188_p5 = pneg %p7187_p4 }
  0x89   : > { %p7193_p9 = pnand %p7192_p13, %p7188_p5 }
  0x8b   : > { %7196 = shalt.err (!%p7193_p9)
}
  0x8c   : > { %s7197_s3 = scalar_lea.vmem %s7579_s27, 9216  ;;  %s7261_s0 = smov [#allocation9]  }
  0x8d   : > { %p7198_p7 = scmp.ne.s32.totalorder %s7579_s27, %s7197_s3  ;;  %s7202_s19 = sshll.u32 %s7261_s0, 4  ;;  %s7203_s19 = int_to_ptr.vmem [resolvable:$false] %s7202_s19 }
  0x8e   : > { %s7204_s5 = scalar_lea.vmem %s7203_s19, 18432  ;;  %p7205_p10 = scmp.lt.s32.totalorder %s7579_s27, %s7203_s19 }
  0x8f   : > { %p7200_p0 = pnand %p7198_p7, %p7470_p12  ;;  %p7206_p2 = scmp.lt.s32.totalorder %s7204_s5, %s7197_s3 }
  0x91   : > { %p7201_p1 = pneg %p7200_p0  ;;  %p7207_p3 = por %p7206_p2, %p7205_p10 }
  0x93   : > { %p7208_p4 = pnand %p7207_p3, %p7201_p1 }
  0x95   : > { %7211 = shalt.err (!%p7208_p4)
}
  0x96   : > { %6691 = dma.hbm_to_vmem [thread:$0]  (!%p7445_p8), %s7577_s29, 9216, %s7579_s27, %s801_s2, %s8781_s16, %s8781_s16, %s8780_s13  }
  0x97   : > { %p8783_p12 = scmp.ne.s32.totalorder %s8777_s20, 0 }
  0x98   : > { %s866_s21 = sand.u32 (!%p8783_p12), 1, %s7246_s26   ;;  %p8784_p5 = scmp.ne.s32.totalorder (!%p8783_p12), %s8771_s30, 0 }
  0x99   : > { %864 = sbr.rel (%p8783_p12) target bundleno = 3548 (0xddc), region = 116  ;;  %s867_s17 = scalar_lea.sflag (!%p8783_p12), [#allocation5], %s866_s21 }
  0x9a   : > { %s6667_s1 = smul.u32 (!%p8783_p12), 192, %s866_s21 }
  0x9c   : > { %s7608_s24 = scalar_lea.vmem (!%p8783_p12), [#allocation4], %s6667_s1 }
  0x9e   : > { %7229 = dma.done.wait (%p8784_p5), %s867_s17, 3072  }
  0x9f   : > { %7231 = vsyncadd (%p8784_p5), %s867_s17, 4294964224  ;;  %s875_s8 = sand.u32 1, %s7418_s6   ;;  %s7615_s13 = scalar_lea.vmem [#allocation6], %s6667_s1 }
  0xa0   : > { %s876_s4 = scalar_lea.sflag [#allocation7], %s875_s8 }
  0xa1   : > { %7233 = dma.done.wait (%p8784_p5), %s876_s4, 6144  }
  0xa2   : > { %7235 = vsyncadd (%p8784_p5), %s876_s4, 4294961152  ;;  %s6668_s20 = smul.u32 576, %s866_s21  ;;  %s7621_s16 = scalar_lea.vmem [#allocation8], %s6667_s1 }
  0xa3   : > { %s894_s27 = scalar_lea.sflag [#allocation10], %s866_s21 }
  0xa4   : > { %s7623_s29 = scalar_lea.vmem [#allocation9], %s6668_s20 }
  0xa5   : > { %7237 = dma.done.wait (%p8784_p5), %s894_s27, 9216  }
  0xa6   : > { %7239 = vsyncadd (%p8784_p5), %s894_s27, 4294958080  ;;  %p1019_p8 = scmp.lt.s32.totalorder %s7418_s6, 1  ;;  %s8789_s9 = sld [smem:[#allocation24_spill]] }
  0xa7   : > { %s8790_s7 = sld [smem:[#allocation25_spill]]  ;;  %p5849_p6 = scmp.ne.s32.totalorder %s7418_s6, 0 }
  0xa8   : > { %s7631_s2 = scalar_select %p1019_p8, %s7418_s6, 1 }
  0xa9   : > { %s8791_s28 = sld [smem:[#allocation29_spill]] }
  0xaa   : > { %s6669_s1 = smul.u32 768, %s7631_s2  ;;  %s5844_s17 = sshll.u32 %s7631_s2, 2 }
  0xab   : > { %s6670_s8 = smul.u32 224, %s7631_s2  ;;  %s5846_s4 = sshll.u32 %s7631_s2, 3 }
  0xac   : > { %s7654_s11 = scalar_lea.vmem %s8789_s9, %s6669_s1  ;;  %s7674_s9 = scalar_lea.vmem %s8713_s14, %s5846_s4 }
  0xad   : > { %s7659_s18 = scalar_lea.vmem %s8790_s7, %s5844_s17  ;;  %s1057_s30 = scalar_lea.vmem %s8714_s15, %s7631_s2 }
  0xae   : > { %s6142_s22 = sshll.u32 %s7631_s2, 5  ;;  %s8792_s5 = sld [smem:[#allocation30_spill]] }
  0xaf   : > { %s7683_s7 = scalar_lea.vmem %s8791_s28, %s6670_s8  ;;  %s8793_s27 = sld [smem:[#allocation31_spill]] }
  0xb0   : > { %s8794_s25 = sld [smem:[#allocation18_spill]] (!%p5849_p6) }
  0xb1   : > { %1070 = sbr.rel (%p5849_p6) target bundleno = 194 (0xc2), region = 136  ;;  %s8795_s19 = sld [smem:[#allocation38_spill]] (!%p5849_p6) }
  0xb4   : > { %s7689_s3 = scalar_lea.vmem %s8792_s5, %s6142_s22 }
  0xb5   : > { %s1065_s4 = scalar_lea.vmem %s8793_s27, %s7631_s2 }
  0xb6   : > { %v1071_v0 = vld [vmem:[%s8794_s25] sm:$0xff]  ;;  %v1072_v1 = vld [vmem:[%s8794_s25 + $0x8] sm:$0xff]  ;;  %v1073_v2 = vld [vmem:[%s8794_s25 + $0x10] sm:$0xff]  ;;  %vm1097_vm0 = vcmask 261120   ;;  %vm1100_vm1 = vcmask 259072   ;;  %v7262_v4 = vmov 0.0  }
  0xb7   : > { %1075 = vst [vmem:[%s8795_s19] sm:$0xff] %v1071_v0  ;;  %1076 = vst [vmem:[%s8795_s19 + $0x8] sm:$0xff] %v1072_v1  ;;  %v1074_v3 = vld [vmem:[%s8794_s25 + $0x18] sm:$0xff] }
  0xb8   : > { %1077 = vst [vmem:[%s8795_s19 + $0x10] sm:$0xff] %v1073_v2  ;;  %1079 = vst [vmem:[#allocation2] sm:$0xff] %v7262_v4 }
  0xb9   : > { %1080 = vst [vmem:[#allocation2 + $0x38] sm:$0xff] %v7262_v4  ;;  %1081 = vst [vmem:[#allocation2 + $0x78] sm:$0xff] %v7262_v4 }
  0xba   : > { %1085 = vst [vmem:[#allocation2 + $0x70] sm:$0x3] %v7262_v4  ;;  %1086 = vst [vmem:[#allocation2 + $0x80] sm:$0x3] %v7262_v4 }
  0xbb   : > { %1087 = vst [vmem:[#allocation2 + $0x88] sm:$0x3] %v7262_v4  ;;  %1088 = vst [vmem:[#allocation2 + $0x40] sm:$0xff] %v7262_v4 }
  0xbc   : > { %1089 = vst [vmem:[#allocation2 + $0x50] sm:$0xff] %v7262_v4  ;;  %1090 = vst [vmem:[#allocation2 + $0x28] sm:$0xff] %v7262_v4 }
  0xbd   : > { %1094 = vst [vmem:[#allocation2 + $0x18] sm:$0x3] %v7262_v4  ;;  %1095 = vst [vmem:[#allocation2 + $0x68] sm:$0x3] %v7262_v4 }
  0xbe   : > { %1096 = vst [vmem:[#allocation2 + $0x60] sm:$0x3] %v7262_v4  ;;  %1098 = vst.msk [vmem:[#allocation3] sm:$0xff] %vm1097_vm0, %v7262_v4 }
  0xbf   : > { %1099 = vst.msk [vmem:[#allocation3 + $0x8] sm:$0xff] %vm1097_vm0, %v7262_v4  ;;  %1102 = vst.msk [vmem:[#allocation3 + $0x18] sm:$0xff] %vm1097_vm0, %v7262_v4 }
  0xc0   : > { %1103 = vst.msk [vmem:[#allocation3 + $0x20] sm:$0xff] %vm1097_vm0, %v7262_v4  ;;  %1078 = vst [vmem:[%s8795_s19 + $0x18] sm:$0xff] %v1074_v3 }
  0xc1   : > { %1101 = vst.msk [vmem:[#allocation3 + $0x10] sm:$0x3f] %vm1100_vm1, %v7262_v4  ;;  %1104 = vst.msk [vmem:[#allocation3 + $0x28] sm:$0x3f] %vm1100_vm1, %v7262_v4 }
  0xc2 PF: > { %v6764_v5 = vld [vmem:[%s7608_s24 + $0x78] sm:$0xff]   ;;  %v6767_v8 = vld [vmem:[%s7608_s24 + $0x70] sm:$0xff]   ;;  %v6770_v11 = vld [vmem:[%s7608_s24 + $0x68] sm:$0xff]   ;;  %s8796_s28 = sld [smem:[#allocation38_spill]]  ;;  %vm1115_vm2 = vcmask 1040384   ;;  %vm1200_vm3 = vcmask 1046528   ;;  %s8805_s5 = scalar_lea.vmem %s8709_s10, %s7631_s2 }
  0xc3   : > { %v6765_v6 = vld [vmem:[%s7608_s24 + $0x38] sm:$0xff]   ;;  %6143 = vmatprep.subr.bf16.mxu0 %v6764_v5  ;;  %v6768_v9 = vld [vmem:[%s7608_s24 + $0x30] sm:$0xff]   ;;  %v6771_v12 = vld [vmem:[%s7608_s24 + $0x28] sm:$0xff]   ;;  %vm1219_vm4 = vcmask 1045504   ;;  %s8797_s20 = sld [smem:[#allocation20_spill]]  ;;  %vm4406_vm13 = vcmask 261120  }
  0xc4   : > { %v6766_v7 = vld [vmem:[%s7608_s24 + $0xb8] sm:$0xff]   ;;  %6144 = vmatpush3.bf16.msra.mxu0 %v6765_v6  ;;  %v6769_v10 = vld [vmem:[%s7608_s24 + $0xb0] sm:$0xff]   ;;  %v6772_v13 = vld [vmem:[%s7608_s24 + $0xa8] sm:$0xff]   ;;  %s8799_s17 = sld [smem:[#allocation21_spill]]  ;;  %vm4523_vm14 = vcmask 523264   ;;  %vm4528_vm15 = vcmask 785408  }
  0xc5   : > { %6493 = vmatprep.subr.bf16.mxu1 %v6766_v7  ;;  %6145 = vmatprep.subr.bf16.mxu0 %v6767_v8  ;;  %v6773_v14 = vld [vmem:[%s7608_s24 + $0x60] sm:$0xff]   ;;  %v6776_v17 = vld [vmem:[%s7608_s24 + $0x58] sm:$0xff]   ;;  %v6779_v20 = vld [vmem:[%s7608_s24 + $0x50] sm:$0xff]   ;;  %s8801_s26 = sld [smem:[#allocation23_spill]]  ;;  %vm4692_vm0 = vcmask 130048   ;;  %vm7271_vm1 = vmmov 0  }
  0xc6   : > { %6494 = vmatpush3.bf16.msra.mxu1 %v6766_v7  ;;  %v6774_v15 = vld [vmem:[%s7608_s24 + $0x20] sm:$0xff]   ;;  %v6778_v18 = vld [vmem:[%s7608_s24 + $0x98] sm:$0xff]   ;;  %v6781_v21 = vld [vmem:[%s7608_s24 + $0x90] sm:$0xff]   ;;  %s8803_s0 = sld [smem:[#allocation26_spill]]  ;;  %p6114_p11 = scmp.ne.s32.totalorder %s7418_s6, 1 }
  0xc7   : > { %6495 = vmatprep.subr.bf16.mxu1 %v6769_v10  ;;  %v6775_v16 = vld [vmem:[%s7608_s24 + $0xa0] sm:$0xff]   ;;  %v6777_v19 = vld [vmem:[%s7608_s24 + $0x18] sm:$0xff]   ;;  %v6780_v22 = vld [vmem:[%s7608_s24 + $0x10] sm:$0xff]   ;;  %s8809_s23 = sld [smem:[#allocation34_spill]] }
  0xc8   : > { %6146 = vmatpush3.bf16.msra.mxu0 %v6768_v9  ;;  %v6782_v23 = vld [vmem:[%s7608_s24 + $0x48] sm:$0xff]   ;;  %v6785_v26 = vld [vmem:[%s7608_s24 + $0x40] sm:$0xff]   ;;  %v1107_v30 = vld [vmem:[%s8796_s28 + $0x10] sm:$0xff] }
  0xc9   : > { %6147 = vmatprep.subr.bf16.mxu0 %v6770_v11  ;;  %v6783_v24 = vld [vmem:[%s7608_s24 + $0x8] sm:$0xff]   ;;  %v6787_v27 = vld [vmem:[%s7608_s24 + $0x80] sm:$0xff]   ;;  %v1108_v34 = vld [vmem:[%s8796_s28 + $0x18] sm:$0xff]  ;;  %v1119_v35 = vrot.slane %v1107_v30, 7  ;;  %s8798_s1 = scalar_lea.vmem %s8797_s20, %s7631_s2  ;;  %s8806_s20 = scalar_lea.vmem %s8711_s12, %s7631_s2 }
  0xca   : > { %6496 = vmatpush3.bf16.msra.mxu1 %v6769_v10  ;;  %v6784_v25 = vld [vmem:[%s7608_s24 + $0x88] sm:$0xff]   ;;  %v1105_v28 = vld [vmem:[%s8796_s28] sm:$0xff]  ;;  %v1120_v36 = vrot.slane %v1108_v34, 7  ;;  %v6788_v11 = vld [vmem:[%s7615_s13 + $0x78] sm:$0xff]   ;;  %s8800_s8 = scalar_lea.vmem %s8799_s17, %s7631_s2  ;;  %s8807_s17 = sld [smem:[#allocation32_spill]] }
  0xcb   : > { %6497 = vmatprep.subr.bf16.mxu1 %v6772_v13  ;;  %v1106_v29 = vld [vmem:[%s8796_s28 + $0x8] sm:$0xff]  ;;  %v6786_v31 = vld [vmem:[%s7608_s24] sm:$0xff]   ;;  %v1116_v32 = vrot.slane %v1105_v28, 7  ;;  %1131 = vst [vmem:[#allocation2 + $0x40] sm:$0xfe] %v1119_v35  ;;  %v6807_v30 = vld [vmem:[%s7615_s13 + $0x90] sm:$0xff]   ;;  %s8802_s19 = scalar_lea.vmem %s8801_s26, %s7631_s2 }
  0xcc   : > { %6148 = vmatpush3.bf16.msra.mxu0 %v6771_v12  ;;  %v1117_v33 = vrot.slane %v1106_v29, 7  ;;  %v1121_v39 = vsel %vm1115_vm2, %v1119_v35, %v1120_v36  ;;  %1133 = vst [vmem:[#allocation2 + $0x18] sm:$0x1] %v1120_v36  ;;  %v6789_v12 = vld [vmem:[%s7615_s13 + $0x38] sm:$0xff]   ;;  %v6805_v28 = vld [vmem:[%s7615_s13 + $0x48] sm:$0xff]   ;;  %v6811_v34 = vld [vmem:[%s7615_s13 + $0x80] sm:$0xff]   ;;  %s8804_s21 = scalar_lea.vmem %s8803_s0, %s7631_s2 }
  0xcd   : > { %6149 = vmatprep.subr.bf16.mxu0 %v6773_v14  ;;  %1128 = vst [vmem:[#allocation2] sm:$0xfe] %v1116_v32  ;;  %v1226_v41 = vrot.slane %v1121_v39, 2  ;;  %v1207_v45 = vrot.slane %v1121_v39, 1  ;;  %v6791_v14 = vld [vmem:[%s7615_s13 + $0x30] sm:$0xff]   ;;  %v6806_v29 = vld [vmem:[%s7615_s13 + $0x8] sm:$0xff]  }
  0xce   : > { %6498 = vmatpush3.bf16.msra.mxu1 %v6772_v13  ;;  %v1118_v37 = vsel %vm1115_vm2, %v1116_v32, %v1117_v33  ;;  %1130 = vst [vmem:[#allocation2 + $0x70] sm:$0x1] %v1117_v33  ;;  %v6790_v13 = vld [vmem:[%s7615_s13 + $0x70] sm:$0xff]   ;;  %v6809_v32 = vld [vmem:[%s7615_s13] sm:$0xff]   ;;  %v6810_v33 = vld [vmem:[%s7615_s13 + $0x88] sm:$0xff]   ;;  %s7269_s24 = smov 64  }
  0xcf   : > { %6499 = vmatprep.subr.bf16.mxu1 %v6775_v16  ;;  %v1202_v38 = vrot.slane %v1118_v37, 1  ;;  %v1221_v40 = vrot.slane %v1118_v37, 2  ;;  %v6814_v35 = vld [vmem:[%s7654_s11 + $0xe4] ss:$16 sps:$4 sm:$0xff]   ;;  %s8811_s26 = sld [smem:[#allocation35_spill]] }
  0xd0   : > { %6150 = vmatpush3.bf16.msra.mxu0 %v6774_v15  ;;  %v6792_v15 = vld [vmem:[%s7615_s13 + $0xb8] sm:$0xff]   ;;  %v6838_v36 = vld [vmem:[%s7654_s11 + $0x2e4] ss:$16 sps:$4 sm:$0xff]   ;;  %s8815_s0 = sld [smem:[#allocation38_spill]] (!%p6114_p11) }
  0xd1   : > { %6151 = vmatprep.subr.bf16.mxu0 %v6776_v17  ;;  %v6794_v17 = vld [vmem:[%s7615_s13 + $0x28] sm:$0xff]  }
  0xd2   : > { %6500 = vmatpush3.bf16.msra.mxu1 %v6775_v16  ;;  %v1192_v53 = vld [vmem:[#allocation2 + $0x40] sm:$0xfc]  ;;  %v6793_v16 = vld [vmem:[%s7615_s13 + $0x68] sm:$0xff]  }
  0xd3   : > { %6501 = vmatprep.subr.bf16.mxu1 %v6778_v18  ;;  %v1193_v54 = vld [vmem:[#allocation2 + $0x18] sm:$0x3]  ;;  %v1225_v57 = vrot.slane %v1192_v53, 2  ;;  %v1188_v59 = vld [vmem:[#allocation2 + $0x40] sm:$0xfe] }
  0xd4   : > { %6152 = vmatpush3.bf16.msra.mxu0 %v6777_v19  ;;  %v1186_v42 = vld [vmem:[#allocation2] sm:$0xfe]  ;;  %v1228_v58 = vrot.slane %v1193_v54, 2  ;;  %v1189_v60 = vld [vmem:[#allocation2 + $0x18] sm:$0x1]  ;;  %v1206_v0 = vrot.slane %v1188_v59, 1 }
  0xd5   : > { %6153 = vmatprep.subr.bf16.mxu0 %v6779_v20  ;;  %v1187_v43 = vld [vmem:[#allocation2 + $0x70] sm:$0x1]  ;;  %v1182_v44 = vld [vmem:[#allocation2] sm:$0xff]  ;;  %v1201_v46 = vrot.slane %v1186_v42, 1  ;;  %v1227_v2 = vsel %vm1219_vm4, %v1225_v57, %v1226_v41  ;;  %v1209_v4 = vrot.slane %v1189_v60, 1 }
  0xd6   : > { %6502 = vmatpush3.bf16.msra.mxu1 %v6778_v18  ;;  %v1204_v47 = vrot.slane %v1187_v43, 1  ;;  %v1190_v48 = vld [vmem:[#allocation2] sm:$0xfc]  ;;  %v1191_v49 = vld [vmem:[#allocation2 + $0x70] sm:$0x3]  ;;  %v1234_v50 = vpack.c.bf16 %v1118_v37, %v1182_v44  ;;  %v1229_v3 = vsel %vm1219_vm4, %v1226_v41, %v1228_v58  ;;  %v1208_v6 = vsel %vm1200_vm3, %v1206_v0, %v1207_v45 }
  0xd7   : > { %6503 = vmatprep.subr.bf16.mxu1 %v6781_v21  ;;  %v1220_v51 = vrot.slane %v1190_v48, 2  ;;  %v1223_v52 = vrot.slane %v1191_v49, 2  ;;  %v1203_v55 = vsel %vm1200_vm3, %v1201_v46, %v1202_v38  ;;  %v1239_v5 = vpack.c.bf16 %v1229_v3, %v1227_v2  ;;  %v1184_v7 = vld [vmem:[#allocation2 + $0x40] sm:$0xff]  ;;  %v6795_v18 = vld [vmem:[%s7615_s13 + $0xb0] sm:$0xff]  }
  0xd8   : > { %6154 = vmatpush3.bf16.msra.mxu0 %v6780_v22  ;;  %v1205_v56 = vsel %vm1200_vm3, %v1202_v38, %v1204_v47  ;;  %v1210_v8 = vsel %vm1200_vm3, %v1207_v45, %v1209_v4  ;;  %v1237_v10 = vpack.c.bf16 %v1121_v39, %v1184_v7  ;;  %v6796_v19 = vld [vmem:[%s7615_s13 + $0x60] sm:$0xff]   ;;  %v6799_v22 = vld [vmem:[%s7615_s13 + $0x58] sm:$0xff]  }
  0xd9   : > { %6155 = vmatprep.subr.bf16.mxu0 %v6782_v23  ;;  %v1235_v61 = vpack.c.bf16 %v1205_v56, %v1203_v55  ;;  %v1222_v62 = vsel %vm1219_vm4, %v1220_v51, %v1221_v40  ;;  %v1224_v63 = vsel %vm1219_vm4, %v1221_v40, %v1223_v52  ;;  %v1238_v9 = vpack.c.bf16 %v1210_v8, %v1208_v6  ;;  %v6797_v20 = vld [vmem:[%s7615_s13 + $0x20] sm:$0xff]   ;;  %v6800_v23 = vld [vmem:[%s7615_s13 + $0x18] sm:$0xff]  }
  0xda   : > { %6504 = vmatpush3.bf16.msra.mxu1 %v6781_v21  ;;  %v1236_v1 = vpack.c.bf16 %v1224_v63, %v1222_v62  ;;  %v6798_v21 = vld [vmem:[%s7615_s13 + $0xa8] sm:$0xff]   ;;  %v5850_v40 = vld [vmem:[%s8798_s1] ss:$0 sm:$0xff]  ;;  %s7264_s1 = smov 127  }
  0xdb   : > { %6505 = vmatprep.subr.bf16.mxu1 %v6784_v25  ;;  %1422 = vmatprep.mubr.bf16.mxu0 %v1235_v61  ;;  %v5875_v45 = vld [vmem:[%s8800_s8] ss:$0 sm:$0xff]  ;;  %s7272_s8 = smov 120  }
  0xdc   : > { %6156 = vmatpush3.bf16.msra.mxu0 %v6783_v24  ;;  %6509 = vmatprep.mubr.bf16.mxu1 %v1236_v1  ;;  %v6801_v24 = vld [vmem:[%s7615_s13 + $0xa0] sm:$0xff]  }
  0xdd   : > { %6157 = vmatprep.subr.bf16.mxu0 %v6785_v26  ;;  %v6803_v26 = vld [vmem:[%s7615_s13 + $0x10] sm:$0xff]  }
  0xde   : > { %6506 = vmatpush3.bf16.msra.mxu1 %v6784_v25  ;;  %v6802_v25 = vld [vmem:[%s7615_s13 + $0x50] sm:$0xff]  }
  0xdf   : > { %6507 = vmatprep.subr.bf16.mxu1 %v6787_v27 }
  0xe0   : > { %6158 = vmatpush3.bf16.msra.mxu0 %v6786_v31  ;;  %v6808_v31 = vld [vmem:[%s7615_s13 + $0x40] sm:$0xff]  }
  0xe1   : > { %6181 = vmatprep.subr.bf16.mxu0 %v6788_v11 }
  0xe2   : > { %6508 = vmatpush3.bf16.msra.mxu1 %v6787_v27  ;;  %v6804_v27 = vld [vmem:[%s7615_s13 + $0x98] sm:$0xff]  }
  0xe3   : > { %1423 = vmatmul.mubr.bf16.vlgmr.msra.gmra.mxu0 %v1234_v50  ;;  %6513 = vmatprep.subr.bf16.mxu1 %v6792_v15 }
  0xe4   : > { %1430 = vmatprep.mubr.bf16.mxu0 %v1238_v9  ;;  %6182 = vmatpush3.bf16.msra.mxu0 %v6789_v12 }
  0xe5   : > { %6510 = vmatmul.mubr.bf16.vlgmr.msra.gmra.mxu1 %v1239_v5  ;;  %6183 = vmatprep.subr.bf16.mxu0 %v6790_v13 }
  0xe6   : > { %6514 = vmatpush3.bf16.msra.mxu1 %v6792_v15 }
  0xe7   : > { %6515 = vmatprep.subr.bf16.mxu1 %v6795_v18 }
  0xe8   : > { %6184 = vmatpush3.bf16.msra.mxu0 %v6791_v14 }
  0xe9   : > { %6185 = vmatprep.subr.bf16.mxu0 %v6793_v16 }
  0xea   : > { %6516 = vmatpush3.bf16.msra.mxu1 %v6795_v18 }
  0xeb   : > { %1431 = vmatmul.mubr.bf16.gmra.mxu0 %v1237_v10  ;;  %6517 = vmatprep.subr.bf16.mxu1 %v6798_v21 }
  0xec   : > { %6186 = vmatpush3.bf16.msra.mxu0 %v6794_v17 }
  0xed   : > { %6187 = vmatprep.subr.bf16.mxu0 %v6796_v19 }
  0xee   : > { %6518 = vmatpush3.bf16.msra.mxu1 %v6798_v21 }
  0xef   : > { %6519 = vmatprep.subr.bf16.mxu1 %v6801_v24 }
  0xf0   : > { %6188 = vmatpush3.bf16.msra.mxu0 %v6797_v20 }
  0xf1   : > { %6189 = vmatprep.subr.bf16.mxu0 %v6799_v22 }
  0xf2   : > { %6520 = vmatpush3.bf16.msra.mxu1 %v6801_v24 }
  0xf3   : > { %6521 = vmatprep.subr.bf16.mxu1 %v6804_v27 }
  0xf4   : > { %6190 = vmatpush3.bf16.msra.mxu0 %v6800_v23 }
  0xf5   : > { %6191 = vmatprep.subr.bf16.mxu0 %v6802_v25 }
  0xf6   : > { %6522 = vmatpush3.bf16.msra.mxu1 %v6804_v27 }
  0xf7   : > { %6523 = vmatprep.subr.bf16.mxu1 %v6807_v30 }
  0xf8   : > { %6192 = vmatpush3.bf16.msra.mxu0 %v6803_v26 }
  0xf9   : > { %6193 = vmatprep.subr.bf16.mxu0 %v6805_v28 }
  0xfa   : > { %6524 = vmatpush3.bf16.msra.mxu1 %v6807_v30 }
  0xfb   : > { %6525 = vmatprep.subr.bf16.mxu1 %v6810_v33 }
  0xfc   : > { %6194 = vmatpush3.bf16.msra.mxu0 %v6806_v29 }
  0xfd   : > { %6195 = vmatprep.subr.bf16.mxu0 %v6808_v31  ;;  %v6812_v31 = vld [vmem:[%s7654_s11 + $0xe0] ss:$16 sps:$4 sm:$0xff]  }
  0xfe   : > { %6526 = vmatpush3.bf16.msra.mxu1 %v6810_v33  ;;  %v6817_v33 = vld [vmem:[%s7654_s11 + $0xc4] ss:$16 sps:$4 sm:$0xff]  }
  0xff   : > { %6527 = vmatprep.subr.bf16.mxu1 %v6811_v34 }
 0x100   : > { %6196 = vmatpush3.bf16.msra.mxu0 %v6809_v32 }
 0x101   : > { %2557 = vmatprep.subr.bf16.mxu0 %v6814_v35 }
 0x102   : > { %6528 = vmatpush3.bf16.msra.mxu1 %v6811_v34 }
 0x103   : > { %2610 = vmatprep.subr.bf16.mxu1 %v6838_v36 }
 0x1a3   : > { %v6159_v37 = vpop.f32.mrf.mxu0 }
 0x1a5   : > { %v6511_v38 = vpop.f32.mrf.mxu1  ;;  %v6160_v39 = vpop.f32.mrf.mxu0 }
 0x1a6   : > { %v6161_v41 = vadd.f32 %v6160_v39, %v6159_v37  ;;  %v6815_v39 = vld [vmem:[%s7654_s11 + $0xc0] ss:$16 sps:$4 sm:$0xff]  }
 0x1a7   : > { %v1473_v42 = vpop.f32.mrf.mxu1  ;;  %v6162_v43 = vpop.f32.mrf.mxu0 }
 0x1a8   : > { %v1425_v44 = vadd.f32 %v6161_v41, %v5850_v40 }
 0x1a9   : > { %v6512_v46 = vpop.f32.mrf.mxu1  ;;  %v6163_v47 = vpop.f32.mrf.mxu0 }
 0x1aa   : > { %v1474_v48 = vadd.f32 %v1473_v42, %v1425_v44  ;;  %v6164_v49 = vadd.f32 %v6163_v47, %v6162_v43  ;;  %v6820_v44 = vld [vmem:[%s7654_s11 + $0xa4] ss:$16 sps:$4 sm:$0xff]  }
 0x1ab   : > { %v6165_v50 = vpop.f32.mrf.mxu0  ;;  %v1476_v53 = vpop.f32.mrf.mxu1 }
 0x1ac   : > { %vm1488_vm5 = vcmp.ge.f32.partialorder %v1474_v48, 0.0  ;;  %v1498_v51 = vmul.f32 %v5875_v45, %v1474_v48  ;;  %v1428_v52 = vadd.f32 %v6164_v49, %v5850_v40 }
 0x1ad   : > { %v6166_v54 = vpop.f32.mrf.mxu0 }
 0x1ae   : > { %v1502_v55 = vsel %vm1488_vm5, %v1474_v48, %v1498_v51  ;;  %v1477_v56 = vadd.f32 %v1476_v53, %v1428_v52  ;;  %v6167_v57 = vadd.f32 %v6166_v54, %v6165_v50  ;;  %v6836_v50 = vld [vmem:[%s7654_s11 + $0x2e0] ss:$16 sps:$4 sm:$0xff]   ;;  %vm4830_vm5 = vcmask 1041409  }
 0x1af   : > { %v1511_v58 = vrot.slane %v1502_v55, 7  ;;  %v6168_v59 = vpop.f32.mrf.mxu0  ;;  %v6818_v53 = vld [vmem:[%s7654_s11 + $0xa0] ss:$16 sps:$4 sm:$0xff]   ;;  %v6823_v55 = vld [vmem:[%s7654_s11 + $0x84] ss:$16 sps:$4 sm:$0xff]  }
 0x1b0   : > { %vm1489_vm6 = vcmp.ge.f32.partialorder %v1477_v56, 0.0  ;;  %v1499_v60 = vmul.f32 %v5875_v45, %v1477_v56  ;;  %v1433_v61 = vadd.f32 %v6167_v57, %v5850_v40  ;;  %v6826_v57 = vld [vmem:[%s7654_s11 + $0x64] ss:$16 sps:$4 sm:$0xff]  }
 0x1b1   : > { %1523 = vst [vmem:[#allocation2] sm:$0xfe] %v1511_v58  ;;  %v6169_v62 = vpop.f32.mrf.mxu0 }
 0x1b2   : > { %v1503_v63 = vsel %vm1489_vm6, %v1477_v56, %v1499_v60  ;;  %v1482_v0 = vadd.f32 %v6511_v38, %v1433_v61  ;;  %v6170_v1 = vadd.f32 %v6169_v62, %v6168_v59  ;;  %v6821_v56 = vld [vmem:[%s7654_s11 + $0x80] ss:$16 sps:$4 sm:$0xff]   ;;  %v6829_v59 = vld [vmem:[%s7654_s11 + $0x44] ss:$16 sps:$4 sm:$0xff]   ;;  %vm4911_vm6 = vcmask 64512  }
 0x1b3   : > { %v1512_v2 = vrot.slane %v1503_v63, 7  ;;  %v6827_v60 = vld [vmem:[%s7654_s11 + $0x40] ss:$16 sps:$4 sm:$0xff]   ;;  %v6832_v61 = vld [vmem:[%s7654_s11 + $0x24] ss:$16 sps:$4 sm:$0xff]  }
 0x1b4   : > { %vm1490_vm7 = vcmp.ge.f32.partialorder %v1482_v0, 0.0  ;;  %v1500_v3 = vmul.f32 %v5875_v45, %v1482_v0  ;;  %v1436_v4 = vadd.f32 %v6170_v1, %v5850_v40  ;;  %v6830_v62 = vld [vmem:[%s7654_s11 + $0x20] ss:$16 sps:$4 sm:$0xff]   ;;  %v6835_v63 = vld [vmem:[%s7654_s11 + $0x4] ss:$16 sps:$4 sm:$0xff]  }
 0x1b5   : > { %1525 = vst [vmem:[#allocation2 + $0x70] sm:$0x1] %v1512_v2  ;;  %v1513_v11 = vsel %vm1115_vm2, %v1511_v58, %v1512_v2  ;;  %v6824_v58 = vld [vmem:[%s7654_s11 + $0x60] ss:$16 sps:$4 sm:$0xff]   ;;  %v6841_v1 = vld [vmem:[%s7654_s11 + $0x1e4] ss:$16 sps:$4 sm:$0xff]  }
 0x1b6   : > { %v1504_v5 = vsel %vm1490_vm7, %v1482_v0, %v1500_v3  ;;  %v1485_v6 = vadd.f32 %v6512_v46, %v1436_v4  ;;  %v1596_v18 = vrot.slane %v1513_v11, 1  ;;  %v1614_v20 = vrot.slane %v1513_v11, 2  ;;  %v6833_v0 = vld [vmem:[%s7654_s11] ss:$16 sps:$4 sm:$0xff]   ;;  %v6844_v3 = vld [vmem:[%s7654_s11 + $0x2c4] ss:$16 sps:$4 sm:$0xff]  }
 0x1b7   : > { %v1514_v7 = vrot.slane %v1504_v5, 7  ;;  %v6839_v2 = vld [vmem:[%s7654_s11 + $0x1e0] ss:$16 sps:$4 sm:$0xff]   ;;  %v6847_v5 = vld [vmem:[%s7654_s11 + $0x1c4] ss:$16 sps:$4 sm:$0xff]  }
 0x1b8   : > { %vm1491_vm8 = vcmp.ge.f32.partialorder %v1485_v6, 0.0  ;;  %v1501_v8 = vmul.f32 %v5875_v45, %v1485_v6  ;;  %v1581_v9 = vld [vmem:[#allocation2] sm:$0xfe] }
 0x1b9   : > { %v1585_v10 = vld [vmem:[#allocation2] sm:$0xfc]  ;;  %1526 = vst [vmem:[#allocation2 + $0x40] sm:$0xfe] %v1514_v7  ;;  %v1595_v14 = vrot.slane %v1581_v9, 1 }
 0x1ba   : > { %v1505_v12 = vsel %vm1491_vm8, %v1485_v6, %v1501_v8  ;;  %v1613_v15 = vrot.slane %v1585_v10, 2  ;;  %v1577_v22 = vld [vmem:[#allocation2] sm:$0xff] }
 0x1bb   : > { %v1515_v13 = vrot.slane %v1505_v12, 7  ;;  %v1597_v23 = vsel %vm1200_vm3, %v1595_v14, %v1596_v18  ;;  %v1627_v32 = vpack.c.bf16 %v1513_v11, %v1577_v22  ;;  %v6842_v4 = vld [vmem:[%s7654_s11 + $0x2c0] ss:$16 sps:$4 sm:$0xff]   ;;  %v6853_v9 = vld [vmem:[%s7654_s11 + $0x1a4] ss:$16 sps:$4 sm:$0xff]  }
 0x1bc   : > { %v1582_v16 = vld [vmem:[#allocation2 + $0x70] sm:$0x1]  ;;  %v1615_v25 = vsel %vm1219_vm4, %v1613_v15, %v1614_v20  ;;  %v6856_v11 = vld [vmem:[%s7654_s11 + $0x284] ss:$16 sps:$4 sm:$0xff]  }
 0x1bd   : > { %v1586_v17 = vld [vmem:[#allocation2 + $0x70] sm:$0x3]  ;;  %1528 = vst [vmem:[#allocation2 + $0x18] sm:$0x1] %v1515_v13  ;;  %v1598_v19 = vrot.slane %v1582_v16, 1  ;;  %v1516_v34 = vsel %vm1115_vm2, %v1514_v7, %v1515_v13 }
 0x1be   : > { %v1616_v21 = vrot.slane %v1586_v17, 2  ;;  %v1601_v40 = vrot.slane %v1516_v34, 1  ;;  %v1619_v42 = vrot.slane %v1516_v34, 2  ;;  %v6845_v6 = vld [vmem:[%s7654_s11 + $0x1c0] ss:$16 sps:$4 sm:$0xff]  }
 0x1bf   : > { %v1599_v24 = vsel %vm1200_vm3, %v1596_v18, %v1598_v19  ;;  %v6850_v7 = vld [vmem:[%s7654_s11 + $0x2a4] ss:$16 sps:$4 sm:$0xff]   ;;  %v6848_v8 = vld [vmem:[%s7654_s11 + $0x2a0] ss:$16 sps:$4 sm:$0xff]  }
 0x1c0   : > { %v1617_v26 = vsel %vm1219_vm4, %v1614_v20, %v1616_v21  ;;  %v1628_v27 = vpack.c.bf16 %v1599_v24, %v1597_v23  ;;  %v1583_v29 = vld [vmem:[#allocation2 + $0x40] sm:$0xfe] }
 0x1c1   : > { %v1629_v28 = vpack.c.bf16 %v1617_v26, %v1615_v25  ;;  %v1587_v30 = vld [vmem:[#allocation2 + $0x40] sm:$0xfc]  ;;  %v1600_v35 = vrot.slane %v1583_v29, 1 }
 0x1c2   : > { %1815 = vmatprep.mubr.bf16.mxu0 %v1628_v27  ;;  %v1618_v36 = vrot.slane %v1587_v30, 2  ;;  %v1579_v45 = vld [vmem:[#allocation2 + $0x40] sm:$0xff] }
 0x1c3   : > { %6529 = vmatprep.mubr.bf16.mxu1 %v1629_v28  ;;  %1816 = vmatmul.mubr.bf16.vlgmr.msra.gmra.mxu0 %v1627_v32  ;;  %v1602_v46 = vsel %vm1200_vm3, %v1600_v35, %v1601_v40  ;;  %v1630_v54 = vpack.c.bf16 %v1516_v34, %v1579_v45  ;;  %v6851_v10 = vld [vmem:[%s7654_s11 + $0x1a0] ss:$16 sps:$4 sm:$0xff]   ;;  %v6859_v13 = vld [vmem:[%s7654_s11 + $0x184] ss:$16 sps:$4 sm:$0xff]   ;;  %v6886_v32 = vld [vmem:[%s7654_s11 + $0xec] ss:$16 sps:$4 sm:$0xff]  }
 0x1c4   : > { %v1584_v37 = vld [vmem:[#allocation2 + $0x18] sm:$0x1]  ;;  %2558 = vmatpush1.bf16.msra.mxu0 %v6812_v31  ;;  %v1620_v48 = vsel %vm1219_vm4, %v1618_v36, %v1619_v42  ;;  %v6854_v12 = vld [vmem:[%s7654_s11 + $0x280] ss:$16 sps:$4 sm:$0xff]   ;;  %v6862_v15 = vld [vmem:[%s7654_s11 + $0x264] ss:$16 sps:$4 sm:$0xff]  }
 0x1c5   : > { %v1588_v38 = vld [vmem:[#allocation2 + $0x18] sm:$0x3]  ;;  %v1603_v41 = vrot.slane %v1584_v37, 1  ;;  %2559 = vmatprep.subr.bf16.mxu0 %v6817_v33  ;;  %v6857_v14 = vld [vmem:[%s7654_s11 + $0x180] ss:$16 sps:$4 sm:$0xff]   ;;  %v7263_v31 = vmov 0  }
 0x1c6   : > { %v1621_v43 = vrot.slane %v1588_v38, 2  ;;  %v6860_v16 = vld [vmem:[%s7654_s11 + $0x260] ss:$16 sps:$4 sm:$0xff]   ;;  %v6865_v17 = vld [vmem:[%s7654_s11 + $0x164] ss:$16 sps:$4 sm:$0xff]  }
 0x1c7   : > { %v1604_v47 = vsel %vm1200_vm3, %v1601_v40, %v1603_v41  ;;  %v6863_v18 = vld [vmem:[%s7654_s11 + $0x160] ss:$16 sps:$4 sm:$0xff]   ;;  %v6868_v19 = vld [vmem:[%s7654_s11 + $0x244] ss:$16 sps:$4 sm:$0xff]   ;;  %v6889_v33 = vld [vmem:[%s7654_s11 + $0x2ec] ss:$16 sps:$4 sm:$0xff]  }
 0x1c8   : > { %v1622_v49 = vsel %vm1219_vm4, %v1619_v42, %v1621_v43  ;;  %v1631_v51 = vpack.c.bf16 %v1604_v47, %v1602_v46  ;;  %2560 = vmatpush1.bf16.msra.mxu0 %v6815_v39  ;;  %v6866_v20 = vld [vmem:[%s7654_s11 + $0x240] ss:$16 sps:$4 sm:$0xff]   ;;  %v6871_v21 = vld [vmem:[%s7654_s11 + $0x144] ss:$16 sps:$4 sm:$0xff]  }
 0x1c9   : > { %v1632_v52 = vpack.c.bf16 %v1622_v49, %v1620_v48  ;;  %2561 = vmatprep.subr.bf16.mxu0 %v6820_v44  ;;  %v6869_v22 = vld [vmem:[%s7654_s11 + $0x140] ss:$16 sps:$4 sm:$0xff]   ;;  %v6874_v23 = vld [vmem:[%s7654_s11 + $0x224] ss:$16 sps:$4 sm:$0xff]  }
 0x1ca   : > { %1823 = vmatprep.mubr.bf16.mxu0 %v1631_v51  ;;  %v6872_v24 = vld [vmem:[%s7654_s11 + $0x220] ss:$16 sps:$4 sm:$0xff]   ;;  %v6877_v25 = vld [vmem:[%s7654_s11 + $0x124] ss:$16 sps:$4 sm:$0xff]  }
 0x1cb   : > { %6530 = vmatmul.mubr.bf16.vlgmr.msra.gmra.mxu1 %v1632_v52  ;;  %1824 = vmatmul.mubr.bf16.gmra.mxu0 %v1630_v54  ;;  %v6875_v26 = vld [vmem:[%s7654_s11 + $0x120] ss:$16 sps:$4 sm:$0xff]   ;;  %v6880_v28 = vld [vmem:[%s7654_s11 + $0x204] ss:$16 sps:$4 sm:$0xff]  }
 0x1cc   : > { %2611 = vmatpush1.bf16.msra.mxu1 %v6836_v50  ;;  %2562 = vmatpush1.bf16.msra.mxu0 %v6818_v53  ;;  %v6878_v27 = vld [vmem:[%s7654_s11 + $0x200] ss:$16 sps:$4 sm:$0xff]   ;;  %v6883_v30 = vld [vmem:[%s7654_s11 + $0x104] ss:$16 sps:$4 sm:$0xff]  }
 0x1cd   : > { %2563 = vmatprep.subr.bf16.mxu0 %v6823_v55  ;;  %2612 = vmatprep.subr.bf16.mxu1 %v6844_v3  ;;  %v6881_v29 = vld [vmem:[%s7654_s11 + $0x100] ss:$16 sps:$4 sm:$0xff]  }
 0x1ce   : > { %2642 = vmatprep.mubr.bf16.mxu1 %v7263_v31  ;;  %v5876_v38 = vld [vmem:[%s8802_s19] ss:$0 sm:$0xff] }
 0x1d0   : > { %2564 = vmatpush1.bf16.msra.mxu0 %v6821_v56  ;;  %2613 = vmatpush1.bf16.msra.mxu1 %v6842_v4 }
 0x1d1   : > { %2565 = vmatprep.subr.bf16.mxu0 %v6826_v57  ;;  %2614 = vmatprep.subr.bf16.mxu1 %v6850_v7 }
 0x1d4   : > { %2566 = vmatpush1.bf16.msra.mxu0 %v6824_v58  ;;  %2615 = vmatpush1.bf16.msra.mxu1 %v6848_v8 }
 0x1d5   : > { %2567 = vmatprep.subr.bf16.mxu0 %v6829_v59  ;;  %2616 = vmatprep.subr.bf16.mxu1 %v6856_v11 }
 0x1d8   : > { %2568 = vmatpush1.bf16.msra.mxu0 %v6827_v60  ;;  %2617 = vmatpush1.bf16.msra.mxu1 %v6854_v12 }
 0x1d9   : > { %2569 = vmatprep.subr.bf16.mxu0 %v6832_v61  ;;  %2618 = vmatprep.subr.bf16.mxu1 %v6862_v15 }
 0x1dc   : > { %2570 = vmatpush1.bf16.msra.mxu0 %v6830_v62  ;;  %2619 = vmatpush1.bf16.msra.mxu1 %v6860_v16 }
 0x1dd   : > { %2571 = vmatprep.subr.bf16.mxu0 %v6835_v63  ;;  %2620 = vmatprep.subr.bf16.mxu1 %v6868_v19 }
 0x1e0   : > { %2572 = vmatpush1.bf16.msra.mxu0 %v6833_v0  ;;  %2621 = vmatpush1.bf16.msra.mxu1 %v6866_v20 }
 0x1e1   : > { %2573 = vmatprep.subr.bf16.mxu0 %v6841_v1  ;;  %2622 = vmatprep.subr.bf16.mxu1 %v6874_v23 }
 0x1e4   : > { %2574 = vmatpush2.bf16.msra.mxu0 %v6839_v2  ;;  %2623 = vmatpush1.bf16.msra.mxu1 %v6872_v24 }
 0x1e5   : > { %2575 = vmatprep.subr.bf16.mxu0 %v6847_v5  ;;  %2624 = vmatprep.subr.bf16.mxu1 %v6880_v28 }
 0x1e8   : > { %2576 = vmatpush2.bf16.msra.mxu0 %v6845_v6  ;;  %2625 = vmatpush1.bf16.msra.mxu1 %v6878_v27 }
 0x1e9   : > { %2577 = vmatprep.subr.bf16.mxu0 %v6853_v9  ;;  %2663 = vmatprep.subr.bf16.mxu1 %v6886_v32  ;;  %v6890_v32 = vld [vmem:[%s7654_s11 + $0xc8] ss:$16 sps:$4 sm:$0xff]  }
 0x1ec   : > { %2578 = vmatpush2.bf16.msra.mxu0 %v6851_v10 }
 0x1ed   : > { %2579 = vmatprep.subr.bf16.mxu0 %v6859_v13  ;;  %v6884_v13 = vld [vmem:[%s7654_s11 + $0xe8] ss:$16 sps:$4 sm:$0xff]  }
 0x1f0   : > { %2580 = vmatpush2.bf16.msra.mxu0 %v6857_v14 }
 0x1f1   : > { %2581 = vmatprep.subr.bf16.mxu0 %v6865_v17 }
 0x1f4   : > { %2582 = vmatpush2.bf16.msra.mxu0 %v6863_v18  ;;  %v6887_v18 = vld [vmem:[%s7654_s11 + $0x2e8] ss:$16 sps:$4 sm:$0xff]  }
 0x1f5   : > { %2583 = vmatprep.subr.bf16.mxu0 %v6871_v21  ;;  %v6892_v21 = vld [vmem:[%s7654_s11 + $0xcc] ss:$16 sps:$4 sm:$0xff]  }
 0x1f8   : > { %2584 = vmatpush2.bf16.msra.mxu0 %v6869_v22 }
 0x1f9   : > { %2585 = vmatprep.subr.bf16.mxu0 %v6877_v25  ;;  %v6895_v25 = vld [vmem:[%s7654_s11 + $0x2cc] ss:$16 sps:$4 sm:$0xff]  }
 0x1fc   : > { %2586 = vmatpush2.bf16.msra.mxu0 %v6875_v26 }
 0x1fd   : > { %2587 = vmatprep.subr.bf16.mxu0 %v6883_v30 }
 0x200   : > { %2588 = vmatpush2.bf16.msra.mxu0 %v6881_v29 }
 0x201   : > { %2716 = vmatprep.subr.bf16.mxu0 %v6889_v33 }
 0x283   : > { %v6197_v34 = vpop.f32.mrf.mxu0 }
 0x285   : > { %v6198_v35 = vpop.f32.mrf.mxu0 }
 0x286   : > { %v6199_v36 = vadd.f32 %v6198_v35, %v6197_v34  ;;  %v6893_v35 = vld [vmem:[%s7654_s11 + $0x2c8] ss:$16 sps:$4 sm:$0xff]  }
 0x287   : > { %v6200_v37 = vpop.f32.mrf.mxu0 }
 0x288   : > { %v1818_v43 = vadd.f32 %v6199_v36, %v5876_v38 }
 0x289   : > { %v6201_v39 = vpop.f32.mrf.mxu0 }
 0x28a   : > { %v6202_v41 = vadd.f32 %v6201_v39, %v6200_v37 }
 0x28b   : > { %v6531_v40 = vpop.f32.mrf.mxu1  ;;  %v6203_v42 = vpop.f32.mrf.mxu0 }
 0x28c   : > { %v1821_v51 = vadd.f32 %v6202_v41, %v5876_v38  ;;  %v6901_v41 = vld [vmem:[%s7654_s11 + $0x2ac] ss:$16 sps:$4 sm:$0xff]  }
 0x28d   : > { %v1866_v44 = vpop.f32.mrf.mxu1  ;;  %v6204_v46 = vpop.f32.mrf.mxu0 }
 0x28e   : > { %v7872_v45 = vadd.f32 %v1866_v44, %v1818_v43  ;;  %v6205_v47 = vadd.f32 %v6204_v46, %v6203_v42  ;;  %v6896_v43 = vld [vmem:[%s7654_s11 + $0xa8] ss:$16 sps:$4 sm:$0xff]  }
 0x28f   : > { %v6532_v48 = vpop.f32.mrf.mxu1  ;;  %v6206_v50 = vpop.f32.mrf.mxu0 }
 0x290   : > { %v1886_v49 = vrot.slane %v7872_v45, 7  ;;  %v1826_v52 = vadd.f32 %v6205_v47, %v5876_v38  ;;  %v6899_v47 = vld [vmem:[%s7654_s11 + $0x2a8] ss:$16 sps:$4 sm:$0xff]  }
 0x291   : > { %v1869_v53 = vpop.f32.mrf.mxu1  ;;  %v6207_v55 = vpop.f32.mrf.mxu0 }
 0x292   : > { %1898 = vst [vmem:[#allocation2] sm:$0xfe] %v1886_v49  ;;  %v7875_v54 = vadd.f32 %v1869_v53, %v1821_v51  ;;  %v7877_v56 = vadd.f32 %v6531_v40, %v1826_v52  ;;  %v6208_v57 = vadd.f32 %v6207_v55, %v6206_v50  ;;  %v6907_v50 = vld [vmem:[%s7654_s11 + $0x28c] ss:$16 sps:$4 sm:$0xff]   ;;  %v6902_v51 = vld [vmem:[%s7654_s11 + $0x88] ss:$16 sps:$4 sm:$0xff]  }
 0x293   : > { %v6905_v52 = vld [vmem:[%s7654_s11 + $0x288] ss:$16 sps:$4 sm:$0xff]   ;;  %v6910_v53 = vld [vmem:[%s7654_s11 + $0x6c] ss:$16 sps:$4 sm:$0xff]  }
 0x294   : > { %v1887_v58 = vrot.slane %v7875_v54, 7  ;;  %v1889_v59 = vrot.slane %v7877_v56, 7  ;;  %v1829_v60 = vadd.f32 %v6208_v57, %v5876_v38  ;;  %v6898_v38 = vld [vmem:[%s7654_s11 + $0xac] ss:$16 sps:$4 sm:$0xff]   ;;  %v6908_v57 = vld [vmem:[%s7654_s11 + $0x68] ss:$16 sps:$4 sm:$0xff]  }
 0x295   : > { %v6913_v55 = vld [vmem:[%s7654_s11 + $0x26c] ss:$16 sps:$4 sm:$0xff]  }
 0x296   : > { %1900 = vst [vmem:[#allocation2 + $0x70] sm:$0x1] %v1887_v58  ;;  %1901 = vst [vmem:[#allocation2 + $0x40] sm:$0xfe] %v1889_v59  ;;  %v7881_v61 = vadd.f32 %v6532_v48, %v1829_v60  ;;  %v1888_v1 = vsel %vm1115_vm2, %v1886_v49, %v1887_v58  ;;  %v6904_v49 = vld [vmem:[%s7654_s11 + $0x8c] ss:$16 sps:$4 sm:$0xff]  }
 0x297   : > { %v2019_v6 = vrot.slane %v1888_v1, 1  ;;  %v2037_v8 = vrot.slane %v1888_v1, 2  ;;  %v6911_v58 = vld [vmem:[%s7654_s11 + $0x268] ss:$16 sps:$4 sm:$0xff]   ;;  %v6919_v60 = vld [vmem:[%s7654_s11 + $0x24c] ss:$16 sps:$4 sm:$0xff]  }
 0x298   : > { %v1890_v62 = vrot.slane %v7881_v61, 7 }
 0x299   : > { %v2004_v63 = vld [vmem:[#allocation2] sm:$0xfe] }
 0x29a   : > { %v2008_v0 = vld [vmem:[#allocation2] sm:$0xfc]  ;;  %1903 = vst [vmem:[#allocation2 + $0x18] sm:$0x1] %v1890_v62  ;;  %v2018_v2 = vrot.slane %v2004_v63, 1  ;;  %v1891_v11 = vsel %vm1115_vm2, %v1889_v59, %v1890_v62 }
 0x29b   : > { %v2036_v3 = vrot.slane %v2008_v0, 2  ;;  %v2000_v12 = vld [vmem:[#allocation2] sm:$0xff]  ;;  %v2024_v28 = vrot.slane %v1891_v11, 1  ;;  %v2042_v34 = vrot.slane %v1891_v11, 2  ;;  %v6916_v59 = vld [vmem:[%s7654_s11 + $0x4c] ss:$16 sps:$4 sm:$0xff]  }
 0x29c   : > { %v2020_v14 = vsel %vm1200_vm3, %v2018_v2, %v2019_v6  ;;  %v7895_v24 = vpack.c.bf16 %v1888_v1, %v2000_v12  ;;  %v6914_v62 = vld [vmem:[%s7654_s11 + $0x48] ss:$16 sps:$4 sm:$0xff]   ;;  %v6922_v0 = vld [vmem:[%s7654_s11 + $0x2c] ss:$16 sps:$4 sm:$0xff]  }
 0x29d   : > { %v2005_v4 = vld [vmem:[#allocation2 + $0x70] sm:$0x1]  ;;  %v2006_v10 = vld [vmem:[#allocation2 + $0x40] sm:$0xfe]  ;;  %v2038_v16 = vsel %vm1219_vm4, %v2036_v3, %v2037_v8  ;;  %v6917_v63 = vld [vmem:[%s7654_s11 + $0x248] ss:$16 sps:$4 sm:$0xff]  }
 0x29e   : > { %v2009_v5 = vld [vmem:[#allocation2 + $0x70] sm:$0x3]  ;;  %v2021_v7 = vrot.slane %v2005_v4, 1  ;;  %v2023_v22 = vrot.slane %v2006_v10, 1  ;;  %v2010_v23 = vld [vmem:[#allocation2 + $0x40] sm:$0xfc] }
 0x29f   : > { %v2039_v9 = vrot.slane %v2009_v5, 2  ;;  %v2041_v33 = vrot.slane %v2010_v23, 2  ;;  %v2002_v42 = vld [vmem:[#allocation2 + $0x40] sm:$0xff]  ;;  %v6925_v1 = vld [vmem:[%s7654_s11 + $0x22c] ss:$16 sps:$4 sm:$0xff]  }
 0x2a0   : > { %v2022_v15 = vsel %vm1200_vm3, %v2019_v6, %v2021_v7  ;;  %v2025_v36 = vsel %vm1200_vm3, %v2023_v22, %v2024_v28  ;;  %v7916_v48 = vpack.c.bf16 %v1891_v11, %v2002_v42  ;;  %v6920_v2 = vld [vmem:[%s7654_s11 + $0x28] ss:$16 sps:$4 sm:$0xff]   ;;  %v6928_v4 = vld [vmem:[%s7654_s11 + $0xc] ss:$16 sps:$4 sm:$0xff]  }
 0x2a1   : > { %v2040_v17 = vsel %vm1219_vm4, %v2037_v8, %v2039_v9  ;;  %v2051_v19 = vpack.c.bf16 %v2022_v15, %v2020_v14  ;;  %v2007_v26 = vld [vmem:[#allocation2 + $0x18] sm:$0x1]  ;;  %v2043_v44 = vsel %vm1219_vm4, %v2041_v33, %v2042_v34  ;;  %v6931_v5 = vld [vmem:[%s7654_s11 + $0x20c] ss:$16 sps:$4 sm:$0xff]   ;;  %v6965_v33 = vld [vmem:[%s7621_s16 + $0x20] sm:$0xff]  }
 0x2a2   : > { %v7892_v20 = vpack.c.bf16 %v2040_v17, %v2038_v16  ;;  %v2011_v27 = vld [vmem:[#allocation2 + $0x18] sm:$0x3]  ;;  %v2026_v29 = vrot.slane %v2007_v26, 1  ;;  %v6934_v8 = vld [vmem:[%s7654_s11 + $0x1ec] ss:$16 sps:$4 sm:$0xff]   ;;  %v6958_v26 = vld [vmem:[%s7621_s16 + $0x70] sm:$0xff]  }
 0x2a3   : > { %2589 = vmatprep.mubr.bf16.mxu0 %v2051_v19  ;;  %v2044_v30 = vrot.slane %v2011_v27, 2  ;;  %v6923_v3 = vld [vmem:[%s7654_s11 + $0x228] ss:$16 sps:$4 sm:$0xff]   ;;  %v6937_v11 = vld [vmem:[%s7654_s11 + $0x1cc] ss:$16 sps:$4 sm:$0xff]   ;;  %v6959_v27 = vld [vmem:[%s7621_s16 + $0x30] sm:$0xff]  }
 0x2a4   : > { %2643 = vmatmul.mubr.bf16.vlgmr.msra.gmra.mxu1 %v7892_v20  ;;  %2590 = vmatmul.mubr.bf16.vlgmr.msra.gmra.mxu0 %v7895_v24  ;;  %v2027_v37 = vsel %vm1200_vm3, %v2024_v28, %v2026_v29  ;;  %v6926_v6 = vld [vmem:[%s7654_s11 + $0x8] ss:$16 sps:$4 sm:$0xff]   ;;  %v6940_v14 = vld [vmem:[%s7654_s11 + $0x1ac] ss:$16 sps:$4 sm:$0xff]  }
 0x2a5   : > { %2664 = vmatpush1.bf16.msra.mxu1 %v6884_v13  ;;  %2717 = vmatpush1.bf16.msra.mxu0 %v6887_v18  ;;  %v7905_v39 = vpack.c.bf16 %v2027_v37, %v2025_v36  ;;  %v2045_v40 = vsel %vm1219_vm4, %v2042_v34, %v2044_v30  ;;  %v6929_v7 = vld [vmem:[%s7654_s11 + $0x208] ss:$16 sps:$4 sm:$0xff]   ;;  %v6943_v16 = vld [vmem:[%s7654_s11 + $0x18c] ss:$16 sps:$4 sm:$0xff]   ;;  %v6969_v37 = vld [vmem:[%s7621_s16 + $0xa0] sm:$0xff]  }
 0x2a6   : > { %2665 = vmatprep.subr.bf16.mxu1 %v6892_v21  ;;  %2718 = vmatprep.subr.bf16.mxu0 %v6895_v25  ;;  %v7913_v46 = vpack.c.bf16 %v2045_v40, %v2043_v44  ;;  %v6956_v9 = vld [vmem:[%s7621_s16 + $0x78] sm:$0xff]   ;;  %v6961_v29 = vld [vmem:[%s7621_s16 + $0x68] sm:$0xff]   ;;  %v6976_v44 = vld [vmem:[%s7621_s16 + $0x40] sm:$0xff]  }
 0x2a7   : > { %2652 = vmatprep.mubr.bf16.mxu1 %v7263_v31  ;;  %2599 = vmatprep.mubr.bf16.mxu0 %v7905_v39  ;;  %v6932_v10 = vld [vmem:[%s7654_s11 + $0x1e8] ss:$16 sps:$4 sm:$0xff]   ;;  %v6946_v18 = vld [vmem:[%s7654_s11 + $0x16c] ss:$16 sps:$4 sm:$0xff]  }
 0x2a8   : > { %v6957_v12 = vld [vmem:[%s7621_s16 + $0x38] sm:$0xff]   ;;  %v6962_v30 = vld [vmem:[%s7621_s16 + $0x28] sm:$0xff]  }
 0x2a9   : > { %2666 = vmatpush1.bf16.msra.mxu1 %v6890_v32  ;;  %2719 = vmatpush1.bf16.msra.mxu0 %v6893_v35  ;;  %v6935_v13 = vld [vmem:[%s7654_s11 + $0x1c8] ss:$16 sps:$4 sm:$0xff]   ;;  %v6952_v21 = vld [vmem:[%s7654_s11 + $0x12c] ss:$16 sps:$4 sm:$0xff]   ;;  %v6963_v32 = vld [vmem:[%s7621_s16 + $0xb0] sm:$0xff]  }
 0x2aa   : > { %2667 = vmatprep.subr.bf16.mxu1 %v6898_v38  ;;  %2720 = vmatprep.subr.bf16.mxu0 %v6901_v41  ;;  %v6938_v15 = vld [vmem:[%s7654_s11 + $0x1a8] ss:$16 sps:$4 sm:$0xff]   ;;  %v6955_v23 = vld [vmem:[%s7654_s11 + $0x10c] ss:$16 sps:$4 sm:$0xff]   ;;  %v6970_v38 = vld [vmem:[%s7621_s16 + $0x50] sm:$0xff]  }
 0x2ab   : > { %v6941_v17 = vld [vmem:[%s7654_s11 + $0x188] ss:$16 sps:$4 sm:$0xff]  }
 0x2ac   : > { %2653 = vmatmul.mubr.bf16.gmra.mxu1 %v7913_v46  ;;  %2600 = vmatmul.mubr.bf16.gmra.mxu0 %v7916_v48  ;;  %v6950_v22 = vld [vmem:[%s7654_s11 + $0x128] ss:$16 sps:$4 sm:$0xff]  }
 0x2ad   : > { %2668 = vmatpush1.bf16.msra.mxu1 %v6896_v43  ;;  %2695 = vmatprep.mubr.bf16.mxu1 %v2051_v19  ;;  %v6944_v19 = vld [vmem:[%s7654_s11 + $0x168] ss:$16 sps:$4 sm:$0xff]   ;;  %v6975_v43 = vld [vmem:[%s7621_s16 + $0x90] sm:$0xff]  }
 0x2ae   : > { %2721 = vmatpush1.bf16.msra.mxu0 %v6899_v47  ;;  %2669 = vmatprep.subr.bf16.mxu1 %v6904_v49  ;;  %v6953_v25 = vld [vmem:[%s7654_s11 + $0x108] ss:$16 sps:$4 sm:$0xff]  }
 0x2af   : > { %2722 = vmatprep.subr.bf16.mxu0 %v6907_v50  ;;  %2748 = vmatprep.mubr.bf16.mxu0 %v7263_v31  ;;  %v6960_v28 = vld [vmem:[%s7621_s16 + $0xb8] sm:$0xff]   ;;  %v6966_v34 = vld [vmem:[%s7621_s16 + $0xa8] sm:$0xff]  }
 0x2b0   : > { %v6967_v35 = vld [vmem:[%s7621_s16 + $0x58] sm:$0xff]   ;;  %v6973_v41 = vld [vmem:[%s7621_s16 + $0x48] sm:$0xff]  }
 0x2b1   : > { %2670 = vmatpush1.bf16.msra.mxu1 %v6902_v51  ;;  %v6968_v36 = vld [vmem:[%s7621_s16 + $0x18] sm:$0xff]   ;;  %v6974_v42 = vld [vmem:[%s7621_s16 + $0x8] sm:$0xff]   ;;  %v2057_v51 = vlaneseq }
 0x2b2   : > { %2723 = vmatpush1.bf16.msra.mxu0 %v6905_v52  ;;  %2671 = vmatprep.subr.bf16.mxu1 %v6910_v53  ;;  %v6972_v40 = vld [vmem:[%s7621_s16 + $0x98] sm:$0xff]   ;;  %v6978_v47 = vld [vmem:[%s7621_s16 + $0x88] sm:$0xff]  }
 0x2b3   : > { %2724 = vmatprep.subr.bf16.mxu0 %v6913_v55  ;;  %v6980_v49 = vld [vmem:[%s7623_s29 + $0x78] sm:$0xff]   ;;  %v7989_v52 = vshrl.u32 %v2057_v51, 7  ;;  %v7995_v55 = vld [vmem:[%s7659_s18] sm:$0xf]  ;;  %s7266_s18 = smov 124  }
 0x2b4   : > { %v6982_v50 = vld [vmem:[%s7623_s29 + $0xf8] sm:$0xff]  }
 0x2b5   : > { %2672 = vmatpush1.bf16.msra.mxu1 %v6908_v57  ;;  %v7992_v53 = vsub.s32 0, %v7989_v52  ;;  %v2063_v57 = vsub.s32 1, %v7989_v52 }
 0x2b6   : > { %2725 = vmatpush1.bf16.msra.mxu0 %v6911_v58  ;;  %2673 = vmatprep.subr.bf16.mxu1 %v6916_v59 }
 0x2b7   : > { %2726 = vmatprep.subr.bf16.mxu0 %v6919_v60  ;;  %v2060_v58 = vrot.slane %v7995_v55, %v7992_v53  ;;  %v2064_v60 = vrot.slane %v7995_v55, %v2063_v57 }
 0x2b9   : > { %2674 = vmatpush1.bf16.msra.mxu1 %v6914_v62 }
 0x2ba   : > { %2727 = vmatpush1.bf16.msra.mxu0 %v6917_v63  ;;  %2675 = vmatprep.subr.bf16.mxu1 %v6922_v0 }
 0x2bb   : > { %2728 = vmatprep.subr.bf16.mxu0 %v6925_v1  ;;  %v5997_v1 = vld [vmem:[%s8804_s21] ss:$0 sm:$0xff]  ;;  %s7265_s21 = smov 126  }
 0x2bd   : > { %2676 = vmatpush1.bf16.msra.mxu1 %v6920_v2 }
 0x2be   : > { %2729 = vmatpush1.bf16.msra.mxu0 %v6923_v3  ;;  %2677 = vmatprep.subr.bf16.mxu1 %v6928_v4 }
 0x2bf   : > { %2730 = vmatprep.subr.bf16.mxu0 %v6931_v5 }
 0x2c1   : > { %2678 = vmatpush1.bf16.msra.mxu1 %v6926_v6 }
 0x2c2   : > { %2731 = vmatpush1.bf16.msra.mxu0 %v6929_v7  ;;  %2679 = vmatprep.subr.bf16.mxu1 %v6934_v8 }
 0x2c3   : > { %6219 = vmatprep.subr.bf16.mxu0 %v6956_v9 }
 0x2c5   : > { %2680 = vmatpush2.bf16.msra.mxu1 %v6932_v10  ;;  %2749 = vmatmul.mubr.bf16.vlgmr.msra.gmra.mxu0 %v7892_v20  ;;  %v6947_v20 = vld [vmem:[%s7654_s11 + $0x148] ss:$16 sps:$4 sm:$0xff]  }
 0x2c6   : > { %2681 = vmatprep.subr.bf16.mxu1 %v6937_v11  ;;  %2758 = vmatprep.mubr.bf16.mxu0 %v7263_v31  ;;  %v6949_v31 = vld [vmem:[%s7654_s11 + $0x14c] ss:$16 sps:$4 sm:$0xff]  }
 0x2c7   : > { %6220 = vmatpush3.bf16.msra.mxu0 %v6957_v12 }
 0x2c8   : > { %6221 = vmatprep.subr.bf16.mxu0 %v6958_v26 }
 0x2c9   : > { %2682 = vmatpush2.bf16.msra.mxu1 %v6935_v13 }
 0x2ca   : > { %2683 = vmatprep.subr.bf16.mxu1 %v6940_v14 }
 0x2cb   : > { %6222 = vmatpush3.bf16.msra.mxu0 %v6959_v27 }
 0x2cc   : > { %6223 = vmatprep.subr.bf16.mxu0 %v6961_v29 }
 0x2cd   : > { %2684 = vmatpush2.bf16.msra.mxu1 %v6938_v15  ;;  %2759 = vmatmul.mubr.bf16.gmra.mxu0 %v7913_v46  ;;  %v6977_v46 = vld [vmem:[%s7621_s16] sm:$0xff]  }
 0x2ce   : > { %2685 = vmatprep.subr.bf16.mxu1 %v6943_v16 }
 0x2cf   : > { %6224 = vmatpush3.bf16.msra.mxu0 %v6962_v30 }
 0x2d1   : > { %2686 = vmatpush2.bf16.msra.mxu1 %v6941_v17 }
 0x2d2   : > { %2687 = vmatprep.subr.bf16.mxu1 %v6946_v18 }
 0x2d5   : > { %2688 = vmatpush2.bf16.msra.mxu1 %v6944_v19 }
 0x2d6   : > { %2689 = vmatprep.subr.bf16.mxu1 %v6949_v31 }
 0x2d9   : > { %2690 = vmatpush2.bf16.msra.mxu1 %v6947_v20 }
 0x2da   : > { %2691 = vmatprep.subr.bf16.mxu1 %v6952_v21 }
 0x2dd   : > { %2692 = vmatpush2.bf16.msra.mxu1 %v6950_v22 }
 0x2de   : > { %2693 = vmatprep.subr.bf16.mxu1 %v6955_v23 }
 0x2e1   : > { %2694 = vmatpush2.bf16.msra.mxu1 %v6953_v25 }
 0x2e2   : > { %6533 = vmatprep.subr.bf16.mxu1 %v6960_v28 }
 0x2e4   : > { %2696 = vmatmul.mubr.bf16.vlgmr.msra.gmra.mxu1 %v7895_v24  ;;  %v6964_v24 = vld [vmem:[%s7621_s16 + $0x60] sm:$0xff]  }
 0x2e5   : > { %2705 = vmatprep.mubr.bf16.mxu1 %v7905_v39  ;;  %6534 = vmatpush3.bf16.msra.mxu1 %v6960_v28  ;;  %v6971_v39 = vld [vmem:[%s7621_s16 + $0x10] sm:$0xff]  }
 0x2e6   : > { %6535 = vmatprep.subr.bf16.mxu1 %v6963_v32  ;;  %6225 = vmatprep.subr.bf16.mxu0 %v6964_v24 }
 0x2e7   : > { %6226 = vmatpush3.bf16.msra.mxu0 %v6965_v33 }
 0x2e8   : > { %6227 = vmatprep.subr.bf16.mxu0 %v6967_v35 }
 0x2e9   : > { %6536 = vmatpush3.bf16.msra.mxu1 %v6963_v32 }
 0x2ea   : > { %6537 = vmatprep.subr.bf16.mxu1 %v6966_v34 }
 0x2eb   : > { %6228 = vmatpush3.bf16.msra.mxu0 %v6968_v36 }
 0x2ec   : > { %2706 = vmatmul.mubr.bf16.gmra.mxu1 %v7916_v48  ;;  %6229 = vmatprep.subr.bf16.mxu0 %v6970_v38  ;;  %v6979_v48 = vld [vmem:[%s7621_s16 + $0x80] sm:$0xff]  }
 0x2ed   : > { %6538 = vmatpush3.bf16.msra.mxu1 %v6966_v34 }
 0x2ee   : > { %6539 = vmatprep.subr.bf16.mxu1 %v6969_v37 }
 0x2ef   : > { %6230 = vmatpush3.bf16.msra.mxu0 %v6971_v39 }
 0x2f0   : > { %6231 = vmatprep.subr.bf16.mxu0 %v6973_v41 }
 0x2f1   : > { %6540 = vmatpush3.bf16.msra.mxu1 %v6969_v37 }
 0x2f2   : > { %6541 = vmatprep.subr.bf16.mxu1 %v6972_v40 }
 0x2f3   : > { %6232 = vmatpush3.bf16.msra.mxu0 %v6974_v42 }
 0x2f4   : > { %6233 = vmatprep.subr.bf16.mxu0 %v6976_v44 }
 0x2f5   : > { %6542 = vmatpush3.bf16.msra.mxu1 %v6972_v40 }
 0x2f6   : > { %6543 = vmatprep.subr.bf16.mxu1 %v6975_v43 }
 0x2f7   : > { %6234 = vmatpush3.bf16.msra.mxu0 %v6977_v46 }
 0x2f8   : > { %6257 = vmatprep.subr.bf16.mxu0 %v6980_v49 }
 0x2f9   : > { %6544 = vmatpush3.bf16.msra.mxu1 %v6975_v43 }
 0x2fa   : > { %6545 = vmatprep.subr.bf16.mxu1 %v6978_v47 }
 0x2fd   : > { %6546 = vmatpush3.bf16.msra.mxu1 %v6978_v47 }
 0x2fe   : > { %6547 = vmatprep.subr.bf16.mxu1 %v6979_v48 }
 0x301   : > { %6548 = vmatpush3.bf16.msra.mxu1 %v6979_v48 }
 0x302   : > { %6285 = vmatprep.subr.bf16.mxu1 %v6982_v50 }
 0x364   : > { %v2644_v59 = vpop.f32.mrf.mxu1  ;;  %v2591_v62 = vpop.f32.mrf.mxu0 }
 0x365   : > { %v2592_v63 = vadd.f32 %v2591_v62, %v2060_v58 }
 0x366   : > { %v2646_v0 = vpop.f32.mrf.mxu1  ;;  %v2593_v2 = vpop.f32.mrf.mxu0 }
 0x367   : > { %v2645_v3 = vadd.f32 %v2644_v59, %v2592_v63  ;;  %v2594_v4 = vadd.f32 %v2593_v2, %v2064_v60 }
 0x368   : > { %v2648_v5 = vpop.f32.mrf.mxu1  ;;  %v2595_v6 = vpop.f32.mrf.mxu0 }
 0x369   : > { %vm2769_vm9 = vcmp.ge.f32.partialorder %v2645_v3, 0.0  ;;  %v2780_v7 = vmul.f32 %v5997_v1, %v2645_v3  ;;  %v2596_v8 = vadd.f32 %v2595_v6, %v2060_v58  ;;  %v2647_v10 = vadd.f32 %v2646_v0, %v2594_v4 }
 0x36a   : > { %v2650_v9 = vpop.f32.mrf.mxu1  ;;  %v2597_v11 = vpop.f32.mrf.mxu0 }
 0x36b   : > { %v2784_v12 = vsel %vm2769_vm9, %v2645_v3, %v2780_v7  ;;  %v2649_v13 = vadd.f32 %v2648_v5, %v2596_v8  ;;  %v2598_v14 = vadd.f32 %v2597_v11, %v2064_v60  ;;  %v3180_v21 = vrot.slane %v2647_v10, 7  ;;  %v6981_v7 = vld [vmem:[%s7623_s29 + $0x38] sm:$0xff]  }
 0x36c   : > { %v2654_v15 = vpop.f32.mrf.mxu1  ;;  %v2793_v16 = vrot.slane %v2784_v12, 7  ;;  %v2601_v17 = vpop.f32.mrf.mxu0 }
 0x36d   : > { %vm2770_vm10 = vcmp.ge.f32.partialorder %v2649_v13, 0.0  ;;  %v2781_v18 = vmul.f32 %v5997_v1, %v2649_v13  ;;  %v2651_v19 = vadd.f32 %v2650_v9, %v2598_v14  ;;  %v2602_v31 = vadd.f32 %v2601_v17, %v2060_v58 }
 0x36e   : > { %v2656_v20 = vpop.f32.mrf.mxu1  ;;  %2805 = vst [vmem:[#allocation2] sm:$0xfe] %v2793_v16  ;;  %v2603_v22 = vpop.f32.mrf.mxu0 }
 0x36f   : > { %v2785_v23 = vsel %vm2770_vm10, %v2649_v13, %v2781_v18  ;;  %v3183_v25 = vrot.slane %v2651_v19, 7  ;;  %v2655_v26 = vadd.f32 %v2654_v15, %v2602_v31  ;;  %v2604_v27 = vadd.f32 %v2603_v22, %v2064_v60  ;;  %v6984_v15 = vld [vmem:[%s7623_s29 + $0x70] sm:$0xff]   ;;  %v6988_v22 = vld [vmem:[%s7623_s29 + $0x68] sm:$0xff]  }
 0x370   : > { %v2794_v28 = vrot.slane %v2785_v23, 7  ;;  %v2658_v29 = vpop.f32.mrf.mxu1  ;;  %v2605_v30 = vpop.f32.mrf.mxu0 }
 0x371   : > { %v8007_v32 = vsel %vm1115_vm2, %v3180_v21, %v3183_v25  ;;  %vm2771_vm11 = vcmp.ge.f32.partialorder %v2655_v26, 0.0  ;;  %v2782_v24 = vmul.f32 %v5997_v1, %v2655_v26  ;;  %v2606_v33 = vadd.f32 %v2605_v30, %v2060_v58 }
 0x372   : > { %2807 = vst [vmem:[#allocation2 + $0x70] sm:$0x1] %v2794_v28  ;;  %v2607_v34 = vpop.f32.mrf.mxu0  ;;  %v2657_v36 = vadd.f32 %v2656_v20, %v2604_v27  ;;  %v2660_v40 = vpop.f32.mrf.mxu1  ;;  %v2795_v47 = vsel %vm1115_vm2, %v2793_v16, %v2794_v28  ;;  %v3433_v20 = vrot.slane %v8007_v32, 1 }
 0x373   : > { %v2786_v35 = vsel %vm2771_vm11, %v2655_v26, %v2782_v24  ;;  %v2608_v37 = vadd.f32 %v2607_v34, %v2064_v60  ;;  %v2659_v39 = vadd.f32 %v2658_v29, %v2606_v33  ;;  %v2878_v63 = vrot.slane %v2795_v47, 1 }
 0x374   : > { %v2796_v38 = vrot.slane %v2786_v35, 7  ;;  %v3189_v48 = vrot.slane %v2657_v36, 7  ;;  %v2896_v2 = vrot.slane %v2795_v47, 2 }
 0x375   : > { %v2661_v41 = vadd.f32 %v2660_v40, %v2608_v37  ;;  %v2863_v42 = vld [vmem:[#allocation2] sm:$0xfe]  ;;  %vm2772_vm12 = vcmp.ge.f32.partialorder %v2659_v39, 0.0  ;;  %v2783_v46 = vmul.f32 %v5997_v1, %v2659_v39 }
 0x376   : > { %v2867_v43 = vld [vmem:[#allocation2] sm:$0xfc]  ;;  %2808 = vst [vmem:[#allocation2 + $0x40] sm:$0xfe] %v2796_v38  ;;  %v2877_v51 = vrot.slane %v2863_v42, 1  ;;  %v6989_v42 = vld [vmem:[%s7623_s29 + $0x28] sm:$0xff]  }
 0x377   : > { %v2859_v44 = vld [vmem:[#allocation2] sm:$0xff]  ;;  %v3192_v49 = vrot.slane %v2661_v41, 7  ;;  %v2787_v50 = vsel %vm2772_vm12, %v2659_v39, %v2783_v46  ;;  %v2895_v57 = vrot.slane %v2867_v43, 2  ;;  %v6983_v41 = vld [vmem:[%s7623_s29 + $0xb8] sm:$0xff]  }
 0x378   : > { %3216 = vst [vmem:[#allocation2] sm:$0xfe] %v3180_v21  ;;  %v2797_v58 = vrot.slane %v2787_v50, 7  ;;  %v2879_v1 = vsel %vm1200_vm3, %v2877_v51, %v2878_v63  ;;  %v2909_v13 = vpack.c.bf16 %v2795_v47, %v2859_v44  ;;  %v6985_v21 = vld [vmem:[%s7623_s29 + $0x30] sm:$0xff]   ;;  %v6992_v46 = vld [vmem:[%s7623_s29 + $0x60] sm:$0xff]   ;;  %v6996_v50 = vld [vmem:[%s7623_s29 + $0x58] sm:$0xff]  }
 0x379   : > { %v8011_v59 = vsel %vm1115_vm2, %v3189_v48, %v3192_v49  ;;  %v2864_v60 = vld [vmem:[#allocation2 + $0x70] sm:$0x1]  ;;  %v2897_v5 = vsel %vm1219_vm4, %v2895_v57, %v2896_v2  ;;  %v6991_v51 = vld [vmem:[%s7623_s29 + $0xa8] sm:$0xff]   ;;  %v6997_v57 = vld [vmem:[%s7623_s29 + $0x18] sm:$0xff]  }
 0x37a   : > { %v2868_v62 = vld [vmem:[#allocation2 + $0x70] sm:$0x3]  ;;  %v2880_v0 = vrot.slane %v2864_v60, 1  ;;  %2810 = vst [vmem:[#allocation2 + $0x18] sm:$0x1] %v2797_v58  ;;  %v2798_v16 = vsel %vm1115_vm2, %v2796_v38, %v2797_v58  ;;  %v6994_v58 = vld [vmem:[%s7623_s29 + $0xe0] sm:$0xff]  }
 0x37b   : > { %v2898_v3 = vrot.slane %v2868_v62, 2  ;;  %3222 = vst [vmem:[#allocation2 + $0x70] sm:$0x1] %v3183_v25  ;;  %v2883_v25 = vrot.slane %v2798_v16, 1  ;;  %v2901_v29 = vrot.slane %v2798_v16, 2  ;;  %v6986_v44 = vld [vmem:[%s7623_s29 + $0xf0] sm:$0xff]  }
 0x37c   : > { %v2881_v4 = vsel %vm1200_vm3, %v2878_v63, %v2880_v0  ;;  %v6987_v47 = vld [vmem:[%s7623_s29 + $0xb0] sm:$0xff]   ;;  %v6995_v62 = vld [vmem:[%s7623_s29 + $0xa0] sm:$0xff]   ;;  %v6998_v0 = vld [vmem:[%s7623_s29 + $0xd8] sm:$0xff]  }
 0x37d   : > { %v2899_v6 = vsel %vm1219_vm4, %v2896_v2, %v2898_v3  ;;  %v2910_v8 = vpack.c.bf16 %v2881_v4, %v2879_v1  ;;  %v2865_v10 = vld [vmem:[#allocation2 + $0x40] sm:$0xfe]  ;;  %v7000_v60 = vld [vmem:[%s7623_s29 + $0x50] sm:$0xff]   ;;  %v7004_v2 = vld [vmem:[%s7623_s29 + $0x48] sm:$0xff]  }
 0x37e   : > { %v2911_v9 = vpack.c.bf16 %v2899_v6, %v2897_v5  ;;  %v2869_v11 = vld [vmem:[#allocation2 + $0x40] sm:$0xfc]  ;;  %v2882_v17 = vrot.slane %v2865_v10, 1  ;;  %v7001_v63 = vld [vmem:[%s7623_s29 + $0x10] sm:$0xff]   ;;  %v6999_v3 = vld [vmem:[%s7623_s29 + $0x98] sm:$0xff]  }
 0x37f   : > { %v2861_v12 = vld [vmem:[#allocation2 + $0x40] sm:$0xff]  ;;  %3097 = vmatprep.mubr.bf16.mxu0 %v2910_v8  ;;  %v2900_v19 = vrot.slane %v2869_v11, 2  ;;  %v7005_v1 = vld [vmem:[%s7623_s29 + $0x8] sm:$0xff]   ;;  %v7002_v5 = vld [vmem:[%s7623_s29 + $0xd0] sm:$0xff]  }
 0x380   : > { %3225 = vst [vmem:[#allocation2 + $0x40] sm:$0xfe] %v3189_v48  ;;  %v3390_v14 = vld [vmem:[#allocation2] sm:$0xfe]  ;;  %6549 = vmatprep.mubr.bf16.mxu1 %v2911_v9  ;;  %3098 = vmatmul.mubr.bf16.vlgmr.msra.gmra.mxu0 %v2909_v13  ;;  %v2884_v24 = vsel %vm1200_vm3, %v2882_v17, %v2883_v25  ;;  %v2912_v43 = vpack.c.bf16 %v2798_v16, %v2861_v12  ;;  %v7006_v10 = vld [vmem:[%s7623_s29 + $0xc8] sm:$0xff]   ;;  %v7012_v11 = vld [vmem:[%s7623_s29 + $0x178] sm:$0xff]  }
 0x381   : > { %v3432_v18 = vrot.slane %v3390_v14, 1  ;;  %6258 = vmatpush3.bf16.msra.mxu0 %v6981_v7  ;;  %v2866_v23 = vld [vmem:[#allocation2 + $0x18] sm:$0x1]  ;;  %v2902_v36 = vsel %vm1219_vm4, %v2900_v19, %v2901_v29  ;;  %v6993_v48 = vld [vmem:[%s7623_s29 + $0x20] sm:$0xff]   ;;  %v7003_v7 = vld [vmem:[%s7623_s29 + $0x90] sm:$0xff]   ;;  %v2067_v12 = vsub.s32 2, %v7989_v52 }
 0x382   : > { %v3393_v31 = vld [vmem:[#allocation2 + $0x70] sm:$0x1]  ;;  %v2870_v26 = vld [vmem:[#allocation2 + $0x18] sm:$0x3]  ;;  %6259 = vmatprep.subr.bf16.mxu0 %v6984_v15  ;;  %v2885_v28 = vrot.slane %v2866_v23, 1  ;;  %v7008_v6 = vld [vmem:[%s7623_s29 + $0x40] sm:$0xff]  }
 0x383   : > { %v3441_v27 = vrot.slane %v3393_v31, 1  ;;  %v2903_v30 = vrot.slane %v2870_v26, 2  ;;  %3231 = vst [vmem:[#allocation2 + $0x18] sm:$0x1] %v3192_v49  ;;  %v3434_v33 = vsel %vm1200_vm3, %v3432_v18, %v3433_v20  ;;  %v6990_v49 = vld [vmem:[%s7623_s29 + $0xe8] sm:$0xff]   ;;  %v7009_v8 = vld [vmem:[%s7623_s29] sm:$0xff]   ;;  %v2068_v17 = vrot.slane %v7995_v55, %v2067_v12 }
 0x384   : > { %v2886_v35 = vsel %vm1200_vm3, %v2883_v25, %v2885_v28  ;;  %v2071_v13 = vsub.s32 3, %v7989_v52  ;;  %v7007_v14 = vld [vmem:[%s7623_s29 + $0x88] sm:$0xff]   ;;  %v7010_v16 = vld [vmem:[%s7623_s29 + $0xc0] sm:$0xff]  }
 0x385   : > { %v3442_v34 = vsel %vm1200_vm3, %v3433_v20, %v3441_v27  ;;  %v2904_v37 = vsel %vm1219_vm4, %v2901_v29, %v2903_v30  ;;  %6260 = vmatpush3.bf16.msra.mxu0 %v6985_v21  ;;  %v2913_v39 = vpack.c.bf16 %v2886_v35, %v2884_v24  ;;  %v2750_v4 = vpop.f32.mrf.mxu0  ;;  %v7011_v19 = vld [vmem:[%s7623_s29 + $0x80] sm:$0xff]   ;;  %v7014_v21 = vld [vmem:[%s7623_s29 + $0x1f8] sm:$0xff]  }
 0x386   : > { %v3531_v38 = vpack.c.bf16 %v3442_v34, %v3434_v33  ;;  %v2914_v40 = vpack.c.bf16 %v2904_v37, %v2902_v36  ;;  %6261 = vmatprep.subr.bf16.mxu0 %v6988_v22  ;;  %v2072_v18 = vrot.slane %v7995_v55, %v2071_v13  ;;  %v7015_v13 = vld [vmem:[%s7623_s29 + $0x1b8] sm:$0xff]  }
 0x387   : > { %3105 = vmatprep.mubr.bf16.mxu0 %v2913_v39  ;;  %v2752_v9 = vpop.f32.mrf.mxu0 }
 0x388   : > { %6550 = vmatmul.mubr.bf16.vlgmr.msra.gmra.mxu1 %v2914_v40  ;;  %3106 = vmatmul.mubr.bf16.gmra.mxu0 %v2912_v43 }
 0x389   : > { %4065 = vmatprep.mubr.bf16.mxu1 %v3531_v38  ;;  %6286 = vmatpush3.bf16.msra.mxu1 %v6983_v41  ;;  %v2754_v15 = vpop.f32.mrf.mxu0 }
 0x38a   : > { %6262 = vmatpush3.bf16.msra.mxu0 %v6989_v42  ;;  %6287 = vmatprep.subr.bf16.mxu1 %v6986_v44  ;;  %v3399_v36 = vld [vmem:[#allocation2 + $0x18] sm:$0x1]  ;;  %v3396_v42 = vld [vmem:[#allocation2 + $0x40] sm:$0xfe] }
 0x38b   : > { %6263 = vmatprep.subr.bf16.mxu0 %v6992_v46  ;;  %v2756_v31 = vpop.f32.mrf.mxu0  ;;  %v3456_v44 = vrot.slane %v3399_v36, 1 }
 0x38d   : > { %6288 = vmatpush3.bf16.msra.mxu1 %v6987_v47  ;;  %v2760_v27 = vpop.f32.mrf.mxu0 }
 0x38e   : > { %6264 = vmatpush3.bf16.msra.mxu0 %v6993_v48  ;;  %6289 = vmatprep.subr.bf16.mxu1 %v6990_v49 }
 0x38f   : > { %6265 = vmatprep.subr.bf16.mxu0 %v6996_v50  ;;  %v2762_v37 = vpop.f32.mrf.mxu0 }
 0x391   : > { %6290 = vmatpush3.bf16.msra.mxu1 %v6991_v51  ;;  %v2764_v50 = vpop.f32.mrf.mxu0 }
 0x392   : > { %6266 = vmatpush3.bf16.msra.mxu0 %v6997_v57  ;;  %6291 = vmatprep.subr.bf16.mxu1 %v6994_v58  ;;  %v3447_v57 = vrot.slane %v3396_v42, 1  ;;  %v3448_v58 = vrot.slane %v8011_v59, 1 }
 0x393   : > { %6267 = vmatprep.subr.bf16.mxu0 %v7000_v60 }
 0x395   : > { %6292 = vmatpush3.bf16.msra.mxu1 %v6995_v62 }
 0x396   : > { %6268 = vmatpush3.bf16.msra.mxu0 %v7001_v63  ;;  %6293 = vmatprep.subr.bf16.mxu1 %v6998_v0 }
 0x397   : > { %6269 = vmatprep.subr.bf16.mxu0 %v7004_v2  ;;  %v3378_v2 = vld [vmem:[#allocation2] sm:$0xff] }
 0x399   : > { %6294 = vmatpush3.bf16.msra.mxu1 %v6999_v3 }
 0x39a   : > { %6270 = vmatpush3.bf16.msra.mxu0 %v7005_v1  ;;  %6295 = vmatprep.subr.bf16.mxu1 %v7002_v5 }
 0x39b   : > { %6271 = vmatprep.subr.bf16.mxu0 %v7008_v6 }
 0x39d   : > { %6296 = vmatpush3.bf16.msra.mxu1 %v7003_v7 }
 0x39e   : > { %6272 = vmatpush3.bf16.msra.mxu0 %v7009_v8  ;;  %6297 = vmatprep.subr.bf16.mxu1 %v7006_v10  ;;  %v2766_v10 = vpop.f32.mrf.mxu0 }
 0x39f   : > { %6313 = vmatprep.subr.bf16.mxu0 %v7012_v11  ;;  %v3528_v11 = vpack.c.bf16 %v8007_v32, %v3378_v2  ;;  %v7027_v2 = vld [vmem:[%s7623_s29 + $0x1a0] sm:$0xff]  }
 0x3a1   : > { %6298 = vmatpush3.bf16.msra.mxu1 %v7007_v14 }
 0x3a2   : > { %6299 = vmatprep.subr.bf16.mxu1 %v7010_v16 }
 0x3a4   : > { %v2697_v20 = vpop.f32.mrf.mxu1 }
 0x3a5   : > { %v2698_v22 = vadd.f32 %v2697_v20, %v2068_v17  ;;  %6300 = vmatpush3.bf16.msra.mxu1 %v7011_v19  ;;  %v3449_v19 = vsel %vm1200_vm3, %v3447_v57, %v3448_v58  ;;  %v7024_v57 = vld [vmem:[%s7623_s29 + $0x160] sm:$0xff]  }
 0x3a6   : > { %v2699_v23 = vpop.f32.mrf.mxu1  ;;  %6341 = vmatprep.subr.bf16.mxu1 %v7014_v21 }
 0x3a7   : > { %v2751_v25 = vadd.f32 %v2750_v4, %v2698_v22  ;;  %v2700_v26 = vadd.f32 %v2699_v23, %v2072_v18  ;;  %v3457_v4 = vsel %vm1200_vm3, %v3448_v58, %v3456_v44 }
 0x3a8   : > { %v2701_v28 = vpop.f32.mrf.mxu1  ;;  %v3540_v20 = vpack.c.bf16 %v3457_v4, %v3449_v19  ;;  %v7029_v4 = vld [vmem:[%s7623_s29 + $0x118] sm:$0xff]  }
 0x3a9   : > { %v3181_v29 = vrot.slane %v2751_v25, 7  ;;  %v2753_v30 = vadd.f32 %v2752_v9, %v2700_v26  ;;  %v2702_v24 = vadd.f32 %v2701_v28, %v2068_v17  ;;  %v7013_v9 = vld [vmem:[%s7623_s29 + $0x138] sm:$0xff]   ;;  %v7017_v25 = vld [vmem:[%s7623_s29 + $0x130] sm:$0xff]  }
 0x3aa   : > { %v2703_v33 = vpop.f32.mrf.mxu1  ;;  %v7019_v28 = vld [vmem:[%s7623_s29 + $0x1b0] sm:$0xff]  }
 0x3ab   : > { %3217 = vst [vmem:[#allocation2 + $0x38] sm:$0xfe] %v3181_v29  ;;  %v3182_v55 = vrot.slane %v2753_v30, 7  ;;  %v2755_v34 = vadd.f32 %v2754_v15, %v2702_v24  ;;  %v2704_v35 = vadd.f32 %v2703_v33, %v2072_v18 }
 0x3ac   : > { %v2707_v38 = vpop.f32.mrf.mxu1 }
 0x3ad   : > { %3218 = vst [vmem:[#allocation2 + $0x78] sm:$0xfe] %v3182_v55  ;;  %v3185_v39 = vrot.slane %v2755_v34, 7  ;;  %v2757_v40 = vadd.f32 %v2756_v31, %v2704_v35  ;;  %v2708_v41 = vadd.f32 %v2707_v38, %v2068_v17  ;;  %v7018_v31 = vld [vmem:[%s7623_s29 + $0x1f0] sm:$0xff]   ;;  %v7022_v34 = vld [vmem:[%s7623_s29 + $0x1e8] sm:$0xff]  }
 0x3ae   : > { %v2709_v43 = vpop.f32.mrf.mxu1 }
 0x3af   : > { %v8062_v46 = vsel %vm1115_vm2, %v3181_v29, %v3185_v39  ;;  %3223 = vst [vmem:[#allocation2 + $0x80] sm:$0x1] %v3185_v39  ;;  %v3187_v47 = vrot.slane %v2757_v40, 7  ;;  %v2761_v48 = vadd.f32 %v2760_v27, %v2708_v41  ;;  %v2710_v49 = vadd.f32 %v2709_v43, %v2072_v18  ;;  %v7020_v29 = vld [vmem:[%s7623_s29 + $0x168] sm:$0xff]  }
 0x3b0   : > { %v2711_v51 = vpop.f32.mrf.mxu1  ;;  %v7021_v41 = vld [vmem:[%s7623_s29 + $0x128] sm:$0xff]  }
 0x3b1   : > { %v8066_v60 = vsel %vm1115_vm2, %v3182_v55, %v3187_v47  ;;  %3224 = vst [vmem:[#allocation2 + $0x88] sm:$0x1] %v3187_v47  ;;  %v3190_v62 = vrot.slane %v2761_v48, 7  ;;  %v2763_v63 = vadd.f32 %v2762_v37, %v2710_v49  ;;  %v2712_v0 = vadd.f32 %v2711_v51, %v2068_v17  ;;  %v3384_v55 = vld [vmem:[#allocation2 + $0x40] sm:$0xff]  ;;  %v7023_v49 = vld [vmem:[%s7623_s29 + $0x1a8] sm:$0xff]  }
 0x3b2   : > { %v2713_v3 = vpop.f32.mrf.mxu1  ;;  %v3379_v1 = vld [vmem:[#allocation2 + $0x38] sm:$0xff]  ;;  %v3439_v35 = vrot.slane %v8066_v60, 1  ;;  %v3490_v37 = vrot.slane %v8062_v46, 2  ;;  %v3537_v44 = vpack.c.bf16 %v8011_v59, %v3384_v55  ;;  %v3487_v55 = vrot.slane %v8007_v32, 2 }
 0x3b3   : > { %3226 = vst [vmem:[#allocation2 + $0x50] sm:$0xfe] %v3190_v62  ;;  %v3191_v5 = vrot.slane %v2763_v63, 7  ;;  %v2765_v6 = vadd.f32 %v2764_v50, %v2712_v0  ;;  %v2714_v7 = vadd.f32 %v2713_v3, %v2072_v18  ;;  %v3529_v8 = vpack.c.bf16 %v8062_v46, %v3379_v1  ;;  %v7016_v18 = vld [vmem:[%s7623_s29 + $0x170] sm:$0xff]   ;;  %v3403_v27 = vld [vmem:[#allocation2 + $0x38] sm:$0xfc] }
 0x3b4   : > { %v3380_v12 = vld [vmem:[#allocation2 + $0x78] sm:$0xff]  ;;  %v3489_v39 = vrot.slane %v3403_v27, 2  ;;  %v7025_v0 = vld [vmem:[%s7623_s29 + $0x120] sm:$0xff]  }
 0x3b5   : > { %v3392_v14 = vld [vmem:[#allocation2 + $0x78] sm:$0xfe]  ;;  %3227 = vst [vmem:[#allocation2 + $0x28] sm:$0xfe] %v3191_v5  ;;  %v3194_v15 = vrot.slane %v2765_v6, 7  ;;  %v2767_v16 = vadd.f32 %v2766_v10, %v2714_v7  ;;  %4016 = vmatprep.mubr.bf16.mxu0 %v3529_v8  ;;  %v3530_v17 = vpack.c.bf16 %v8066_v60, %v3380_v12  ;;  %v7032_v6 = vld [vmem:[%s7623_s29 + $0x150] sm:$0xff]  }
 0x3b6   : > { %4017 = vmatmul.mubr.bf16.vlgmr.msra.gmra.mxu0 %v3528_v11  ;;  %v3406_v21 = vld [vmem:[#allocation2 + $0x80] sm:$0x3]  ;;  %v3438_v26 = vrot.slane %v3392_v14, 1  ;;  %v3491_v58 = vsel %vm1219_vm4, %v3489_v39, %v3490_v37  ;;  %v7028_v3 = vld [vmem:[%s7623_s29 + $0x158] sm:$0xff]   ;;  %v7034_v7 = vld [vmem:[%s7623_s29 + $0x1d0] sm:$0xff]  }
 0x3b7   : > { %v8078_v22 = vsel %vm1115_vm2, %v3190_v62, %v3194_v15  ;;  %3232 = vst [vmem:[#allocation2 + $0x68] sm:$0x1] %v3194_v15  ;;  %v3196_v23 = vrot.slane %v2767_v16, 7  ;;  %6314 = vmatpush3.bf16.msra.mxu0 %v7013_v9  ;;  %4066 = vmatmul.mubr.bf16.vlgmr.msra.gmra.mxu1 %v3530_v17  ;;  %v3497_v24 = vrot.slane %v3406_v21, 2  ;;  %v7026_v62 = vld [vmem:[%s7623_s29 + $0x1e0] sm:$0xff]   ;;  %v7030_v1 = vld [vmem:[%s7623_s29 + $0x1d8] sm:$0xff]  }
 0x3b8   : > { %6342 = vmatpush3.bf16.msra.mxu1 %v7015_v13  ;;  %4073 = vmatprep.mubr.bf16.mxu1 %v3540_v20  ;;  %v3395_v30 = vld [vmem:[#allocation2 + $0x88] sm:$0x1]  ;;  %v3440_v42 = vsel %vm1200_vm3, %v3438_v26, %v3439_v35  ;;  %v7033_v8 = vld [vmem:[%s7623_s29 + $0x110] sm:$0xff]   ;;  %v3394_v13 = vld [vmem:[#allocation2 + $0x80] sm:$0x1]  ;;  %v3505_v39 = vrot.slane %v8078_v22, 2 }
 0x3b9   : > { %v8084_v33 = vsel %vm1115_vm2, %v3191_v5, %v3196_v23  ;;  %3233 = vst [vmem:[#allocation2 + $0x60] sm:$0x1] %v3196_v23  ;;  %6315 = vmatprep.subr.bf16.mxu0 %v7016_v18  ;;  %6343 = vmatprep.subr.bf16.mxu1 %v7018_v31  ;;  %v3445_v36 = vrot.slane %v3395_v30, 1  ;;  %v3498_v50 = vsel %vm1219_vm4, %v3490_v37, %v3497_v24  ;;  %v7031_v5 = vld [vmem:[%s7623_s29 + $0x198] sm:$0xff]   ;;  %v7035_v9 = vld [vmem:[%s7623_s29 + $0x190] sm:$0xff]   ;;  %v7036_v10 = vld [vmem:[%s7623_s29 + $0x148] sm:$0xff]  }
 0x3ba   : > { %v3385_v38 = vld [vmem:[#allocation2 + $0x50] sm:$0xff]  ;;  %v3535_v63 = vpack.c.bf16 %v3498_v50, %v3491_v58  ;;  %v7038_v11 = vld [vmem:[%s7623_s29 + $0x1c8] sm:$0xff]   ;;  %v7040_v17 = vld [vmem:[%s7623_s29 + $0x140] sm:$0xff]   ;;  %v3443_v20 = vrot.slane %v3394_v13, 1 }
 0x3bb   : > { %6316 = vmatpush3.bf16.msra.mxu0 %v7017_v25  ;;  %v3538_v40 = vpack.c.bf16 %v8078_v22, %v3385_v38  ;;  %v3446_v43 = vsel %vm1200_vm3, %v3439_v35, %v3445_v36  ;;  %v7037_v12 = vld [vmem:[%s7623_s29 + $0x108] sm:$0xff]   ;;  %v3405_v16 = vld [vmem:[#allocation2 + $0x70] sm:$0x3]  ;;  %v3391_v19 = vld [vmem:[#allocation2 + $0x38] sm:$0xfe] }
 0x3bc   : > { %6344 = vmatpush3.bf16.msra.mxu1 %v7019_v28  ;;  %6317 = vmatprep.subr.bf16.mxu0 %v7020_v29  ;;  %v3386_v47 = vld [vmem:[#allocation2 + $0x28] sm:$0xff]  ;;  %v3533_v48 = vpack.c.bf16 %v3446_v43, %v3440_v42  ;;  %v7042_v31 = vld [vmem:[%s7623_s29 + $0x1c0] sm:$0xff]   ;;  %v3495_v26 = vrot.slane %v3405_v16, 2  ;;  %v3409_v27 = vld [vmem:[#allocation2 + $0x50] sm:$0xfc]  ;;  %v3436_v28 = vrot.slane %v8062_v46, 1 }
 0x3bd   : > { %4024 = vmatprep.mubr.bf16.mxu0 %v3538_v40  ;;  %6345 = vmatprep.subr.bf16.mxu1 %v7022_v34  ;;  %v3539_v51 = vpack.c.bf16 %v8084_v33, %v3386_v47  ;;  %v7039_v14 = vld [vmem:[%s7623_s29 + $0x188] sm:$0xff]   ;;  %v3402_v23 = vld [vmem:[#allocation2] sm:$0xfc]  ;;  %v3435_v30 = vrot.slane %v3391_v19, 1  ;;  %v3454_v34 = vrot.slane %v8084_v33, 1  ;;  %v7044_v36 = vld [vmem:[%s7623_s29 + $0x238] sm:$0xff]  }
 0x3be   : > { %4025 = vmatmul.mubr.bf16.gmra.mxu0 %v3537_v44  ;;  %v3412_v18 = vld [vmem:[#allocation2 + $0x68] sm:$0x3]  ;;  %v7041_v29 = vld [vmem:[%s7623_s29 + $0x100] sm:$0xff]   ;;  %v3486_v38 = vrot.slane %v3402_v23, 2  ;;  %v3444_v40 = vsel %vm1200_vm3, %v3436_v28, %v3443_v20  ;;  %v3504_v46 = vrot.slane %v3409_v27, 2  ;;  %v3496_v42 = vsel %vm1219_vm4, %v3487_v55, %v3495_v26  ;;  %v7048_v20 = vld [vmem:[%s7623_s29 + $0x218] sm:$0xff]  }
 0x3bf   : > { %6318 = vmatpush3.bf16.msra.mxu0 %v7021_v41  ;;  %4074 = vmatmul.mubr.bf16.gmra.mxu1 %v3539_v51  ;;  %v3398_v21 = vld [vmem:[#allocation2 + $0x28] sm:$0xfe]  ;;  %v3512_v24 = vrot.slane %v3412_v18, 2  ;;  %v7043_v35 = vld [vmem:[%s7623_s29 + $0x180] sm:$0xff]   ;;  %v3400_v32 = vld [vmem:[#allocation2 + $0x68] sm:$0x1]  ;;  %v3437_v43 = vsel %vm1200_vm3, %v3435_v30, %v3436_v28 }
 0x3c0   : > { %4114 = vmatprep.mubr.bf16.mxu0 %v3533_v48  ;;  %6346 = vmatpush3.bf16.msra.mxu1 %v7023_v49  ;;  %v3401_v15 = vld [vmem:[#allocation2 + $0x60] sm:$0x1]  ;;  %v3453_v37 = vrot.slane %v3398_v21, 1  ;;  %v3411_v47 = vld [vmem:[#allocation2 + $0x18] sm:$0x3]  ;;  %v3532_v49 = vpack.c.bf16 %v3444_v40, %v3437_v43  ;;  %v3488_v51 = vsel %vm1219_vm4, %v3486_v38, %v3487_v55  ;;  %v7049_v21 = vld [vmem:[%s7623_s29 + $0x210] sm:$0xff]  }
 0x3c1   : > { %4163 = vmatprep.mubr.bf16.mxu1 %v3535_v63  ;;  %6319 = vmatprep.subr.bf16.mxu0 %v7024_v57  ;;  %v3460_v25 = vrot.slane %v3401_v15, 1  ;;  %v3513_v44 = vsel %vm1219_vm4, %v3505_v39, %v3512_v24  ;;  %v3407_v48 = vld [vmem:[#allocation2 + $0x88] sm:$0x3]  ;;  %v3397_v57 = vld [vmem:[#allocation2 + $0x50] sm:$0xfe]  ;;  %v3506_v63 = vsel %vm1219_vm4, %v3504_v46, %v3505_v39  ;;  %v7051_v26 = vld [vmem:[%s7623_s29 + $0x200] sm:$0xff]  }
 0x3c2   : > { %6347 = vmatprep.subr.bf16.mxu1 %v7026_v62  ;;  %v3455_v50 = vsel %vm1200_vm3, %v3453_v37, %v3454_v34  ;;  %v3534_v62 = vpack.c.bf16 %v3496_v42, %v3488_v51  ;;  %v7050_v23 = vld [vmem:[%s7623_s29 + $0x208] sm:$0xff]  }
 0x3c3   : > { %6320 = vmatpush3.bf16.msra.mxu0 %v7025_v0  ;;  %v3461_v41 = vsel %vm1200_vm3, %v3454_v34, %v3460_v25  ;;  %v7045_v0 = vld [vmem:[%s7623_s29 + $0x230] sm:$0xff]   ;;  %v3413_v25 = vld [vmem:[#allocation2 + $0x60] sm:$0x3]  ;;  %v3410_v27 = vld [vmem:[#allocation2 + $0x28] sm:$0xfc] }
 0x3c4   : > { %6348 = vmatpush3.bf16.msra.mxu1 %v7027_v2  ;;  %6321 = vmatprep.subr.bf16.mxu0 %v7028_v3  ;;  %v3542_v58 = vpack.c.bf16 %v3461_v41, %v3455_v50  ;;  %v3458_v2 = vrot.slane %v3400_v32, 1  ;;  %v3408_v3 = vld [vmem:[#allocation2 + $0x40] sm:$0xfc]  ;;  %v3514_v28 = vrot.slane %v3413_v25, 2  ;;  %v3507_v30 = vrot.slane %v3410_v27, 2 }
 0x3c5   : > { %6349 = vmatprep.subr.bf16.mxu1 %v7030_v1  ;;  %v3404_v1 = vld [vmem:[#allocation2 + $0x78] sm:$0xfc] }
 0x3c7   : > { %6322 = vmatpush3.bf16.msra.mxu0 %v7029_v4  ;;  %v3544_v4 = vpack.c.bf16 %v3513_v44, %v3506_v63 }
 0x3c8   : > { %6350 = vmatpush3.bf16.msra.mxu1 %v7031_v5  ;;  %6323 = vmatprep.subr.bf16.mxu0 %v7032_v6  ;;  %v3510_v5 = vrot.slane %v3411_v47, 2  ;;  %v3499_v6 = vrot.slane %v3407_v48, 2 }
 0x3c9   : > { %6351 = vmatprep.subr.bf16.mxu1 %v7034_v7  ;;  %v3451_v7 = vrot.slane %v8078_v22, 1 }
 0x3cb   : > { %6324 = vmatpush3.bf16.msra.mxu0 %v7033_v8  ;;  %v3450_v8 = vrot.slane %v3397_v57, 1  ;;  %v3459_v13 = vsel %vm1200_vm3, %v3451_v7, %v3458_v2 }
 0x3cc   : > { %6352 = vmatpush3.bf16.msra.mxu1 %v7035_v9  ;;  %6325 = vmatprep.subr.bf16.mxu0 %v7036_v10  ;;  %v3501_v9 = vrot.slane %v3408_v3, 2  ;;  %v3502_v10 = vrot.slane %v8011_v59, 2 }
 0x3cd   : > { %6353 = vmatprep.subr.bf16.mxu1 %v7038_v11  ;;  %v3492_v11 = vrot.slane %v3404_v1, 2  ;;  %v3452_v16 = vsel %vm1200_vm3, %v3450_v8, %v3451_v7 }
 0x3ce   : > { %v3511_v15 = vsel %vm1219_vm4, %v3502_v10, %v3510_v5  ;;  %v3503_v59 = vsel %vm1219_vm4, %v3501_v9, %v3502_v10 }
 0x3cf   : > { %6326 = vmatpush3.bf16.msra.mxu0 %v7037_v12  ;;  %v3493_v12 = vrot.slane %v8066_v60, 2  ;;  %v3543_v60 = vpack.c.bf16 %v3511_v15, %v3503_v59 }
 0x3d0   : > { %6354 = vmatpush3.bf16.msra.mxu1 %v7039_v14  ;;  %6327 = vmatprep.subr.bf16.mxu0 %v7040_v17  ;;  %v7046_v14 = vld [vmem:[%s7623_s29 + $0x228] sm:$0xff]   ;;  %v3541_v17 = vpack.c.bf16 %v3459_v13, %v3452_v16 }
 0x3d1   : > { %6355 = vmatprep.subr.bf16.mxu1 %v7042_v31  ;;  %v3500_v22 = vsel %vm1219_vm4, %v3493_v12, %v3499_v6  ;;  %v3494_v19 = vsel %vm1219_vm4, %v3492_v11, %v3493_v12  ;;  %v7047_v31 = vld [vmem:[%s7623_s29 + $0x220] sm:$0xff]  }
 0x3d2   : > { %v3536_v18 = vpack.c.bf16 %v3500_v22, %v3494_v19 }
 0x3d3   : > { %6328 = vmatpush3.bf16.msra.mxu0 %v7041_v29  ;;  %v3508_v29 = vrot.slane %v8084_v33, 2  ;;  %v5998_v33 = vld [vmem:[%s8805_s5] ss:$0 sm:$0xff]  ;;  %s7268_s5 = smov 32  }
 0x3d4   : > { %6356 = vmatpush3.bf16.msra.mxu1 %v7043_v35  ;;  %6553 = vmatprep.subr.bf16.mxu0 %v7044_v36 }
 0x3d5   : > { %v3515_v24 = vsel %vm1219_vm4, %v3508_v29, %v3514_v28  ;;  %v3509_v55 = vsel %vm1219_vm4, %v3507_v30, %v3508_v29  ;;  %v6023_v30 = vld [vmem:[%s8806_s20] ss:$0 sm:$0xff]  ;;  %s8808_s20 = sld [smem:[#allocation33_spill]] }
 0x3d6   : > { %4115 = vmatmul.mubr.bf16.vlgmr.msra.gmra.mxu0 %v3532_v49  ;;  %v3545_v34 = vpack.c.bf16 %v3515_v24, %v3509_v55 }
 0x3d7   : > { %4122 = vmatprep.mubr.bf16.mxu0 %v3542_v58  ;;  %4164 = vmatmul.mubr.bf16.vlgmr.msra.gmra.mxu1 %v3534_v62 }
 0x3d8   : > { %6554 = vmatpush3.bf16.msra.mxu0 %v7044_v36  ;;  %4171 = vmatprep.mubr.bf16.mxu1 %v3544_v4 }
 0x3d9   : > { %6555 = vmatprep.subr.bf16.mxu0 %v7045_v0 }
 0x3dc   : > { %6556 = vmatpush3.bf16.msra.mxu0 %v7045_v0 }
 0x3dd   : > { %6557 = vmatprep.subr.bf16.mxu0 %v7046_v14 }
 0x3de   : > { %4123 = vmatmul.mubr.bf16.gmra.mxu0 %v3541_v17 }
 0x3df   : > { %4172 = vmatmul.mubr.bf16.gmra.mxu1 %v3543_v60  ;;  %6569 = vmatprep.mubr.bf16.mxu0 %v3536_v18 }
 0x3e0   : > { %6558 = vmatpush3.bf16.msra.mxu0 %v7046_v14 }
 0x3e1   : > { %6559 = vmatprep.subr.bf16.mxu0 %v7047_v31 }
 0x3e4   : > { %6560 = vmatpush3.bf16.msra.mxu0 %v7047_v31 }
 0x3e5   : > { %6561 = vmatprep.subr.bf16.mxu0 %v7048_v20 }
 0x3e8   : > { %6562 = vmatpush3.bf16.msra.mxu0 %v7048_v20 }
 0x3e9   : > { %6563 = vmatprep.subr.bf16.mxu0 %v7049_v21 }
 0x3ec   : > { %6564 = vmatpush3.bf16.msra.mxu0 %v7049_v21 }
 0x3ed   : > { %6565 = vmatprep.subr.bf16.mxu0 %v7050_v23 }
 0x3f0   : > { %6566 = vmatpush3.bf16.msra.mxu0 %v7050_v23 }
 0x3f1   : > { %6567 = vmatprep.subr.bf16.mxu0 %v7051_v26 }
 0x3f4   : > { %6568 = vmatpush3.bf16.msra.mxu0 %v7051_v26 }
 0x3f7   : > { %6570 = vmatmul.mubr.bf16.vlgmr.msra.gmra.mxu0 %v3545_v34 }
 0x440   : > { %v6235_v35 = vpop.f32.mrf.mxu0 }
 0x442   : > { %v6236_v36 = vpop.f32.mrf.mxu0 }
 0x443   : > { %v6237_v37 = vadd.f32 %v6236_v36, %v6235_v35 }
 0x444   : > { %v6238_v38 = vpop.f32.mrf.mxu0 }
 0x445   : > { %v3100_v42 = vadd.f32 %v6237_v37, %v5998_v33 }
 0x446   : > { %v6239_v39 = vpop.f32.mrf.mxu0 }
 0x447   : > { %v6240_v40 = vadd.f32 %v6239_v39, %v6238_v38 }
 0x448   : > { %v6551_v46 = vpop.f32.mrf.mxu1  ;;  %v6241_v41 = vpop.f32.mrf.mxu0 }
 0x449   : > { %v3103_v50 = vadd.f32 %v6240_v40, %v5998_v33 }
 0x44a   : > { %v3148_v32 = vpop.f32.mrf.mxu1  ;;  %v6242_v44 = vpop.f32.mrf.mxu0 }
 0x44b   : > { %v8155_v43 = vadd.f32 %v3148_v32, %v3100_v42  ;;  %v6243_v47 = vadd.f32 %v6242_v44, %v6241_v41 }
 0x44c   : > { %v6552_v48 = vpop.f32.mrf.mxu1  ;;  %v6244_v49 = vpop.f32.mrf.mxu0 }
 0x44d   : > { %v3108_v51 = vadd.f32 %v6243_v47, %v5998_v33 }
 0x44e   : > { %v3151_v57 = vpop.f32.mrf.mxu1  ;;  %v6245_v62 = vpop.f32.mrf.mxu0 }
 0x44f   : > { %v8157_v58 = vadd.f32 %v3151_v57, %v3103_v50  ;;  %v8159_v63 = vadd.f32 %v6551_v46, %v3108_v51  ;;  %v6246_v0 = vadd.f32 %v6245_v62, %v6244_v49 }
 0x451   : > { %v3111_v2 = vadd.f32 %v6246_v0, %v5998_v33 }
 0x453   : > { %v8161_v3 = vadd.f32 %v6552_v48, %v3111_v2 }
 0x476   : > { %v6273_v1 = vpop.f32.mrf.mxu0 }
 0x477   : > { %v6301_v4 = vpop.f32.mrf.mxu1 }
 0x478   : > { %v6274_v5 = vpop.f32.mrf.mxu0 }
 0x479   : > { %v6302_v6 = vpop.f32.mrf.mxu1  ;;  %v6275_v29 = vadd.f32 %v6274_v5, %v6273_v1 }
 0x47a   : > { %v6276_v7 = vpop.f32.mrf.mxu0  ;;  %v6303_v38 = vadd.f32 %v6302_v6, %v6301_v4 }
 0x47b   : > { %v6304_v8 = vpop.f32.mrf.mxu1  ;;  %v4019_v37 = vadd.f32 %v6275_v29, %v6023_v30 }
 0x47c   : > { %v6277_v9 = vpop.f32.mrf.mxu0 }
 0x47d   : > { %v6305_v10 = vpop.f32.mrf.mxu1  ;;  %v6278_v39 = vadd.f32 %v6277_v9, %v6276_v7  ;;  %v4068_v47 = vadd.f32 %v6303_v38, %v4019_v37  ;;  %v4300_v37 = vld [vmem:[%s8807_s17 + $0x58] sm:$0xff] }
 0x47e   : > { %v6279_v11 = vpop.f32.mrf.mxu0  ;;  %v6306_v48 = vadd.f32 %v6305_v10, %v6304_v8 }
 0x47f   : > { %v6307_v12 = vpop.f32.mrf.mxu1  ;;  %v4022_v49 = vadd.f32 %v6278_v39, %v6023_v30  ;;  %v4315_v39 = vld [vmem:[%s8807_s17 + $0xd0] sm:$0xff] }
 0x480   : > { %v6280_v13 = vpop.f32.mrf.mxu0 }
 0x481   : > { %v6308_v14 = vpop.f32.mrf.mxu1  ;;  %v6281_v28 = vadd.f32 %v6280_v13, %v6279_v11  ;;  %v4071_v4 = vadd.f32 %v6306_v48, %v4022_v49  ;;  %v4295_v48 = vld [vmem:[%s8807_s17 + $0x30] sm:$0xff]  ;;  %v4310_v49 = vld [vmem:[%s8807_s17 + $0xa8] sm:$0xff] }
 0x482   : > { %v6282_v15 = vpop.f32.mrf.mxu0  ;;  %v6309_v35 = vadd.f32 %v6308_v14, %v6307_v12 }
 0x483   : > { %v6310_v22 = vpop.f32.mrf.mxu1  ;;  %v4027_v34 = vadd.f32 %v6281_v28, %v6023_v30  ;;  %v4302_v28 = vld [vmem:[%s8807_s17 + $0x68] sm:$0xff] }
 0x484   : > { %v6283_v16 = vpop.f32.mrf.mxu0 }
 0x485   : > { %v6311_v17 = vpop.f32.mrf.mxu1  ;;  %v6284_v36 = vadd.f32 %v6283_v16, %v6282_v15  ;;  %v4076_v41 = vadd.f32 %v6309_v35, %v4027_v34  ;;  %v4301_v35 = vld [vmem:[%s8807_s17 + $0x60] sm:$0xff] }
 0x486   : > { %v6312_v32 = vadd.f32 %v6311_v17, %v6310_v22 }
 0x487   : > { %v4030_v42 = vadd.f32 %v6284_v36, %v6023_v30  ;;  %v4316_v36 = vld [vmem:[%s8807_s17 + $0xd8] sm:$0xff] }
 0x489   : > { %v4079_v0 = vadd.f32 %v6312_v32, %v4030_v42  ;;  %v4297_v42 = vld [vmem:[%s8807_s17 + $0x40] sm:$0xff]  ;;  %v4312_v32 = vld [vmem:[%s8807_s17 + $0xb8] sm:$0xff] }
 0x496   : > { %v6329_v59 = vpop.f32.mrf.mxu0 }
 0x497   : > { %v6357_v19 = vpop.f32.mrf.mxu1 }
 0x498   : > { %v6330_v60 = vpop.f32.mrf.mxu0 }
 0x499   : > { %v6358_v18 = vpop.f32.mrf.mxu1  ;;  %v6331_v44 = vadd.f32 %v6330_v60, %v6329_v59 }
 0x49a   : > { %v6332_v31 = vpop.f32.mrf.mxu0  ;;  %v6359_v1 = vadd.f32 %v6358_v18, %v6357_v19 }
 0x49b   : > { %v6360_v20 = vpop.f32.mrf.mxu1  ;;  %v4117_v2 = vadd.f32 %v6331_v44, %v4068_v47  ;;  %v4296_v44 = vld [vmem:[%s8807_s17 + $0x38] sm:$0xff]  ;;  %v4311_v47 = vld [vmem:[%s8807_s17 + $0xb0] sm:$0xff] }
 0x49c   : > { %v6333_v21 = vpop.f32.mrf.mxu0 }
 0x49d   : > { %v6361_v23 = vpop.f32.mrf.mxu1  ;;  %v6334_v5 = vadd.f32 %v6333_v21, %v6332_v31  ;;  %v4166_v15 = vadd.f32 %v6359_v1, %v4117_v2  ;;  %v4304_v21 = vld [vmem:[%s8807_s17 + $0x78] sm:$0xff]  ;;  %v4307_v2 = vld [vmem:[%s8807_s17 + $0x90] sm:$0xff] }
 0x49e   : > { %v6335_v25 = vpop.f32.mrf.mxu0  ;;  %v6362_v13 = vadd.f32 %v6361_v23, %v6360_v20  ;;  %v4320_v20 = vld [vmem:[%s8807_s17 + $0xf8] sm:$0xff]  ;;  %v4319_v23 = vld [vmem:[%s8807_s17 + $0xf0] sm:$0xff] }
 0x49f   : > { %v6363_v26 = vpop.f32.mrf.mxu1  ;;  %v4120_v12 = vadd.f32 %v6334_v5, %v4071_v4  ;;  %6379 = vmatprep.subr.mxu1 %v4320_v20  ;;  %v4291_v1 = vld [vmem:[%s8807_s17 + $0x10] sm:$0xff]  ;;  %v4306_v5 = vld [vmem:[%s8807_s17 + $0x88] sm:$0xff] }
 0x4a0   : > { %v6336_v27 = vpop.f32.mrf.mxu0  ;;  %6380 = vmatpush3.msra.mxu1 %v4304_v21  ;;  %v4290_v4 = vld [vmem:[%s8807_s17 + $0x8] sm:$0xff] }
 0x4a1   : > { %v6364_v24 = vpop.f32.mrf.mxu1  ;;  %v6337_v33 = vadd.f32 %v6336_v27, %v6335_v25  ;;  %v4169_v59 = vadd.f32 %v6362_v13, %v4120_v12  ;;  %v4318_v27 = vld [vmem:[%s8807_s17 + $0xe8] sm:$0xff]  ;;  %6381 = vmatprep.subr.mxu1 %v4319_v23 }
 0x4a2   : > { %v6338_v55 = vpop.f32.mrf.mxu0  ;;  %v6365_v51 = vadd.f32 %v6364_v24, %v6363_v26  ;;  %v4303_v26 = vld [vmem:[%s8807_s17 + $0x70] sm:$0xff] }
 0x4a3   : > { %v6366_v40 = vpop.f32.mrf.mxu1  ;;  %v4125_v50 = vadd.f32 %v6337_v33, %v4076_v41  ;;  %6382 = vmatpush3.msra.mxu1 %v4303_v26  ;;  %v4299_v33 = vld [vmem:[%s8807_s17 + $0x50] sm:$0xff]  ;;  %v4313_v41 = vld [vmem:[%s8807_s17 + $0xc0] sm:$0xff]  ;;  %v4556_v26 = vld [vmem:[%s7683_s7 + $0x78] sm:$0xff] }
 0x4a4   : > { %v6339_v46 = vpop.f32.mrf.mxu0  ;;  %6383 = vmatprep.subr.mxu1 %v4318_v27  ;;  %v7267_v27 = vmov 0.0  }
 0x4a5   : > { %v6340_v57 = vadd.f32 %v6339_v46, %v6338_v55  ;;  %v6367_v62 = vpop.f32.mrf.mxu1  ;;  %v4174_v9 = vadd.f32 %v6365_v51, %v4125_v50  ;;  %v4317_v55 = vld [vmem:[%s8807_s17 + $0xe0] sm:$0xff]  ;;  %6384 = vmatpush3.msra.mxu1 %v4302_v28  ;;  %v4298_v46 = vld [vmem:[%s8807_s17 + $0x48] sm:$0xff]  ;;  %4581 = vmatprep.subr.mxu0 %v7267_v27  ;;  %v4555_v28 = vld [vmem:[%s7683_s7 + $0x70] sm:$0xff] }
 0x4a6   : > { %v6368_v7 = vadd.f32 %v6367_v62, %v6366_v40  ;;  %6385 = vmatprep.subr.mxu1 %v4317_v55  ;;  %v4314_v40 = vld [vmem:[%s8807_s17 + $0xc8] sm:$0xff]  ;;  %v4309_v51 = vld [vmem:[%s8807_s17 + $0xa0] sm:$0xff]  ;;  %v4308_v62 = vld [vmem:[%s8807_s17 + $0x98] sm:$0xff]  ;;  %4582 = vmatpush1.msra.mxu0 %v4556_v26 }
 0x4a7   : > { %v4128_v6 = vadd.f32 %v6340_v57, %v4079_v0  ;;  %6386 = vmatpush3.msra.mxu1 %v4301_v35  ;;  %v4294_v50 = vld [vmem:[%s8807_s17 + $0x28] sm:$0xff]  ;;  %v4293_v57 = vld [vmem:[%s8807_s17 + $0x20] sm:$0xff]  ;;  %v4292_v0 = vld [vmem:[%s8807_s17 + $0x18] sm:$0xff]  ;;  %4583 = vmatprep.subr.mxu0 %v7267_v27 }
 0x4a8   : > { %6387 = vmatprep.subr.mxu1 %v4316_v36  ;;  %4584 = vmatpush1.msra.mxu0 %v4555_v28  ;;  %v4551_v55 = vld [vmem:[%s7683_s7 + $0x50] sm:$0xff]  ;;  %v4549_v35 = vld [vmem:[%s7683_s7 + $0x40] sm:$0xff]  ;;  %v4548_v36 = vld [vmem:[%s7683_s7 + $0x38] sm:$0xff] }
 0x4a9   : > { %v4177_v22 = vadd.f32 %v6368_v7, %v4128_v6  ;;  %6388 = vmatpush3.msra.mxu1 %v4300_v37  ;;  %v4305_v6 = vld [vmem:[%s8807_s17 + $0x80] sm:$0xff]  ;;  %4585 = vmatprep.subr.mxu0 %v7267_v27  ;;  %v4547_v37 = vld [vmem:[%s7683_s7 + $0x30] sm:$0xff] }
 0x4aa   : > { %6389 = vmatprep.subr.mxu1 %v4315_v39  ;;  %v4289_v7 = vld [vmem:[%s8807_s17] sm:$0xff] }
 0x4ab   : > { %6390 = vmatpush3.msra.mxu1 %v4299_v33  ;;  %v4545_v39 = vld [vmem:[%s7683_s7 + $0x20] sm:$0xff]  ;;  %v4544_v33 = vld [vmem:[%s7683_s7 + $0x18] sm:$0xff] }
 0x4ac   : > { %6391 = vmatprep.subr.mxu1 %v4314_v40  ;;  %v4543_v40 = vld [vmem:[%s7683_s7 + $0x10] sm:$0xff] }
 0x4ad   : > { %6392 = vmatpush3.msra.mxu1 %v4298_v46  ;;  %v4542_v46 = vld [vmem:[%s7683_s7 + $0x8] sm:$0xff] }
 0x4ae   : > { %6393 = vmatprep.subr.mxu1 %v4313_v41  ;;  %v4541_v41 = vld [vmem:[%s7683_s7] sm:$0xff] }
 0x4af   : > { %6394 = vmatpush3.msra.mxu1 %v4297_v42  ;;  %v4568_v42 = vld [vmem:[%s7683_s7 + $0xd8] sm:$0xff] }
 0x4b0   : > { %6395 = vmatprep.subr.mxu1 %v4312_v32  ;;  %v4567_v32 = vld [vmem:[%s7683_s7 + $0xd0] sm:$0xff] }
 0x4b1   : > { %6396 = vmatpush3.msra.mxu1 %v4296_v44  ;;  %v4566_v44 = vld [vmem:[%s7683_s7 + $0xc8] sm:$0xff] }
 0x4b2   : > { %6397 = vmatprep.subr.mxu1 %v4311_v47  ;;  %v4565_v47 = vld [vmem:[%s7683_s7 + $0xc0] sm:$0xff] }
 0x4b3   : > { %6398 = vmatpush3.msra.mxu1 %v4295_v48  ;;  %v4564_v48 = vld [vmem:[%s7683_s7 + $0xb8] sm:$0xff] }
 0x4b4   : > { %6399 = vmatprep.subr.mxu1 %v4310_v49 }
 0x4b5   : > { %6400 = vmatpush3.msra.mxu1 %v4294_v50 }
 0x4b6   : > { %6401 = vmatprep.subr.mxu1 %v4309_v51 }
 0x4b7   : > { %v6571_v11 = vpop.f32.mrf.mxu0  ;;  %6402 = vmatpush3.msra.mxu1 %v4293_v57 }
 0x4b8   : > { %v8168_v14 = vadd.f32 %v6571_v11, %v4174_v9  ;;  %6403 = vmatprep.subr.mxu1 %v4308_v62  ;;  %v4563_v62 = vld [vmem:[%s7683_s7 + $0xb0] sm:$0xff] }
 0x4b9   : > { %v4214_v8 = vpop.f32.mrf.mxu0  ;;  %6404 = vmatpush3.msra.mxu1 %v4292_v0 }
 0x4ba   : > { %v8170_v10 = vadd.f32 %v4214_v8, %v4166_v15  ;;  %4237 = vrot.lane.b32.xlu1 %v8168_v14, %s7264_s1  ;;  %6405 = vmatprep.subr.mxu1 %v4307_v2 }
 0x4bb   : > { %v6572_v16 = vpop.f32.mrf.mxu0  ;;  %6406 = vmatpush3.msra.mxu1 %v4291_v1  ;;  %v4562_v1 = vld [vmem:[%s7683_s7 + $0xa8] sm:$0xff] }
 0x4bc   : > { %v8173_v17 = vadd.f32 %v6572_v16, %v4177_v22  ;;  %4233 = vrot.lane.b32.xlu0 %v8170_v10, %s7264_s1  ;;  %6407 = vmatprep.subr.mxu1 %v4306_v5 }
 0x4bd   : > { %v4217_v19 = vpop.f32.mrf.mxu0  ;;  %6408 = vmatpush3.msra.mxu1 %v4290_v4  ;;  %v4561_v4 = vld [vmem:[%s7683_s7 + $0xa0] sm:$0xff] }
 0x4be   : > { %v8176_v60 = vadd.f32 %v4217_v19, %v4169_v59  ;;  %4239 = vrot.lane.b32.xlu1 %v8173_v17, %s7264_s1  ;;  %6409 = vmatprep.subr.mxu1 %v4305_v6 }
 0x4bf   : > { %6410 = vmatpush3.msra.mxu1 %v4289_v7  ;;  %v4560_v7 = vld [vmem:[%s7683_s7 + $0x98] sm:$0xff] }
 0x4c0   : > { %4235 = vrot.lane.b32.xlu0 %v8176_v60, %s7264_s1 }
 0x52c   : > { %v4238_v18 = vpop.permute.xlu1 %4237 }
 0x52d   : > { %v8203_v30 = vmax.f32 %v8168_v14, %v4238_v18 }
 0x52e   : > { %v4234_v31 = vpop.permute.xlu0 %4233 }
 0x52f   : > { %v8190_v25 = vmax.f32 %v8170_v10, %v4234_v31 }
 0x530   : > { %v4240_v34 = vpop.permute.xlu1 %4239 }
 0x531   : > { %4253 = vrot.lane.b32.xlu0 %v8190_v25, %s7265_s21  ;;  %v4248_v38 = vmax.f32 %v8173_v17, %v4240_v34  ;;  %v4550_v34 = vld [vmem:[%s7683_s7 + $0x48] sm:$0xff] }
 0x532   : > { %v4236_v29 = vpop.permute.xlu0 %4235 }
 0x533   : > { %v8206_v24 = vmax.f32 %v8176_v60, %v4236_v29  ;;  %v4554_v29 = vld [vmem:[%s7683_s7 + $0x68] sm:$0xff] }
 0x534   : > { %4586 = vmatpush1.msra.mxu0 %v4554_v29 }
 0x535   : > { %4257 = vrot.lane.b32.xlu0 %v8203_v30, %s7265_s21  ;;  %4255 = vrot.lane.b32.xlu1 %v8206_v24, %s7265_s21 }
 0x536   : > { %4587 = vmatprep.subr.mxu0 %v7267_v27 }
 0x539   : > { %4259 = vrot.lane.b32.xlu1 %v4248_v38, %s7265_s21 }
 0x5a3   : > { %v4254_v9 = vpop.permute.xlu0 %4253 }
 0x5a4   : > { %v4265_v11 = vmax.f32 %v8190_v25, %v4254_v9 }
 0x5a6   : > { %4273 = vrot.lane.b32.xlu0 %v4265_v11, %s7266_s18 }
 0x5a7   : > { %v4256_v12 = vpop.permute.xlu1 %4255  ;;  %v4258_v13 = vpop.permute.xlu0 %4257 }
 0x5a8   : > { %v4266_v15 = vmax.f32 %v8206_v24, %v4256_v12  ;;  %v4267_v8 = vmax.f32 %v8203_v30, %v4258_v13  ;;  %v4553_v30 = vld [vmem:[%s7683_s7 + $0x60] sm:$0xff]  ;;  %v4552_v24 = vld [vmem:[%s7683_s7 + $0x58] sm:$0xff]  ;;  %v4559_v12 = vld [vmem:[%s7683_s7 + $0x90] sm:$0xff] }
 0x5a9   : > { %4588 = vmatpush1.msra.mxu0 %v4553_v30 }
 0x5aa   : > { %4275 = vrot.lane.b32.xlu1 %v4266_v15, %s7266_s18  ;;  %4277 = vrot.lane.b32.xlu0 %v4267_v8, %s7266_s18 }
 0x5ab   : > { %v4260_v22 = vpop.permute.xlu1 %4259  ;;  %4589 = vmatprep.subr.mxu0 %v7267_v27 }
 0x5ac   : > { %v4268_v16 = vmax.f32 %v4248_v38, %v4260_v22  ;;  %4590 = vmatpush1.msra.mxu0 %v4552_v24  ;;  %v4546_v38 = vld [vmem:[%s7683_s7 + $0x28] sm:$0xff]  ;;  %v4557_v22 = vld [vmem:[%s7683_s7 + $0x80] sm:$0xff] }
 0x5ad   : > { %4591 = vmatprep.subr.mxu0 %v7267_v27 }
 0x5ae   : > { %4279 = vrot.lane.b32.xlu1 %v4268_v16, %s7266_s18  ;;  %4592 = vmatpush1.msra.mxu0 %v4551_v55 }
 0x5af   : > { %4593 = vmatprep.subr.mxu0 %v7267_v27 }
 0x5b0   : > { %4594 = vmatpush1.msra.mxu0 %v4550_v34 }
 0x5b1   : > { %4595 = vmatprep.subr.mxu0 %v7267_v27 }
 0x5b2   : > { %4596 = vmatpush1.msra.mxu0 %v4549_v35 }
 0x5b3   : > { %4597 = vmatprep.subr.mxu0 %v7267_v27 }
 0x5b4   : > { %4598 = vmatpush1.msra.mxu0 %v4548_v36 }
 0x5b5   : > { %4599 = vmatprep.subr.mxu0 %v7267_v27 }
 0x5b6   : > { %4600 = vmatpush1.msra.mxu0 %v4547_v37 }
 0x5b7   : > { %4601 = vmatprep.subr.mxu0 %v7267_v27 }
 0x5b8   : > { %4602 = vmatpush1.msra.mxu0 %v4546_v38 }
 0x5b9   : > { %4603 = vmatprep.subr.mxu0 %v7267_v27 }
 0x5ba   : > { %4604 = vmatpush1.msra.mxu0 %v4545_v39 }
 0x5bb   : > { %4605 = vmatprep.subr.mxu0 %v7267_v27 }
 0x5bc   : > { %4606 = vmatpush1.msra.mxu0 %v4544_v33 }
 0x5bd   : > { %4607 = vmatprep.subr.mxu0 %v7267_v27 }
 0x5be   : > { %4608 = vmatpush1.msra.mxu0 %v4543_v40 }
 0x5bf   : > { %4609 = vmatprep.subr.mxu0 %v7267_v27 }
 0x5c0   : > { %4610 = vmatpush1.msra.mxu0 %v4542_v46 }
 0x5c1   : > { %4611 = vmatprep.subr.mxu0 %v7267_v27 }
 0x5c2   : > { %4612 = vmatpush1.msra.mxu0 %v4541_v41 }
 0x5c3   : > { %4621 = vmatprep.subr.mxu0 %v7267_v27 }
 0x5c4   : > { %4622 = vmatpush2.msra.mxu0 %v4568_v42 }
 0x5c5   : > { %4623 = vmatprep.subr.mxu0 %v7267_v27 }
 0x5c6   : > { %4624 = vmatpush2.msra.mxu0 %v4567_v32 }
 0x5c7   : > { %4625 = vmatprep.subr.mxu0 %v7267_v27 }
 0x5c8   : > { %4626 = vmatpush2.msra.mxu0 %v4566_v44 }
 0x5c9   : > { %4627 = vmatprep.subr.mxu0 %v7267_v27 }
 0x5ca   : > { %4628 = vmatpush2.msra.mxu0 %v4565_v47 }
 0x5cb   : > { %4629 = vmatprep.subr.mxu0 %v7267_v27 }
 0x5cc   : > { %4630 = vmatpush2.msra.mxu0 %v4564_v48 }
 0x5cd   : > { %4631 = vmatprep.subr.mxu0 %v7267_v27 }
 0x5ce   : > { %4632 = vmatpush2.msra.mxu0 %v4563_v62 }
 0x5cf   : > { %4633 = vmatprep.subr.mxu0 %v7267_v27 }
 0x5d0   : > { %4634 = vmatpush2.msra.mxu0 %v4562_v1 }
 0x5d1   : > { %4635 = vmatprep.subr.mxu0 %v7267_v27 }
 0x5d2   : > { %4636 = vmatpush2.msra.mxu0 %v4561_v4 }
 0x5d3   : > { %4637 = vmatprep.subr.mxu0 %v7267_v27 }
 0x5d4   : > { %4638 = vmatpush2.msra.mxu0 %v4560_v7 }
 0x5d5   : > { %4639 = vmatprep.subr.mxu0 %v7267_v27 }
 0x5d6   : > { %4640 = vmatpush2.msra.mxu0 %v4559_v12 }
 0x5d7   : > { %4641 = vmatprep.subr.mxu0 %v7267_v27 }
 0x618   : > { %v4274_v59 = vpop.permute.xlu0 %4273 }
 0x619   : > { %v4285_v19 = vmax.f32 %v4265_v11, %v4274_v59 }
 0x61b   : > { %4385 = vmatprep.mubr.f32.mxu1 %v4285_v19 }
 0x61c   : > { %v4276_v18 = vpop.permute.xlu1 %4275  ;;  %4386 = vmatmul.mubr.f32.vlgmr.msra.gmra.mxu1 %v8170_v10  ;;  %v4278_v31 = vpop.permute.xlu0 %4277 }
 0x61d   : > { %v4286_v20 = vmax.f32 %v4266_v15, %v4276_v18  ;;  %v4287_v21 = vmax.f32 %v4267_v8, %v4278_v31  ;;  %v4558_v15 = vld [vmem:[%s7683_s7 + $0x88] sm:$0xff]  ;;  %s7270_s7 = smov 96  }
 0x61e   : > { %4642 = vmatpush2.msra.mxu0 %v4558_v15 }
 0x61f   : > { %4390 = vmatprep.mubr.f32.mxu1 %v4286_v20  ;;  %4643 = vmatprep.subr.mxu0 %v7267_v27 }
 0x620   : > { %v4280_v23 = vpop.permute.xlu1 %4279  ;;  %4391 = vmatmul.mubr.f32.gmra.mxu1 %v8176_v60  ;;  %4644 = vmatpush2.msra.mxu0 %v4557_v22 }
 0x621   : > { %4395 = vmatprep.mubr.f32.mxu1 %v4287_v21  ;;  %v4288_v25 = vmax.f32 %v4268_v16, %v4280_v23 }
 0x624   : > { %4396 = vmatmul.mubr.f32.gmra.mxu1 %v8168_v14 }
 0x625   : > { %4400 = vmatprep.mubr.f32.mxu1 %v4288_v25 }
 0x628   : > { %4401 = vmatmul.mubr.f32.gmra.mxu1 %v8173_v17 }
 0x6dc   : > { %v6411_v49 = vpop.f32.mrf.mxu1 }
 0x6de   : > { %v6412_v50 = vpop.f32.mrf.mxu1 }
 0x6df   : > { %v6413_v51 = vadd.f32 %v6412_v50, %v6411_v49 }
 0x6e0   : > { %v6414_v57 = vpop.f32.mrf.mxu1 }
 0x6e1   : > { %4407 = vst.msk [vmem:[#allocation3 + $0x3] sm:$0xff] %vm4406_vm13, %v6413_v51 }
 0x6e2   : > { %v6415_v0 = vpop.f32.mrf.mxu1 }
 0x6e3   : > { %v6416_v2 = vadd.f32 %v6415_v0, %v6414_v57 }
 0x6e4   : > { %v6417_v5 = vpop.f32.mrf.mxu1 }
 0x6e5   : > { %4408 = vst.msk [vmem:[#allocation3 + $0xb] sm:$0xff] %vm4406_vm13, %v6416_v2 }
 0x6e6   : > { %v6418_v6 = vpop.f32.mrf.mxu1 }
 0x6e7   : > { %v6419_v9 = vadd.f32 %v6418_v6, %v6417_v5 }
 0x6e8   : > { %v6420_v11 = vpop.f32.mrf.mxu1  ;;  %v4415_v59 = vld [vmem:[#allocation3 + $0x1] sm:$0xff] }
 0x6e9   : > { %4409 = vst.msk [vmem:[#allocation3 + $0x1b] sm:$0xff] %vm4406_vm13, %v6419_v9  ;;  %v4419_v21 = vld [vmem:[#allocation3 + $0x2] sm:$0xff] }
 0x6ea   : > { %v6421_v13 = vpop.f32.mrf.mxu1  ;;  %v4423_v28 = vld [vmem:[#allocation3 + $0x3] sm:$0xff] }
 0x6eb   : > { %v6422_v8 = vadd.f32 %v6421_v13, %v6420_v11  ;;  %v4411_v0 = vld [vmem:[#allocation3] sm:$0xff] }
 0x6ec   : > { %v4431_v16 = vld [vmem:[#allocation3 + $0x5] sm:$0xff]  ;;  %v4432_v26 = vld [vmem:[#allocation3 + $0xd] sm:$0xff] }
 0x6ed   : > { %v4416_v19 = vld [vmem:[#allocation3 + $0x9] sm:$0xff]  ;;  %4410 = vst.msk [vmem:[#allocation3 + $0x23] sm:$0xff] %vm4406_vm13, %v6422_v8  ;;  %4491 = vrot.lane.b32.xlu1 %v4431_v16, %s7268_s5 }
 0x6ee   : > { %v6739_v18 = vpack.i.bf16 %v4416_v19, %v4415_v59  ;;  %v4420_v31 = vld [vmem:[#allocation3 + $0xa] sm:$0xff] }
 0x6ef   : > { %v4435_v20 = vld [vmem:[#allocation3 + $0x6] sm:$0xff]  ;;  %v6744_v23 = vpack.i.bf16 %v4420_v31, %v4419_v21  ;;  %v4436_v55 = vld [vmem:[#allocation3 + $0xe] sm:$0xff] }
 0x6f0   : > { %6740 = vrot.lane.b32.xlu0 %v6739_v18, %s7268_s5  ;;  %v4424_v25 = vld [vmem:[#allocation3 + $0xb] sm:$0xff]  ;;  %v4425_v30 = vld [vmem:[#allocation3 + $0x1b] sm:$0xff] }
 0x6f1   : > { %4507 = vrot.lane.b32.xlu1 %v4435_v20, %s7269_s24  ;;  %v6749_v29 = vpack.i.bf16 %v4424_v25, %v4423_v28  ;;  %v4417_v34 = vld [vmem:[#allocation3 + $0x19] sm:$0xff]  ;;  %v4427_v44 = vld [vmem:[#allocation3 + $0x4] sm:$0xff]  ;;  %v4428_v11 = vld [vmem:[#allocation3 + $0xc] sm:$0xff] }
 0x6f2   : > { %v4421_v38 = vld [vmem:[#allocation3 + $0x1a] sm:$0xff]  ;;  %v4412_v22 = vld [vmem:[#allocation3 + $0x8] sm:$0xff] }
 0x6f3   : > { %v4413_v28 = vld [vmem:[#allocation3 + $0x18] sm:$0xff] }
 0x6f4   : > { %6745 = vrot.lane.b32.xlu0 %v6744_v23, %s7269_s24  ;;  %v4418_v24 = vld [vmem:[#allocation3 + $0x21] sm:$0xff] }
 0x6f5   : > { %4493 = vrot.lane.b32.xlu1 %v4432_v26, %s7268_s5  ;;  %v6754_v35 = vpack.i.bf16 %v4418_v24, %v4417_v34  ;;  %v4422_v36 = vld [vmem:[#allocation3 + $0x22] sm:$0xff] }
 0x6f6   : > { %v4433_v37 = vld [vmem:[#allocation3 + $0x1d] sm:$0xff]  ;;  %v6759_v39 = vpack.i.bf16 %v4422_v36, %v4421_v38  ;;  %v4438_v40 = vld [vmem:[#allocation3 + $0x26] sm:$0xff] }
 0x6f7   : > { %v4437_v33 = vld [vmem:[#allocation3 + $0x1e] sm:$0xff] }
 0x6f8   : > { %6750 = vrot.lane.b32.xlu0 %v6749_v29, %s7270_s7  ;;  %v4434_v46 = vld [vmem:[#allocation3 + $0x25] sm:$0xff]  ;;  %v4429_v25 = vld [vmem:[#allocation3 + $0x1c] sm:$0xff] }
 0x6f9   : > { %4479 = vrot.lane.b32.xlu1 %v4425_v30, %s7270_s7  ;;  %v4426_v41 = vld [vmem:[#allocation3 + $0x23] sm:$0xff] }
 0x6fa   : > { %v4430_v38 = vld [vmem:[#allocation3 + $0x24] sm:$0xff] }
 0x6fc   : > { %4509 = vrot.lane.b32.xlu0 %v4436_v55, %s7269_s24 }
 0x6fd   : > { %6755 = vrot.lane.b32.xlu1 %v6754_v35, %s7268_s5 }
 0x700   : > { %4495 = vrot.lane.b32.xlu0 %v4433_v37, %s7268_s5 }
 0x701   : > { %6760 = vrot.lane.b32.xlu1 %v6759_v39, %s7269_s24 }
 0x704   : > { %4511 = vrot.lane.b32.xlu0 %v4437_v33, %s7269_s24 }
 0x705   : > { %4513 = vrot.lane.b32.xlu1 %v4438_v40, %s7269_s24 }
 0x708   : > { %4497 = vrot.lane.b32.xlu0 %v4434_v46, %s7268_s5 }
 0x70c   : > { %4481 = vrot.lane.b32.xlu0 %v4426_v41, %s7270_s7  ;;  %v4414_v41 = vld [vmem:[#allocation3 + $0x20] sm:$0xff] }
 0x75f   : > { %v4492_v42 = vpop.permute.xlu1 %4491 }
 0x760   : > { %v4533_v47 = vsel %vm4406_vm13, %v4427_v44, %v4492_v42 }
 0x762   : > { %v6741_v32 = vpop.permute.xlu0 %6740 }
 0x763   : > { %v4508_v48 = vpop.permute.xlu1 %4507  ;;  %v6742_v51 = vunpack.i.l.bf16 %v6741_v32  ;;  %v6743_v1 = vunpack.i.h.bf16 %v6741_v32 }
 0x764   : > { %v4537_v49 = vsel %vm4523_vm14, %v4533_v47, %v4508_v48  ;;  %v4691_v48 = vld [vmem:[%s8808_s20 + $0x8] sm:$0xff] }
 0x765   : > { %6096 = vmatprep.mubr.msk.f32.mxu0 %vm4528_vm15, %v4537_v49  ;;  %v4519_v5 = vsel %vm4406_vm13, %v4411_v0, %v6742_v51  ;;  %v4520_v59 = vsel %vm4406_vm13, %v4412_v22, %v6743_v1  ;;  %6573 = vmatprep.subr.mxu1 %v4691_v48  ;;  %v4690_v49 = vld [vmem:[%s8808_s20] sm:$0xff] }
 0x766   : > { %v6746_v50 = vpop.permute.xlu0 %6745  ;;  %6574 = vmatpush3.msra.mxu1 %v4691_v48 }
 0x767   : > { %v6747_v57 = vunpack.i.l.bf16 %v6746_v50  ;;  %v4494_v62 = vpop.permute.xlu1 %4493  ;;  %v6748_v6 = vunpack.i.h.bf16 %v6746_v50  ;;  %6575 = vmatprep.subr.mxu1 %v4690_v49 }
 0x768   : > { %v4534_v15 = vsel %vm4406_vm13, %v4428_v11, %v4494_v62  ;;  %6576 = vmatpush3.msra.mxu1 %v4690_v49 }
 0x769   : > { %v4524_v9 = vsel %vm4523_vm14, %v4519_v5, %v6747_v57  ;;  %v4525_v18 = vsel %vm4523_vm14, %v4520_v59, %v6748_v6  ;;  %6583 = vmatprep.subr.mxu1 %v7267_v27 }
 0x76a   : > { %v6751_v2 = vpop.permute.xlu0 %6750 }
 0x76b   : > { %v6752_v4 = vunpack.i.l.bf16 %v6751_v2  ;;  %v4480_v7 = vpop.permute.xlu1 %4479  ;;  %v6753_v12 = vunpack.i.h.bf16 %v6751_v2 }
 0x76d   : > { %v4529_v13 = vsel %vm4528_vm15, %v4524_v9, %v6752_v4  ;;  %v4530_v31 = vsel %vm4528_vm15, %v4525_v18, %v6753_v12 }
 0x76e   : > { %v4510_v8 = vpop.permute.xlu0 %4509  ;;  %4646 = vmatmul.mubr.f32.vlgmr.msra.gmra.mxu0 %v4529_v13 }
 0x76f   : > { %v4538_v16 = vsel %vm4523_vm14, %v4534_v15, %v4510_v8  ;;  %v6756_v19 = vpop.permute.xlu1 %6755 }
 0x770   : > { %6097 = vmatprep.mubr.msk.f32.mxu0 %vm4528_vm15, %v4538_v16  ;;  %v6757_v20 = vunpack.i.l.bf16 %v6756_v19  ;;  %v6758_v36 = vunpack.i.h.bf16 %v6756_v19 }
 0x772   : > { %v4496_v21 = vpop.permute.xlu0 %4495  ;;  %4651 = vmatmul.mubr.f32.gmra.mxu0 %v4530_v31  ;;  %v4521_v24 = vsel %vm4406_vm13, %v4413_v28, %v6757_v20  ;;  %v4522_v42 = vsel %vm4406_vm13, %v4414_v41, %v6758_v36  ;;  %v4823_v28 = vld [vmem:[%s8809_s23 + $0x58] sm:$0xff]  ;;  %v4816_v36 = vld [vmem:[%s8809_s23 + $0x20] sm:$0xff] }
 0x773   : > { %v6761_v23 = vpop.permute.xlu1 %6760  ;;  %v4535_v29 = vsel %vm4406_vm13, %v4429_v25, %v4496_v21  ;;  %v4827_v21 = vld [vmem:[%s8809_s23 + $0x78] sm:$0xff]  ;;  %v4825_v25 = vld [vmem:[%s8809_s23 + $0x68] sm:$0xff] }
 0x774   : > { %v6762_v26 = vunpack.i.l.bf16 %v6761_v23  ;;  %v6763_v37 = vunpack.i.h.bf16 %v6761_v23  ;;  %v4826_v23 = vld [vmem:[%s8809_s23 + $0x70] sm:$0xff] }
 0x776   : > { %v4512_v30 = vpop.permute.xlu0 %4511  ;;  %v4526_v34 = vsel %vm4523_vm14, %v4521_v24, %v6762_v26  ;;  %v4527_v44 = vsel %vm4523_vm14, %v4522_v42, %v6763_v37  ;;  %v4824_v26 = vld [vmem:[%s8809_s23 + $0x60] sm:$0xff]  ;;  %v4815_v37 = vld [vmem:[%s8809_s23 + $0x18] sm:$0xff]  ;;  %v8464_v42 = vadd.f32 %v8155_v43, %v7872_v45  ;;  %v8486_v43 = vadd.f32 %v8161_v3, %v7881_v61 }
 0x777   : > { %v4539_v55 = vsel %vm4523_vm14, %v4535_v29, %v4512_v30  ;;  %v4531_v35 = vsel %vm4528_vm15, %v4526_v34, %v4480_v7  ;;  %v4514_v33 = vpop.permute.xlu1 %4513  ;;  %v4822_v29 = vld [vmem:[%s8809_s23 + $0x50] sm:$0xff]  ;;  %v4821_v30 = vld [vmem:[%s8809_s23 + $0x48] sm:$0xff]  ;;  %v4820_v24 = vld [vmem:[%s8809_s23 + $0x40] sm:$0xff] }
 0x778   : > { %6098 = vmatprep.mubr.msk.f32.mxu0 %vm4528_vm15, %v4539_v55  ;;  %v4819_v55 = vld [vmem:[%s8809_s23 + $0x38] sm:$0xff]  ;;  %v4818_v34 = vld [vmem:[%s8809_s23 + $0x30] sm:$0xff] }
 0x779   : > { %4656 = vmatmul.mubr.f32.gmra.mxu0 %v4531_v35  ;;  %v4817_v35 = vld [vmem:[%s8809_s23 + $0x28] sm:$0xff] }
 0x77a   : > { %v4498_v39 = vpop.permute.xlu0 %4497 }
 0x77b   : > { %v4536_v40 = vsel %vm4406_vm13, %v4430_v38, %v4498_v39  ;;  %v4814_v38 = vld [vmem:[%s8809_s23 + $0x10] sm:$0xff]  ;;  %v4813_v39 = vld [vmem:[%s8809_s23 + $0x8] sm:$0xff] }
 0x77c   : > { %v4540_v46 = vsel %vm4523_vm14, %v4536_v40, %v4514_v33  ;;  %v4812_v33 = vld [vmem:[%s8809_s23] sm:$0xff] }
 0x77d   : > { %6099 = vmatprep.mubr.msk.f32.mxu0 %vm4528_vm15, %v4540_v46 }
 0x77e   : > { %v4482_v32 = vpop.permute.xlu0 %4481 }
 0x77f   : > { %v4532_v47 = vsel %vm4528_vm15, %v4527_v44, %v4482_v32  ;;  %v8468_v32 = vadd.f32 %v8157_v58, %v7875_v54  ;;  %v8482_v54 = vadd.f32 %v8159_v63, %v7877_v56 }
 0x780   : > { %4661 = vmatmul.mubr.f32.gmra.mxu0 %v4532_v47 }
 0x82e   : > { %v4647_v50 = vpop.f32.mrf.mxu0 }
 0x82f   : > { %v6100_v51 = vmul.f32 -1.442695, %v4647_v50 }
 0x830   : > { %v4649_v57 = vpop.f32.mrf.mxu0 }
 0x831   : > { %7052 = vpow2.f32 %v6100_v51 }
 0x832   : > { %v4652_v62 = vpop.f32.mrf.mxu0 }
 0x833   : > { %v6101_v0 = vmul.f32 -1.442695, %v4652_v62 }
 0x834   : > { %v4654_v2 = vpop.f32.mrf.mxu0 }
 0x835   : > { %7054 = vpow2.f32 %v6101_v0 }
 0x839   : > { %v4657_v1 = vpop.f32.mrf.mxu0 }
 0x83a   : > { %v6102_v5 = vmul.f32 -1.442695, %v4657_v1 }
 0x83b   : > { %v4659_v4 = vpop.f32.mrf.mxu0 }
 0x83c   : > { %7056 = vpow2.f32 %v6102_v5 }
 0x83e   : > { %v7053_v6 = vpop.eup %7052 }
 0x83f   : > { %v4678_v7 = vadd.f32 1.0, %v7053_v6  ;;  %v4903_v6 = vld [vmem:[%s7674_s9] sm:$0xff] }
 0x840   : > { %v4662_v9 = vpop.f32.mrf.mxu0 }
 0x841   : > { %7058 = vrcp.f32 %v4678_v7  ;;  %v6103_v11 = vmul.f32 -1.442695, %v4662_v9  ;;  %v4988_v9 = vld [vmem:[%s7689_s3 + $0x18] sm:$0xff] }
 0x842   : > { %v7055_v12 = vpop.eup %7054  ;;  %v4664_v13 = vpop.f32.mrf.mxu0 }
 0x843   : > { %v4679_v15 = vadd.f32 1.0, %v7055_v12  ;;  %7060 = vpow2.f32 %v6103_v11  ;;  %v4987_v12 = vld [vmem:[%s7689_s3 + $0x10] sm:$0xff] }
 0x845   : > { %7062 = vrcp.f32 %v4679_v15  ;;  %v4986_v15 = vld [vmem:[%s7689_s3 + $0x8] sm:$0xff] }
 0x849   : > { %v7057_v8 = vpop.eup %7056 }
 0x84a   : > { %v4680_v22 = vadd.f32 1.0, %v7057_v8  ;;  %v4985_v8 = vld [vmem:[%s7689_s3] sm:$0xff] }
 0x84c   : > { %7064 = vrcp.f32 %v4680_v22  ;;  %v6108_v22 = vld [vmem:[%s1057_s30] ss:$0 sm:$0xff] }
 0x84e   : > { %v7059_v16 = vpop.eup %7058 }
 0x84f   : > { %6577 = vmatprep.mubr.msk.f32.mxu1 %vm4692_vm0, %v7059_v16 }
 0x850   : > { %v7061_v59 = vpop.eup %7060 }
 0x851   : > { %v4681_v19 = vadd.f32 1.0, %v7061_v59 }
 0x852   : > { %v7063_v18 = vpop.eup %7062 }
 0x853   : > { %7066 = vrcp.f32 %v4681_v19  ;;  %6578 = vmatmul.mubr.msk.f32.vlgmr.msra.gmra.mxu1 %vm4692_vm0, %v7063_v18  ;;  %v6110_v18 = vld [vmem:[%s1065_s4] ss:$0 sm:$0xff] }
 0x854   : > { %6584 = vmatpush3.msra.mxu1 %v4827_v21 }
 0x855   : > { %6585 = vmatprep.subr.mxu1 %v7267_v27 }
 0x856   : > { %6586 = vmatpush3.msra.mxu1 %v4826_v23  ;;  %v5080_v23 = vld [vmem:[%s8811_s26] sm:$0xff]  ;;  %s8813_s26 = sld [smem:[#allocation37_spill]] (!%p6114_p11) }
 0x857   : > { %6587 = vmatprep.subr.mxu1 %v7267_v27 }
 0x858   : > { %6588 = vmatpush3.msra.mxu1 %v4825_v25 }
 0x859   : > { %v7065_v31 = vpop.eup %7064  ;;  %6589 = vmatprep.subr.mxu1 %v7267_v27 }
 0x85a   : > { %6580 = vmatprep.mubr.msk.f32.mxu1 %vm4692_vm0, %v7065_v31  ;;  %6590 = vmatpush3.msra.mxu1 %v4824_v26 }
 0x85b   : > { %6591 = vmatprep.subr.mxu1 %v7267_v27 }
 0x85c   : > { %6592 = vmatpush3.msra.mxu1 %v4823_v28 }
 0x85d   : > { %6593 = vmatprep.subr.mxu1 %v7267_v27 }
 0x85e   : > { %6594 = vmatpush3.msra.mxu1 %v4822_v29 }
 0x85f   : > { %6595 = vmatprep.subr.mxu1 %v7267_v27 }
 0x860   : > { %v7067_v20 = vpop.eup %7066  ;;  %6596 = vmatpush3.msra.mxu1 %v4821_v30 }
 0x861   : > { %6581 = vmatmul.mubr.msk.f32.gmra.mxu1 %vm4692_vm0, %v7067_v20  ;;  %6597 = vmatprep.subr.mxu1 %v7267_v27 }
 0x862   : > { %6598 = vmatpush3.msra.mxu1 %v4820_v24  ;;  %6615 = vmatprep.mubr.msk.f32.mxu1 %vm7271_vm1, %v7267_v27  ;;  %v7273_v24 = vmov 1966171168  }
 0x863   : > { %6599 = vmatprep.subr.mxu1 %v7267_v27 }
 0x864   : > { %6600 = vmatpush3.msra.mxu1 %v4819_v55  ;;  %v5156_v55 = vunpack.c.l.s4 %v7273_v24 }
 0x865   : > { %6601 = vmatprep.subr.mxu1 %v7267_v27 }
 0x866   : > { %6602 = vmatpush3.msra.mxu1 %v4818_v34  ;;  %v5157_v34 = vunpack.c.0.s8 %v5156_v55 }
 0x867   : > { %6603 = vmatprep.subr.mxu1 %v7267_v27 }
 0x868   : > { %6604 = vmatpush3.msra.mxu1 %v4817_v35  ;;  %v5160_v35 = vsub.s32 %v5157_v34, %v7989_v52 }
 0x869   : > { %6605 = vmatprep.subr.mxu1 %v7267_v27 }
 0x86a   : > { %6606 = vmatpush3.msra.mxu1 %v4816_v36 }
 0x86b   : > { %6607 = vmatprep.subr.mxu1 %v7267_v27 }
 0x86c   : > { %6608 = vmatpush3.msra.mxu1 %v4815_v37 }
 0x86d   : > { %6609 = vmatprep.subr.mxu1 %v7267_v27 }
 0x86e   : > { %6610 = vmatpush3.msra.mxu1 %v4814_v38 }
 0x86f   : > { %6611 = vmatprep.subr.mxu1 %v7267_v27 }
 0x870   : > { %6612 = vmatpush3.msra.mxu1 %v4813_v39 }
 0x871   : > { %6613 = vmatprep.subr.mxu1 %v7267_v27 }
 0x872   : > { %6614 = vmatpush3.msra.mxu1 %v4812_v33 }
 0x873   : > { %6618 = vmatprep.subr.mxu1 %v7267_v27 }
 0x913   : > { %v6579_v40 = vpop.f32.mrf.mxu1 }
 0x914   : > { %v8460_v46 = vmul.f32 %v6579_v40, %v8176_v60 }
 0x915   : > { %v4771_v41 = vpop.f32.mrf.mxu1 }
 0x916   : > { %v8471_v44 = vmul.f32 %v4771_v41, %v8170_v10  ;;  %v4795_v47 = vadd.f32 %v8460_v46, %v8468_v32  ;;  %v5188_v40 = vsub.f32 %v8468_v32, %v8460_v46 }
 0x918   : > { %v4794_v48 = vadd.f32 %v8471_v44, %v8464_v42  ;;  %v5187_v41 = vsub.f32 %v8464_v42, %v8471_v44 }
 0x91a   : > { %v4798_v60 = vadd.f32 %v4795_v47, %v4794_v48 }
 0x91c   : > { %v4799_v49 = vrot.slane %v4798_v60, 4 }
 0x91e   : > { %v4800_v58 = vadd.f32 %v4799_v49, %v4798_v60 }
 0x920   : > { %v4801_v62 = vrot.slane %v4800_v58, 2 }
 0x921   : > { %v6582_v50 = vpop.f32.mrf.mxu1 }
 0x922   : > { %v8478_v51 = vmul.f32 %v6582_v50, %v8173_v17  ;;  %v4802_v56 = vadd.f32 %v4801_v62, %v4800_v58 }
 0x923   : > { %v4781_v45 = vpop.f32.mrf.mxu1 }
 0x924   : > { %v8489_v10 = vmul.f32 %v4781_v45, %v8168_v14  ;;  %v4797_v57 = vadd.f32 %v8478_v51, %v8486_v43  ;;  %v4803_v3 = vrot.slane %v4802_v56, 1  ;;  %v5190_v60 = vsub.f32 %v8486_v43, %v8478_v51  ;;  %v7072_v43 = vld [vmem:[%s8796_s28] sm:$0xff] }
 0x926   : > { %v4796_v17 = vadd.f32 %v8489_v10, %v8482_v54  ;;  %v4804_v14 = vadd.f32 %v4803_v3, %v4802_v56  ;;  %v5189_v52 = vsub.f32 %v8482_v54, %v8489_v10 }
 0x928   : > { %v4805_v0 = vadd.f32 %v4797_v57, %v4796_v17 }
 0x92a   : > { %v4806_v2 = vrot.slane %v4805_v0, 4 }
 0x92c   : > { %v4807_v63 = vadd.f32 %v4806_v2, %v4805_v0 }
 0x92e   : > { %v4808_v1 = vrot.slane %v4807_v63, 2 }
 0x930   : > { %v4809_v61 = vadd.f32 %v4808_v1, %v4807_v63 }
 0x932   : > { %v4810_v5 = vrot.slane %v4809_v61, 1 }
 0x934   : > { %v4811_v4 = vadd.f32 %v4810_v5, %v4809_v61 }
 0x936   : > { %v4831_v7 = vsel %vm4830_vm5, %v4811_v4, %v4804_v14 }
 0x937   : > { %6616 = vmatmul.mubr.f32.vlgmr.msra.gmra.mxu1 %v4831_v7 }
 0x938   : > { %6619 = vmatpush3.msra.mxu1 %v4903_v6  ;;  %6620 = vmatprep.mubr.msk.f32.mxu1 %vm7271_vm1, %v7267_v27 }
 0x939   : > { %6623 = vmatprep.subr.mxu1 %v7267_v27 }
 0x9f7   : > { %v4899_v11 = vpop.f32.mrf.mxu1 }
 0x9f8   : > { %6621 = vmatmul.mubr.msk.f32.vlgmr.msra.gmra.mxu1 %vm4911_vm6, %v4899_v11 }
 0x9f9   : > { %v6617_v13 = vpop.f32.mrf.mxu1  ;;  %6624 = vmatpush3.msra.mxu1 %v4988_v9  ;;  %6631 = vmatprep.mubr.msk.f32.mxu1 %vm7271_vm1, %v7267_v27 }
 0x9fa   : > { %6625 = vmatprep.subr.mxu1 %v7267_v27 }
 0x9fb   : > { %6626 = vmatpush3.msra.mxu1 %v4987_v12 }
 0x9fc   : > { %6627 = vmatprep.subr.mxu1 %v7267_v27 }
 0x9fd   : > { %6628 = vmatpush3.msra.mxu1 %v4986_v15 }
 0x9fe   : > { %6629 = vmatprep.subr.mxu1 %v7267_v27 }
 0x9ff   : > { %6630 = vmatpush3.msra.mxu1 %v4985_v8 }
 0xa00   : > { %6634 = vmatprep.subr.mxu1 %v7267_v27 }
 0xab8   : > { %v4981_v16 = vpop.f32.mrf.mxu1 }
 0xab9   : > { %v4982_v59 = vadd.f32 %v6108_v22, %v4981_v16 }
 0xaba   : > { %v6622_v19 = vpop.f32.mrf.mxu1 }
 0xabb   : > { %6632 = vmatmul.mubr.msk.f32.vlgmr.msra.gmra.mxu1 %vm4406_vm13, %v4982_v59 }
 0xabc   : > { %6636 = vmatprep.mubr.msk.f32.mxu1 %vm7271_vm1, %v7267_v27  ;;  %6635 = vmatpush3.msra.mxu1 %v5080_v23 }
 0xb7b   : > { %v5065_v31 = vpop.f32.mrf.mxu1 }
 0xb7c   : > { %v5066_v20 = vadd.f32 %v6110_v18, %v5065_v31 }
 0xb7d   : > { %v6633_v21 = vpop.f32.mrf.mxu1 }
 0xb7e   : > { %5070 = vrot.lane.b32.xlu1 %v5066_v20, %s7272_s8  ;;  %s8812_s8 = sld [smem:[#allocation36_spill]] (!%p6114_p11) }
 0xbf0   : > { %v5071_v25 = vpop.permute.xlu1 %5070 }
 0xbf1   : > { %v5073_v26 = vsub.f32 %v5066_v20, %v5071_v25 }
 0xbf3   : > { %v6112_v28 = vmul.f32 -1.442695, %v5073_v26 }
 0xbf5   : > { %7068 = vpow2.f32 %v6112_v28 }
 0xc02   : > { %v7069_v27 = vpop.eup %7068 }
 0xc03   : > { %v5077_v29 = vadd.f32 1.0, %v7069_v27 }
 0xc05   : > { %7070 = vrcp.f32 %v5077_v29 }
 0xc12   : > { %v7071_v30 = vpop.eup %7070 }
 0xc13   : > { %6637 = vmatmul.mubr.msk.f32.vlgmr.msra.gmra.mxu1 %vm4911_vm6, %v7071_v30 }
 0xcd3   : > { %v5150_v36 = vpop.f32.mrf.mxu1 }
 0xcd4   : > { %v5161_v37 = vrot.slane %v5150_v36, %v5160_v35 }
 0xcd5   : > { %v6638_v38 = vpop.f32.mrf.mxu1 }
 0xcd6   : > { %v5162_v39 = vcombine.high %v5161_v37, %v5161_v37  ;;  %v5169_v33 = vrot.slane %v5161_v37, %v5160_v35 }
 0xcd8   : > { %v5176_v47 = vrot.slane %v5162_v39, %v5160_v35  ;;  %v5180_v48 = vrot.slane %v5169_v33, %v7992_v53 }
 0xcda   : > { %v5184_v49 = vrot.slane %v5176_v47, %v7992_v53  ;;  %v5191_v50 = vmul.f32 %v5187_v41, %v5180_v48  ;;  %v5192_v45 = vmul.f32 %v5188_v40, %v5180_v48  ;;  %v7073_v53 = vld [vmem:[%s8796_s28 + $0x8] sm:$0xff] }
 0xcdc   : > { %v5193_v58 = vmul.f32 %v5189_v52, %v5184_v49  ;;  %v5194_v57 = vmul.f32 %v5190_v60, %v5184_v49  ;;  %v5195_v32 = vadd.f32 %v5191_v50, %v8471_v44  ;;  %v5196_v17 = vadd.f32 %v5192_v45, %v8460_v46  ;;  %v7074_v44 = vld [vmem:[%s8796_s28 + $0x10] sm:$0xff]  ;;  %v7075_v46 = vld [vmem:[%s8796_s28 + $0x18] sm:$0xff] }
 0xcde   : > { %v5197_v42 = vadd.f32 %v5193_v58, %v8489_v10  ;;  %v5198_v62 = vadd.f32 %v5194_v57, %v8478_v51  ;;  %v5199_v0 = vadd.f32 %v7072_v43, %v5195_v32  ;;  %v5200_v54 = vadd.f32 %v7073_v53, %v5196_v17  ;;  %5210 = sbr.rel (%p6114_p11) target bundleno = 3548 (0xddc), region = 140 }
 0xce0   : > { %v5201_v2 = vadd.f32 %v7074_v44, %v5197_v42  ;;  %v5202_v51 = vadd.f32 %v7075_v46, %v5198_v62  ;;  %5203 = vst [vmem:[%s8796_s28] sm:$0xff] %v5199_v0  ;;  %5204 = vst [vmem:[%s8796_s28 + $0x8] sm:$0xff] %v5200_v54 }
 0xce2   : > { %5205 = vst [vmem:[%s8796_s28 + $0x10] sm:$0xff] %v5201_v2  ;;  %5206 = vst [vmem:[%s8796_s28 + $0x18] sm:$0xff] %v5202_v51  ;;  %s8814_s28 = sld [smem:[#allocation18_spill]] (!%p6114_p11) }
 0xce3   : > { %v7076_v10 = vld [vmem:[%s8812_s8 + $0x78] sm:$0xff]   ;;  %v5216_v56 = vrot.slane %v5199_v0, 7  ;;  %v5217_v1 = vrot.slane %v5200_v54, 7  ;;  %v7078_v61 = vld [vmem:[%s8812_s8 + $0x70] sm:$0xff]   ;;  %v5219_v3 = vrot.slane %v5201_v2, 7  ;;  %v5220_v4 = vrot.slane %v5202_v51, 7 }
 0xce4   : > { %v7077_v63 = vld [vmem:[%s8812_s8 + $0x38] sm:$0xff]   ;;  %6455 = vmatprep.subr.bf16.mxu0 %v7076_v10  ;;  %v7080_v6 = vld [vmem:[%s8812_s8 + $0x30] sm:$0xff]   ;;  %v7081_v7 = vld [vmem:[%s8812_s8 + $0x68] sm:$0xff]  }
 0xce5   : > { %5228 = vst [vmem:[#allocation2] sm:$0xfe] %v5216_v56  ;;  %6456 = vmatpush3.bf16.msra.mxu0 %v7077_v63  ;;  %v7079_v5 = vld [vmem:[%s8812_s8 + $0xb8] sm:$0xff]   ;;  %v8580_v14 = vsel %vm1115_vm2, %v5216_v56, %v5217_v1  ;;  %5230 = vst [vmem:[#allocation2 + $0x70] sm:$0x1] %v5217_v1  ;;  %v8589_v9 = vsel %vm1115_vm2, %v5219_v3, %v5220_v4  ;;  %v7082_v11 = vld [vmem:[%s8812_s8 + $0xb0] sm:$0xff]  }
 0xce6   : > { %6457 = vmatprep.subr.bf16.mxu0 %v7078_v61  ;;  %5231 = vst [vmem:[#allocation2 + $0x40] sm:$0xfe] %v5219_v3  ;;  %6639 = vmatprep.subr.bf16.mxu1 %v7079_v5  ;;  %5233 = vst [vmem:[#allocation2 + $0x18] sm:$0x1] %v5220_v4  ;;  %v7083_v12 = vld [vmem:[%s8812_s8 + $0x28] sm:$0xff]   ;;  %v7084_v13 = vld [vmem:[%s8812_s8 + $0x60] sm:$0xff]  }
 0xce7   : > { %6640 = vmatpush3.bf16.msra.mxu1 %v7079_v5  ;;  %v7085_v15 = vld [vmem:[%s8812_s8 + $0xa8] sm:$0xff]   ;;  %v7086_v8 = vld [vmem:[%s8812_s8 + $0x20] sm:$0xff]   ;;  %v7087_v22 = vld [vmem:[%s8812_s8 + $0x58] sm:$0xff]   ;;  %v5301_v25 = vrot.slane %v8580_v14, 1  ;;  %v5319_v28 = vrot.slane %v8580_v14, 2  ;;  %v5324_v24 = vrot.slane %v8589_v9, 2 }
 0xce8   : > { %6641 = vmatprep.subr.bf16.mxu1 %v7082_v11  ;;  %v7088_v16 = vld [vmem:[%s8812_s8 + $0xa0] sm:$0xff]   ;;  %v7089_v59 = vld [vmem:[%s8812_s8 + $0x18] sm:$0xff]   ;;  %v7090_v18 = vld [vmem:[%s8812_s8 + $0x50] sm:$0xff]   ;;  %v5306_v33 = vrot.slane %v8589_v9, 1 }
 0xce9   : > { %6458 = vmatpush3.bf16.msra.mxu0 %v7080_v6  ;;  %v7091_v19 = vld [vmem:[%s8812_s8 + $0x98] sm:$0xff]   ;;  %v7092_v31 = vld [vmem:[%s8812_s8 + $0x10] sm:$0xff]   ;;  %v7093_v21 = vld [vmem:[%s8812_s8 + $0x48] sm:$0xff]  }
 0xcea   : > { %6459 = vmatprep.subr.bf16.mxu0 %v7081_v7  ;;  %v7094_v20 = vld [vmem:[%s8812_s8 + $0x90] sm:$0xff]   ;;  %v7095_v23 = vld [vmem:[%s8812_s8 + $0x8] sm:$0xff]   ;;  %v7096_v26 = vld [vmem:[%s8812_s8 + $0x40] sm:$0xff]  }
 0xceb   : > { %6642 = vmatpush3.bf16.msra.mxu1 %v7082_v11  ;;  %v7097_v27 = vld [vmem:[%s8812_s8 + $0x88] sm:$0xff]   ;;  %v7098_v36 = vld [vmem:[%s8812_s8] sm:$0xff]  }
 0xcec   : > { %6643 = vmatprep.subr.bf16.mxu1 %v7085_v15  ;;  %v5286_v29 = vld [vmem:[#allocation2] sm:$0xfe]  ;;  %v5287_v30 = vld [vmem:[#allocation2 + $0x70] sm:$0x1]  ;;  %v6115_v61 = vld [vmem:[%s8813_s26] ss:$0 sm:$0xff] }
 0xced   : > { %6460 = vmatpush3.bf16.msra.mxu0 %v7083_v12  ;;  %v5300_v55 = vrot.slane %v5286_v29, 1  ;;  %v5303_v34 = vrot.slane %v5287_v30, 1  ;;  %v5282_v35 = vld [vmem:[#allocation2] sm:$0xff]  ;;  %v5291_v39 = vld [vmem:[#allocation2 + $0x70] sm:$0x3] }
 0xcee   : > { %6461 = vmatprep.subr.bf16.mxu0 %v7084_v13  ;;  %v7099_v37 = vld [vmem:[%s8812_s8 + $0x80] sm:$0xff]   ;;  %v5321_v48 = vrot.slane %v5291_v39, 2  ;;  %v5293_v52 = vld [vmem:[#allocation2 + $0x18] sm:$0x3]  ;;  %v5332_v43 = vpack.c.bf16 %v8580_v14, %v5282_v35 }
 0xcef   : > { %6644 = vmatpush3.bf16.msra.mxu1 %v7085_v15  ;;  %v5290_v38 = vld [vmem:[#allocation2] sm:$0xfc]  ;;  %v5302_v40 = vsel %vm1200_vm3, %v5300_v55, %v5301_v25  ;;  %v5304_v41 = vsel %vm1200_vm3, %v5301_v25, %v5303_v34  ;;  %v5326_v45 = vrot.slane %v5293_v52, 2  ;;  %v5289_v57 = vld [vmem:[#allocation2 + $0x18] sm:$0x1]  ;;  %v5588_v25 = vld [vmem:[%s8814_s28 + $0x10] sm:$0xff] }
 0xcf0   : > { %6645 = vmatprep.subr.bf16.mxu1 %v7088_v16  ;;  %v5318_v47 = vrot.slane %v5290_v38, 2  ;;  %v5292_v60 = vld [vmem:[#allocation2 + $0x40] sm:$0xfc]  ;;  %v5333_v49 = vpack.c.bf16 %v5304_v41, %v5302_v40  ;;  %v5322_v17 = vsel %vm1219_vm4, %v5319_v28, %v5321_v48  ;;  %v5308_v62 = vrot.slane %v5289_v57, 1 }
 0xcf1   : > { %6462 = vmatpush3.bf16.msra.mxu0 %v7086_v8  ;;  %v5323_v50 = vrot.slane %v5292_v60, 2  ;;  %v5288_v58 = vld [vmem:[#allocation2 + $0x40] sm:$0xfe]  ;;  %v5327_v54 = vsel %vm1219_vm4, %v5324_v24, %v5326_v45 }
 0xcf2   : > { %6463 = vmatprep.subr.bf16.mxu0 %v7087_v22  ;;  %v5320_v32 = vsel %vm1219_vm4, %v5318_v47, %v5319_v28  ;;  %v5305_v42 = vrot.slane %v5288_v58, 1  ;;  %5520 = vmatprep.mubr.bf16.mxu0 %v5333_v49  ;;  %v5309_v2 = vsel %vm1200_vm3, %v5306_v33, %v5308_v62  ;;  %v5284_v10 = vld [vmem:[#allocation2 + $0x40] sm:$0xff] }
 0xcf3   : > { %6646 = vmatpush3.bf16.msra.mxu1 %v7088_v16  ;;  %v5334_v0 = vpack.c.bf16 %v5322_v17, %v5320_v32  ;;  %v5325_v53 = vsel %vm1219_vm4, %v5323_v50, %v5324_v24  ;;  %v5335_v56 = vpack.c.bf16 %v8589_v9, %v5284_v10  ;;  %v5586_v11 = vld [vmem:[%s8814_s28] sm:$0xff]  ;;  %v5589_v24 = vld [vmem:[%s8814_s28 + $0x18] sm:$0xff] }
 0xcf4   : > { %6647 = vmatprep.subr.bf16.mxu1 %v7091_v19  ;;  %v5307_v44 = vsel %vm1200_vm3, %v5305_v42, %v5306_v33  ;;  %v5337_v51 = vpack.c.bf16 %v5327_v54, %v5325_v53 }
 0xcf5   : > { %6464 = vmatpush3.bf16.msra.mxu0 %v7089_v59  ;;  %v5336_v46 = vpack.c.bf16 %v5309_v2, %v5307_v44  ;;  %6655 = vmatprep.mubr.bf16.mxu1 %v5334_v0 }
 0xcf6   : > { %6465 = vmatprep.subr.bf16.mxu0 %v7090_v18 }
 0xcf7   : > { %6648 = vmatpush3.bf16.msra.mxu1 %v7091_v19  ;;  %v5587_v19 = vld [vmem:[%s8814_s28 + $0x8] sm:$0xff] }
 0xcf8   : > { %6649 = vmatprep.subr.bf16.mxu1 %v7094_v20 }
 0xcf9   : > { %6466 = vmatpush3.bf16.msra.mxu0 %v7092_v31 }
 0xcfa   : > { %6467 = vmatprep.subr.bf16.mxu0 %v7093_v21 }
 0xcfb   : > { %6650 = vmatpush3.bf16.msra.mxu1 %v7094_v20 }
 0xcfc   : > { %6651 = vmatprep.subr.bf16.mxu1 %v7097_v27 }
 0xcfd   : > { %6468 = vmatpush3.bf16.msra.mxu0 %v7095_v23 }
 0xcfe   : > { %6469 = vmatprep.subr.bf16.mxu0 %v7096_v26 }
 0xcff   : > { %6652 = vmatpush3.bf16.msra.mxu1 %v7097_v27 }
 0xd00   : > { %6653 = vmatprep.subr.bf16.mxu1 %v7099_v37 }
 0xd01   : > { %6470 = vmatpush3.bf16.msra.mxu0 %v7098_v36 }
 0xd03   : > { %6654 = vmatpush3.bf16.msra.mxu1 %v7099_v37 }
 0xd04   : > { %5521 = vmatmul.mubr.bf16.vlgmr.msra.gmra.mxu0 %v5332_v43 }
 0xd05   : > { %5528 = vmatprep.mubr.bf16.mxu0 %v5336_v46 }
 0xd06   : > { %6656 = vmatmul.mubr.bf16.vlgmr.msra.gmra.mxu1 %v5337_v51 }
 0xd0c   : > { %5529 = vmatmul.mubr.bf16.gmra.mxu0 %v5335_v56 }
 0xdc4   : > { %v6471_v63 = vpop.f32.mrf.mxu0 }
 0xdc6   : > { %v6472_v1 = vpop.f32.mrf.mxu0  ;;  %v6657_v5 = vpop.f32.mrf.mxu1 }
 0xdc7   : > { %v6473_v3 = vadd.f32 %v6472_v1, %v6471_v63 }
 0xdc8   : > { %v6474_v14 = vpop.f32.mrf.mxu0  ;;  %v5571_v6 = vpop.f32.mrf.mxu1 }
 0xdc9   : > { %v5523_v4 = vadd.f32 %v6473_v3, %v6115_v61 }
 0xdca   : > { %v6475_v7 = vpop.f32.mrf.mxu0  ;;  %v6658_v9 = vpop.f32.mrf.mxu1 }
 0xdcb   : > { %v6476_v12 = vadd.f32 %v6475_v7, %v6474_v14  ;;  %v5572_v13 = vadd.f32 %v5571_v6, %v5523_v4 }
 0xdcc   : > { %v6477_v15 = vpop.f32.mrf.mxu0  ;;  %v5574_v16 = vpop.f32.mrf.mxu1 }
 0xdcd   : > { %v5590_v8 = vadd.f32 %v5586_v11, %v5572_v13  ;;  %v5526_v22 = vadd.f32 %v6476_v12, %v6115_v61 }
 0xdce   : > { %v6478_v59 = vpop.f32.mrf.mxu0 }
 0xdcf   : > { %5594 = vst [vmem:[%s8815_s0] sm:$0xff] %v5590_v8  ;;  %v6479_v18 = vadd.f32 %v6478_v59, %v6477_v15  ;;  %v5575_v31 = vadd.f32 %v5574_v16, %v5526_v22 }
 0xdd0   : > { %v6480_v20 = vpop.f32.mrf.mxu0 }
 0xdd1   : > { %v5531_v21 = vadd.f32 %v6479_v18, %v6115_v61  ;;  %v5591_v23 = vadd.f32 %v5587_v19, %v5575_v31 }
 0xdd2   : > { %v6481_v26 = vpop.f32.mrf.mxu0 }
 0xdd3   : > { %v5580_v28 = vadd.f32 %v6657_v5, %v5531_v21  ;;  %5595 = vst [vmem:[%s8815_s0 + $0x8] sm:$0xff] %v5591_v23  ;;  %v6482_v27 = vadd.f32 %v6481_v26, %v6480_v20 }
 0xdd5   : > { %v5592_v29 = vadd.f32 %v5588_v25, %v5580_v28  ;;  %v5534_v30 = vadd.f32 %v6482_v27, %v6115_v61 }
 0xdd7   : > { %5596 = vst [vmem:[%s8815_s0 + $0x10] sm:$0xff] %v5592_v29  ;;  %v5583_v55 = vadd.f32 %v6658_v9, %v5534_v30 }
 0xdd9   : > { %v5593_v34 = vadd.f32 %v5589_v24, %v5583_v55 }
 0xddb   : > { %5597 = vst [vmem:[%s8815_s0 + $0x18] sm:$0xff] %v5593_v34 }
 0xddc PF: > { %s8816_s28 = sld [smem:[#allocation16_spill]] }
 0xddd   : > { %s8817_s5 = sld [smem:[#allocation14_spill]] }
 0xdde   : > { %s8818_s26 = sld [smem:[#allocation15_spill]] }
 0xddf   : > { %s8819_s27 = sld [smem:[#allocation17_spill]] }
 0xde2   : > { %p40_p13 = scmp.ge.s32.totalorder %s8816_s28, 4  }
 0xde4   :  { %42 = sbr.rel (!%p40_p13) target bundleno = 29 (0x1d), region = 236 }
 0xde9   :  { %5609 = vsyncpa [#allocation5], 1 }
 0xdea   :  { %5611 = vsyncpa [#allocation5 + $0x1], 1 }
 0xdeb   :  { %5612 = vsyncpa [#allocation7], 1 }
 0xdec   :  { %5614 = vsyncpa [#allocation7 + $0x1], 1 }
 0xded   :  { %5615 = vsyncpa [#allocation10], 1 }
 0xdee   :  { %5617 = vsyncpa [#allocation10 + $0x1], 1 }

</bundles_post_ra>
